<compile_context>
chip_gen: v7x
topology: tpu7x:2x2x1
jax: 0.10.0
libtpu: 0.0.40
codegen_flags: <defaults>
</compile_context>

<pallas_src>
import jax
import jax.numpy as jnp
from jax.experimental import pallas as pl
from jax.experimental.pallas import tpu as pltpu

IMAGENET_MEAN = jnp.array([0.485, 0.456, 0.406], jnp.float32)
IMAGENET_STD = jnp.array([0.229, 0.224, 0.225], jnp.float32)
RESIZE_HW = (32, 32)   # original module resizes to (224, 224); small stand-in

C1 = 32                # conv1 output channels
C2 = 64                # conv2 output channels (pooled feature size)
TAPS = 9               # 3x3 conv2 taps
K1 = 3 * 3 * 3         # conv1 patch length (cin * kh * kw = 27)
KTAP = K1 + 1          # + per-tap bias/validity column = 28
K2 = TAPS * KTAP       # 252 useful contraction columns
K2P = 256              # padded fused contraction dim (multiple of 128 lanes)
IMG_BLOCK = 8          # images per grid step -> M = IMG_BLOCK * 64 = 512 matmul rows


# ------------------------------------------------------------------ kernel ---
def _fused_stem_kernel(p2_ref, w1_ref, w2_ref, b2_ref, o_ref):
    """Fused conv1(+folded normalize/bias)+ReLU -> conv2+ReLU -> per-image mean/std.

    p2_ref: (IMG_BLOCK*M2, K2P) bf16  fused patches, 9 conv1 taps along K, each tap
                                      block = [27 pixels, validity/bias col, pad]
    w1_ref: (K2P, TAPS*C1)      bf16  block-diagonal conv1 weight (normalize + bias folded)
    w2_ref: (TAPS*C1, C2)       bf16  conv2 weight with taps flattened along K
    b2_ref: (1, C2)             f32
    o_ref : (IMG_BLOCK, 2*C2)   f32   lanes [0,C2)=mean, [C2,2*C2)=unbiased std
    """
    nimg = o_ref.shape[0]

    # conv1 on all taps / positions in ONE matmul; conv2 zero-padding positions come
    # out exactly 0 because their patch AND validity/bias column are 0.
    a1 = jnp.dot(p2_ref[...], w1_ref[...], preferred_element_type=jnp.float32)
    a1 = jnp.maximum(a1, 0.0).astype(jnp.bfloat16)               # (M, TAPS*C1)

    # conv2 as ONE K = TAPS*C1 = 288 matmul.
    feat = jnp.dot(a1, w2_ref[...], preferred_element_type=jnp.float32)
    feat = jnp.maximum(feat + b2_ref[...], 0.0)                  # (M, C2)

    # Global mean / unbiased-std pooling per image (feat stays resident: two-pass var).
    c2 = feat.shape[-1]
    m2 = feat.shape[0] // nimg
    f = feat.reshape(nimg, m2, c2)
    mean = jnp.sum(f, axis=1) * (1.0 / m2)                       # (nimg, C2)
    diff = f - mean[:, None, :]
    var = jnp.sum(diff * diff, axis=1) * (1.0 / max(m2 - 1, 1))

    # Lane-dense single store (128 lanes): mean | std.
    o_ref[...] = jnp.concatenate([mean, jnp.sqrt(var)], axis=-1)


def _fused_stem_call(p2, w1bd, w2f, b2r, num_blocks, m_block):
    # TODO(synk): at the real 224x224 size, also tile the conv2 spatial axis (512-1024
    # rows per block) so a single block never brushes v5e's 16 MiB scoped-VMEM default.
    return pl.pallas_call(
        _fused_stem_kernel,
        out_shape=jax.ShapeDtypeStruct((num_blocks * IMG_BLOCK, 2 * C2), jnp.float32),
        grid=(num_blocks,),
        in_specs=[
            pl.BlockSpec((m_block, K2P), lambda g: (g, 0)),
            pl.BlockSpec(w1bd.shape, lambda g: (0, 0)),
            pl.BlockSpec(w2f.shape, lambda g: (0, 0)),
            pl.BlockSpec(b2r.shape, lambda g: (0, 0)),
        ],
        out_specs=pl.BlockSpec((IMG_BLOCK, 2 * C2), lambda g: (g, 0)),
        compiler_params=pltpu.CompilerParams(dimension_semantics=("parallel",)),
    )(p2, w1bd, w2f, b2r)


# -------------------------------------------------- XLA-side patch building ---
def _im2col_grid(x_chw, kh, kw, *, stride, padding):
    # x: (C, H, W) -> (Ho, Wo, C*kh*kw) with K-order c*(kh*kw) + i*kw + j
    c, h, w = x_chw.shape
    xp = jnp.pad(x_chw, ((0, 0), (padding, padding), (padding, padding)))
    ho = (h + 2 * padding - kh) // stride + 1
    wo = (w + 2 * padding - kw) // stride + 1
    cols = []
    for i in range(kh):
        for j in range(kw):
            cols.append(xp[:, i:i + stride * ho:stride, j:j + stride * wo:stride])
    p = jnp.stack(cols, axis=0)                                # (kh*kw, C, Ho, Wo)
    p = p.transpose(2, 3, 1, 0).reshape(ho, wo, c * kh * kw)   # (Ho, Wo, K)
    return p, ho, wo


def _fused_conv_patches(pgrid, kh, kw, *, stride, padding):
    """conv2-level patches with the 9 conv1 taps concatenated along K.

    Each tap block carries a validity column (1 inside the image, 0 at conv2
    zero-padding positions); pad taps are all-zero so conv1+bias+ReLU yields 0.
    """
    ho1, wo1, k1 = pgrid.shape
    ho2 = (ho1 + 2 * padding - kh) // stride + 1
    wo2 = (wo1 + 2 * padding - kw) // stride + 1
    pg = jnp.pad(pgrid, ((padding, padding), (padding, padding), (0, 0)))
    oh = jnp.arange(ho2)[:, None]
    ow = jnp.arange(wo2)[None, :]
    blocks = []
    for i in range(kh):
        for j in range(kw):
            sl = pg[i:i + stride * ho2:stride, j:j + stride * wo2:stride, :]
            r = stride * oh + i - padding
            c = stride * ow + j - padding
            valid = ((r >= 0) & (r < ho1) & (c >= 0) & (c < wo1)).astype(jnp.float32)
            blocks.append(jnp.concatenate(
                [sl.reshape(ho2 * wo2, k1), valid.reshape(ho2 * wo2, 1)], axis=-1))
    return jnp.concatenate(blocks, axis=-1), ho2, wo2           # (M2, TAPS*KTAP)


def _pack_weights(w1, b1, w2, b2):
    # Fold transforms.Normalize(mean, std) into conv1 weights/bias.
    inv_std = 1.0 / IMAGENET_STD
    w1f = w1 * inv_std[None, :, None, None]
    b1f = b1 - jnp.sum(w1 * (IMAGENET_MEAN * inv_std)[None, :, None, None],
                       axis=(1, 2, 3))

    # Per-tap block: rows 0..26 = conv1 weight, row 27 = bias (picked up by the
    # validity column). Block-diagonal over the 9 taps; zero-pad K to K2P.
    blk = jnp.concatenate([w1f.reshape(C1, K1).T, b1f[None, :]], axis=0)   # (28, 32)
    w1bd = jnp.einsum("ab,ij->aibj", jnp.eye(TAPS, dtype=jnp.float32), blk)
    w1bd = w1bd.reshape(TAPS * KTAP, TAPS * C1)                            # (252, 288)
    w1bd = jnp.pad(w1bd, ((0, K2P - TAPS * KTAP), (0, 0))).astype(jnp.bfloat16)

    # conv2 weight with taps flattened along K (row = tap*C1 + c1), matching a1 columns.
    w2f = jnp.transpose(w2, (2, 3, 1, 0)).reshape(TAPS * C1, C2).astype(jnp.bfloat16)
    b2r = b2.reshape(1, C2).astype(jnp.float32)
    return w1bd, w2f, b2r


# ----------------------------------------------------------------- module ---
def init_params(key):
    k1, k2, k3, k4 = jax.random.split(key, 4)
    w1 = jax.random.normal(k1, (C1, 3, 3, 3), jnp.float32) * (2.0 / (3 * 9)) ** 0.5
    b1 = 0.2 * jax.random.normal(k3, (C1,), jnp.float32)
    w2 = jax.random.normal(k2, (C2, C1, 3, 3), jnp.float32) * (2.0 / (C1 * 9)) ** 0.5
    b2 = 0.2 * jax.random.normal(k4, (C2,), jnp.float32)
    return {"w1": w1, "b1": b1, "w2": w2, "b2": b2}


def feature_extractor_forward(images_hwc, params):
    """Batched FeatureExtractor.forward: (N, H, W, 3) uint8 -> two (N, C2, 1, 1)."""
    if images_hwc.ndim == 3:
        images_hwc = images_hwc[None]
    n = images_hwc.shape[0]

    # transforms.ToTensor(): HWC uint8 [0,255] -> CHW float32 [0,1]
    x = images_hwc.astype(jnp.float32) / 255.0
    x = jnp.transpose(x, (0, 3, 1, 2))                            # (N, 3, H, W)
    # transforms.Resize -> small stand-in (glue, not the hot path)
    # TODO(synk): jax.image.resize(bilinear) is not bit-identical to torchvision Resize.
    x = jax.image.resize(x, (n, 3) + RESIZE_HW, method="bilinear")

    # conv1 im2col once per image, then conv2-level patches with taps along K.
    # TODO(synk): at the real 224x224 size, remove the 2.25x conv1 patch duplication
    # across conv2 taps by keeping conv1 activations resident in VMEM and slicing taps
    # in-kernel; negligible at this demo size (review item 3).
    def per_image(xi):
        pgrid, _, _ = _im2col_grid(xi, 3, 3, stride=2, padding=1)
        p2_i, _, _ = _fused_conv_patches(pgrid, 3, 3, stride=2, padding=1)
        return p2_i                                               # (M2, TAPS*KTAP)

    p2 = jax.vmap(per_image)(x)                                   # (N, M2, 252)
    m2 = p2.shape[1]
    p2 = p2.reshape(n * m2, TAPS * KTAP)
    p2 = jnp.pad(p2, ((0, 0), (0, K2P - TAPS * KTAP)))            # lane pad 252 -> 256

    # Pad the batch to a multiple of IMG_BLOCK (zero rows pool to finite values; sliced off).
    num_blocks = -(-n // IMG_BLOCK)
    pad_rows = num_blocks * IMG_BLOCK * m2 - n * m2
    if pad_rows:
        p2 = jnp.pad(p2, ((0, pad_rows), (0, 0)))
    p2 = p2.astype(jnp.bfloat16)

    w1bd, w2f, b2r = _pack_weights(params["w1"], params["b1"], params["w2"], params["b2"])

    out = _fused_stem_call(p2, w1bd, w2f, b2r, num_blocks, IMG_BLOCK * m2)
    out = out[:n]                                                 # (N, 2*C2)
    features_mean = out[:, :C2].reshape(n, C2, 1, 1)              # F.adaptive_avg_pool2d(., 1)
    features_std = out[:, C2:].reshape(n, C2, 1, 1)               # global_std_pool2d (unbiased)
    return features_mean, features_std


# ----------------------------------------------------------- f32 reference ---
def _reference_forward(image_hwc, params):
    """Pure-JAX f32 reference for one image (unfused, normalize applied explicitly)."""
    x = image_hwc.astype(jnp.float32) / 255.0
    x = jnp.transpose(x, (2, 0, 1))
    x = jax.image.resize(x, (3,) + RESIZE_HW, method="bilinear")
    x = (x - IMAGENET_MEAN[:, None, None]) / IMAGENET_STD[:, None, None]
    y = jax.lax.conv_general_dilated(x[None], params["w1"], (2, 2), [(1, 1), (1, 1)],
                                     dimension_numbers=("NCHW", "OIHW", "NCHW"))
    y = jnp.maximum(y + params["b1"][None, :, None, None], 0.0)
    z = jax.lax.conv_general_dilated(y, params["w2"], (2, 2), [(1, 1), (1, 1)],
                                     dimension_numbers=("NCHW", "OIHW", "NCHW"))
    z = jnp.maximum(z + params["b2"][None, :, None, None], 0.0)
    zf = z.reshape(C2, -1)
    return jnp.mean(zf, axis=1), jnp.std(zf, axis=1, ddof=1)


if __name__ == "__main__":
    key = jax.random.PRNGKey(0)
    pkey, ikey = jax.random.split(key)
    params = init_params(pkey)

    # Small batch of HWC uint8 "images" (ToTensor input convention), values in [0, 255].
    N = 16
    images = jax.random.randint(ikey, (N, 16, 16, 3), 0, 256, dtype=jnp.int32).astype(
        jnp.uint8)

    features_mean, features_std = jax.jit(feature_extractor_forward)(images, params)
    jax.block_until_ready((features_mean, features_std))

    assert features_mean.shape == (N, C2, 1, 1)
    assert features_std.shape == (N, C2, 1, 1)
    assert bool(jnp.all(jnp.isfinite(features_mean)))
    assert bool(jnp.all(jnp.isfinite(features_std)))

    # Loose check vs. an f32 reference (kernel matmuls are bf16 with f32 accumulation).
    ref_mean, ref_std = jax.vmap(lambda im: _reference_forward(im, params))(images)
    ref_mean = ref_mean.reshape(N, C2, 1, 1)
    ref_std = ref_std.reshape(N, C2, 1, 1)
    assert float(jnp.max(jnp.abs(features_mean - ref_mean))) < 0.3
    assert float(jnp.max(jnp.abs(features_std - ref_std))) < 0.3

    print("KERNEL_OK")
</pallas_src>

<mosaic_0001>
module attributes {stable_mosaic.version = 11 : i64} {
  func.func @_fused_stem_kernel(%arg0: i32, %arg1: memref<512x256xbf16, #tpu.memory_space<vmem>>, %arg2: memref<256x288xbf16, #tpu.memory_space<vmem>>, %arg3: memref<288x64xbf16, #tpu.memory_space<vmem>>, %arg4: memref<1x64xf32, #tpu.memory_space<vmem>>, %arg5: memref<8x128xf32, #tpu.memory_space<vmem>>) attributes {dimension_semantics = [#tpu.dimension_semantics<parallel>], iteration_bounds = array<i64: 2>, scalar_prefetch = 0 : i64, scratch_operands = 0 : i64, tpu.core_type = #tpu.core_type<tc>, window_params = [{transform_indices = @transform_0, window_bounds = array<i64: 512, 256>}, {pipeline_mode = #tpu.pipeline_mode<synchronous>, transform_indices = @transform_1, window_bounds = array<i64: 256, 288>}, {pipeline_mode = #tpu.pipeline_mode<synchronous>, transform_indices = @transform_2, window_bounds = array<i64: 288, 64>}, {pipeline_mode = #tpu.pipeline_mode<synchronous>, transform_indices = @transform_3, window_bounds = array<i64: 1, 64>}, {transform_indices = @transform_4, window_bounds = array<i64: 8, 128>}]} {
    %c0 = arith.constant 0 : index
    %c0_0 = arith.constant 0 : index
    %0 = vector.load %arg1[%c0, %c0_0] : memref<512x256xbf16, #tpu.memory_space<vmem>>, vector<512x256xbf16>
    %c0_1 = arith.constant 0 : index
    %c0_2 = arith.constant 0 : index
    %1 = vector.load %arg2[%c0_1, %c0_2] : memref<256x288xbf16, #tpu.memory_space<vmem>>, vector<256x288xbf16>
    %cst = arith.constant dense<0.000000e+00> : vector<512x288xf32>
    %2 = tpu.matmul %0, %1, %cst {dimension_numbers = #tpu.dot_dimension_numbers<[1], [0], [0], [1], [0, 0, 1, 1], [], []>} : vector<512x256xbf16>, vector<256x288xbf16>, vector<512x288xf32> -> vector<512x288xf32>
    %cst_3 = arith.constant 0.000000e+00 : f32
    %3 = vector.broadcast %cst_3 : f32 to vector<512x288xf32>
    %4 = arith.maximumf %2, %3 : vector<512x288xf32>
    %5 = arith.truncf %4 : vector<512x288xf32> to vector<512x288xbf16>
    %c0_4 = arith.constant 0 : index
    %c0_5 = arith.constant 0 : index
    %6 = vector.load %arg3[%c0_4, %c0_5] : memref<288x64xbf16, #tpu.memory_space<vmem>>, vector<288x64xbf16>
    %cst_6 = arith.constant dense<0.000000e+00> : vector<512x64xf32>
    %7 = tpu.matmul %5, %6, %cst_6 {dimension_numbers = #tpu.dot_dimension_numbers<[1], [0], [0], [1], [0, 0, 1, 1], [], []>} : vector<512x288xbf16>, vector<288x64xbf16>, vector<512x64xf32> -> vector<512x64xf32>
    %c0_7 = arith.constant 0 : index
    %c0_8 = arith.constant 0 : index
    %8 = vector.load %arg4[%c0_7, %c0_8] : memref<1x64xf32, #tpu.memory_space<vmem>>, vector<1x64xf32>
    %9 = vector.broadcast %8 : vector<1x64xf32> to vector<512x64xf32>
    %10 = arith.addf %7, %9 : vector<512x64xf32>
    %cst_9 = arith.constant 0.000000e+00 : f32
    %11 = vector.broadcast %cst_9 : f32 to vector<512x64xf32>
    %12 = arith.maximumf %10, %11 : vector<512x64xf32>
    %13 = vector.shape_cast %12 : vector<512x64xf32> to vector<8x64x64xf32>
    %cst_10 = arith.constant dense<0.000000e+00> : vector<8x64xf32>
    %14 = vector.multi_reduction <add>, %13, %cst_10 [1] : vector<8x64x64xf32> to vector<8x64xf32>
    %cst_11 = arith.constant 1.562500e-02 : f32
    %15 = vector.broadcast %cst_11 : f32 to vector<8x64xf32>
    %16 = arith.mulf %14, %15 : vector<8x64xf32>
    %17 = vector.shape_cast %16 : vector<8x64xf32> to vector<8x1x64xf32>
    %18 = vector.broadcast %17 : vector<8x1x64xf32> to vector<8x64x64xf32>
    %19 = arith.subf %13, %18 : vector<8x64x64xf32>
    %20 = arith.mulf %19, %19 : vector<8x64x64xf32>
    %cst_12 = arith.constant dense<0.000000e+00> : vector<8x64xf32>
    %21 = vector.multi_reduction <add>, %20, %cst_12 [1] : vector<8x64x64xf32> to vector<8x64xf32>
    %cst_13 = arith.constant 0.0158730168 : f32
    %22 = vector.broadcast %cst_13 : f32 to vector<8x64xf32>
    %23 = arith.mulf %21, %22 : vector<8x64xf32>
    %24 = math.sqrt %23 : vector<8x64xf32>
    %25 = tpu.concatenate %16, %24 in 1 : vector<8x64xf32>, vector<8x64xf32> -> vector<8x128xf32>
    %c0_14 = arith.constant 0 : index
    %c0_15 = arith.constant 0 : index
    %26 = vector.load %arg5[%c0_14, %c0_15] : memref<8x128xf32, #tpu.memory_space<vmem>>, vector<8x128xf32>
    tpu.vector_store %arg5[%c0_14, %c0_15], %25 {strides = array<i32>} : memref<8x128xf32, #tpu.memory_space<vmem>>, vector<8x128xf32>,
    return
  }
  func.func @transform_0(%arg0: i32) -> (i32, i32) {
    %c0_i32 = arith.constant 0 : i32
    %c0_i32_0 = arith.constant 0 : i32
    return %arg0, %c0_i32 : i32, i32
  }
  func.func @transform_1(%arg0: i32) -> (i32, i32) {
    %c0_i32 = arith.constant 0 : i32
    %c0_i32_0 = arith.constant 0 : i32
    %c0_i32_1 = arith.constant 0 : i32
    return %c0_i32, %c0_i32_0 : i32, i32
  }
  func.func @transform_2(%arg0: i32) -> (i32, i32) {
    %c0_i32 = arith.constant 0 : i32
    %c0_i32_0 = arith.constant 0 : i32
    %c0_i32_1 = arith.constant 0 : i32
    return %c0_i32, %c0_i32_0 : i32, i32
  }
  func.func @transform_3(%arg0: i32) -> (i32, i32) {
    %c0_i32 = arith.constant 0 : i32
    %c0_i32_0 = arith.constant 0 : i32
    %c0_i32_1 = arith.constant 0 : i32
    return %c0_i32, %c0_i32_0 : i32, i32
  }
  func.func @transform_4(%arg0: i32) -> (i32, i32) {
    %c0_i32 = arith.constant 0 : i32
    %c0_i32_0 = arith.constant 0 : i32
    return %arg0, %c0_i32 : i32, i32
  }
}

</mosaic_0001>

<bundles_post_ra>
// kernel: feature_extractor_forward.1
= control target key start
LH: loop header
LB: loop body
LE: loop exit
PB: predicated region body
PF: predicated region fallthrough
CT: control target
= control target key end

     0   :  { %s3909_s15 = smov 0   ;;  %s5413_s0 = inlined_call_operand.vmem [shape: bf16[1024,256], index: 0, kind: input, shape index: {}]   ;;  %s5414_s1 = inlined_call_operand.vmem [shape: bf16[256,288], index: 1, kind: input, shape index: {}]   ;;  %s5415_s2 = inlined_call_operand.vmem [shape: bf16[288,64], index: 2, kind: input, shape index: {}]   ;;  %s5416_s3 = inlined_call_operand.vmem [shape: f32[1,64], index: 3, kind: input, shape index: {}]   ;;  %s5417_s4 = inlined_call_operand.vmem [shape: f32[16,128], index: 4, kind: output, shape index: {}]  }
   0x1 LB: > { %s3915_s16 = sadd.s32 4294967295, %s3880_s15   ;;  %p3363_p0 = scmp.ge.s32.totalorder %s3880_s15, 1  ;;  %s3880_s15 = sphi %s3909_s15, %s14_s15  }
   0x2   : > { %p164_p1 = scmp.lt.s32.totalorder %s3880_s15, 3 }
   0x4   : > { %p165_p2 = pnand %p3363_p0, %p164_p1 }
   0x5   : > { %v3678_v0 = vld [vmem:[%s5414_s1 + $0x4] ss:$12 sps:$4 sm:$0xff] (!%p165_p2)   ;;  %v3680_v1 = vld [vmem:[%s5414_s1] ss:$12 sps:$4 sm:$0xff] (!%p165_p2)   ;;  %v3681_v2 = vld [vmem:[%s5414_s1 + $0x1c] ss:$12 sps:$4 sm:$0xff] (!%p165_p2)  }
   0x6   : > { %168 = sbr.rel (%p165_p2) target bundleno = 1006 (0x3ee), region = 36  ;;  %906 = vmatprep.subr.bf16.mxu0 (!%p165_p2), %v3678_v0  ;;  %3636 = vmatprep.subr.bf16.mxu1 (!%p165_p2), %v3678_v0  ;;  %v3683_v3 = vld [vmem:[%s5414_s1 + $0x18] ss:$12 sps:$4 sm:$0xff] (!%p165_p2)   ;;  %v3684_v4 = vld [vmem:[%s5414_s1 + $0x34] ss:$12 sps:$4 sm:$0xff] (!%p165_p2)   ;;  %s3364_s27 = sshll.u32 (!%p165_p2), %s3915_s16, 6 }
   0x7   : > { %907 = vmatpush1.bf16.msra.mxu0 (!%p165_p2), %v3680_v1  ;;  %3652 = vmatpush1.bf16.msra.mxu1 (!%p165_p2), %v3680_v1  ;;  %v3686_v5 = vld [vmem:[%s5414_s1 + $0x30] ss:$12 sps:$4 sm:$0xff] (!%p165_p2)   ;;  %v3687_v6 = vld [vmem:[%s5414_s1 + $0x4c] ss:$12 sps:$4 sm:$0xff] (!%p165_p2)   ;;  %p191_p3 = scmp.lt.s32.totalorder (!%p165_p2), %s3364_s27, 127  ;;  %v3882_v38 = vmov (!%p165_p2), 0  }
   0x8   : > { %908 = vmatprep.subr.bf16.mxu0 (!%p165_p2), %v3681_v2  ;;  %3637 = vmatprep.subr.bf16.mxu1 (!%p165_p2), %v3681_v2  ;;  %v3689_v7 = vld [vmem:[%s5414_s1 + $0x48] ss:$12 sps:$4 sm:$0xff] (!%p165_p2)   ;;  %v3690_v8 = vld [vmem:[%s5414_s1 + $0x64] ss:$12 sps:$4 sm:$0xff] (!%p165_p2)   ;;  %v3692_v9 = vld [vmem:[%s5414_s1 + $0x60] ss:$12 sps:$4 sm:$0xff] (!%p165_p2)  }
   0x9   : > { %v3693_v10 = vld [vmem:[%s5414_s1 + $0x7c] ss:$12 sps:$4 sm:$0xff] (!%p165_p2)   ;;  %v3695_v11 = vld [vmem:[%s5414_s1 + $0x78] ss:$12 sps:$4 sm:$0xff] (!%p165_p2)   ;;  %v3696_v12 = vld [vmem:[%s5414_s1 + $0x94] ss:$12 sps:$4 sm:$0xff] (!%p165_p2)  }
   0xa   : > { %v3698_v14 = vld [vmem:[%s5414_s1 + $0x90] ss:$12 sps:$4 sm:$0xff] (!%p165_p2)   ;;  %v3699_v16 = vld [vmem:[%s5414_s1 + $0xac] ss:$12 sps:$4 sm:$0xff] (!%p165_p2)   ;;  %v3701_v17 = vld [vmem:[%s5414_s1 + $0xa8] ss:$12 sps:$4 sm:$0xff] (!%p165_p2)  }
   0xb   : > { %909 = vmatpush1.bf16.msra.mxu0 (!%p165_p2), %v3683_v3  ;;  %3653 = vmatpush1.bf16.msra.mxu1 (!%p165_p2), %v3683_v3  ;;  %v3702_v18 = vld [vmem:[%s5414_s1 + $0xc4] ss:$12 sps:$4 sm:$0xff] (!%p165_p2)   ;;  %v3704_v19 = vld [vmem:[%s5414_s1 + $0xc0] ss:$12 sps:$4 sm:$0xff] (!%p165_p2)   ;;  %v3705_v20 = vld [vmem:[%s5414_s1 + $0xdc] ss:$12 sps:$4 sm:$0xff] (!%p165_p2)  }
   0xc   : > { %910 = vmatprep.subr.bf16.mxu0 (!%p165_p2), %v3684_v4  ;;  %3638 = vmatprep.subr.bf16.mxu1 (!%p165_p2), %v3684_v4  ;;  %v3707_v21 = vld [vmem:[%s5414_s1 + $0xd8] ss:$12 sps:$4 sm:$0xff] (!%p165_p2)   ;;  %v3708_v22 = vld [vmem:[%s5414_s1 + $0xf4] ss:$12 sps:$4 sm:$0xff] (!%p165_p2)   ;;  %v3710_v23 = vld [vmem:[%s5414_s1 + $0xf0] ss:$12 sps:$4 sm:$0xff] (!%p165_p2)  }
   0xd   : > { %s5421_s27 = smov (!%p191_p3, %s3364_s27), 127  ;;  %v3711_v24 = vld [vmem:[%s5414_s1 + $0x10c] ss:$12 sps:$4 sm:$0xff]   ;;  %v3713_v25 = vld [vmem:[%s5414_s1 + $0x108] ss:$12 sps:$4 sm:$0xff]   ;;  %v3802_v40 = vld [vmem:[%s5415_s2] sm:$0xff]  }
   0xe   : > { %s3533_s14 = sshll.u32 %s5421_s27, 3  ;;  %v3714_v26 = vld [vmem:[%s5414_s1 + $0x124] ss:$12 sps:$4 sm:$0xff]   ;;  %v3716_v27 = vld [vmem:[%s5414_s1 + $0x120] ss:$12 sps:$4 sm:$0xff]   ;;  %v3820_v55 = vld [vmem:[%s5415_s2 + $0x18] sm:$0xff]  }
   0xf   : > { %911 = vmatpush1.bf16.msra.mxu0 %v3686_v5  ;;  %3654 = vmatpush1.bf16.msra.mxu1 %v3686_v5  ;;  %s3959_s21 = scalar_lea.vmem %s5413_s0, %s3533_s14  ;;  %v3717_v28 = vld [vmem:[%s5414_s1 + $0x13c] ss:$12 sps:$4 sm:$0xff]   ;;  %v3719_v29 = vld [vmem:[%s5414_s1 + $0x138] ss:$12 sps:$4 sm:$0xff]   ;;  %v3720_v30 = vld [vmem:[%s5414_s1 + $0x154] ss:$12 sps:$4 sm:$0xff]  }
  0x10   : > { %912 = vmatprep.subr.bf16.mxu0 %v3687_v6  ;;  %3639 = vmatprep.subr.bf16.mxu1 %v3687_v6  ;;  %v3965_v13 = vld [vmem:[%s3959_s21 + $0x4] ss:$8 sps:$4 sm:$0xff]   ;;  %v3722_v31 = vld [vmem:[%s5414_s1 + $0x150] ss:$12 sps:$4 sm:$0xff]   ;;  %v3725_v33 = vld [vmem:[%s5414_s1 + $0x168] ss:$12 sps:$4 sm:$0xff]  }
  0x11   : > { %v3731_v15 = vld [vmem:[%s3959_s21 + $0x184] ss:$8 sps:$4 sm:$0xff]   ;;  %938 = vmatprep.mubr.bf16.mxu0 %v3965_v13  ;;  %v4027_v34 = vld [vmem:[%s3959_s21] ss:$8 sps:$4 sm:$0xff]   ;;  %v4036_v37 = vld [vmem:[%s3959_s21 + $0x14] ss:$8 sps:$4 sm:$0xff]  }
  0x12   : > { %1178 = vmatprep.mubr.bf16.mxu1 %v3731_v15  ;;  %v3723_v32 = vld [vmem:[%s5414_s1 + $0x16c] ss:$12 sps:$4 sm:$0xff]   ;;  %v4030_v35 = vld [vmem:[%s3959_s21 + $0x180] ss:$8 sps:$4 sm:$0xff]   ;;  %v4040_v39 = vld [vmem:[%s3959_s21 + $0x194] ss:$8 sps:$4 sm:$0xff]  }
  0x13   : > { %913 = vmatpush1.bf16.msra.mxu0 %v3689_v7  ;;  %3655 = vmatpush1.bf16.msra.mxu1 %v3689_v7  ;;  %v3732_v36 = vld [vmem:[%s5414_s1 + $0x8] ss:$12 sps:$4 sm:$0xff]   ;;  %v3733_v41 = vld [vmem:[%s5414_s1 + $0x20] ss:$12 sps:$4 sm:$0xff]   ;;  %v4055_v42 = vld [vmem:[%s3959_s21 + $0x10] ss:$8 sps:$4 sm:$0xff]  }
  0x14   : > { %914 = vmatprep.subr.bf16.mxu0 %v3690_v8  ;;  %3640 = vmatprep.subr.bf16.mxu1 %v3690_v8  ;;  %v4058_v43 = vld [vmem:[%s3959_s21 + $0x190] ss:$8 sps:$4 sm:$0xff]   ;;  %v3809_v44 = vld [vmem:[%s5415_s2 + $0x8] sm:$0xff]   ;;  %v4095_v53 = vld [vmem:[%s3959_s21 + $0x34] ss:$8 sps:$4 sm:$0xff]   ;;  %vm1987_vm0 = vcmask 261120  }
  0x15   : > { %v3740_v45 = vld [vmem:[%s5414_s1 + $0x38] ss:$12 sps:$4 sm:$0xff]   ;;  %v3813_v48 = vld [vmem:[%s5415_s2 + $0x10] sm:$0xff]   ;;  %v4086_v50 = vld [vmem:[%s3959_s21 + $0x20] ss:$8 sps:$4 sm:$0xff]   ;;  %vm2726_vm1 = vcmask 523264  }
  0x16   : > { %v4068_v46 = vld [vmem:[%s3959_s21 + $0x24] ss:$8 sps:$4 sm:$0xff]   ;;  %v3741_v49 = vld [vmem:[%s5414_s1 + $0x50] ss:$12 sps:$4 sm:$0xff]   ;;  %v4089_v51 = vld [vmem:[%s3959_s21 + $0x1a0] ss:$8 sps:$4 sm:$0xff]  }
  0x17   : > { %915 = vmatpush1.bf16.msra.mxu0 %v3692_v9  ;;  %3656 = vmatpush1.bf16.msra.mxu1 %v3692_v9  ;;  %v4072_v47 = vld [vmem:[%s3959_s21 + $0x1a4] ss:$8 sps:$4 sm:$0xff]   ;;  %v3748_v52 = vld [vmem:[%s5414_s1 + $0x68] ss:$12 sps:$4 sm:$0xff]   ;;  %v4118_v58 = vld [vmem:[%s3959_s21 + $0x30] ss:$8 sps:$4 sm:$0xff]  }
  0x18   : > { %916 = vmatprep.subr.bf16.mxu0 %v3693_v10  ;;  %3641 = vmatprep.subr.bf16.mxu1 %v3693_v10  ;;  %v4099_v54 = vld [vmem:[%s3959_s21 + $0x1b4] ss:$8 sps:$4 sm:$0xff]   ;;  %v3749_v56 = vld [vmem:[%s5414_s1 + $0x80] ss:$12 sps:$4 sm:$0xff]   ;;  %v4121_v59 = vld [vmem:[%s3959_s21 + $0x1b0] ss:$8 sps:$4 sm:$0xff]  }
  0x19   : > { %v3824_v57 = vld [vmem:[%s5415_s2 + $0x20] sm:$0xff]   ;;  %v3831_v63 = vld [vmem:[%s5415_s2 + $0x28] sm:$0xff]   ;;  %v3757_v0 = vld [vmem:[%s5414_s1 + $0xb0] ss:$12 sps:$4 sm:$0xff]   ;;  %vm3271_vm2 = vcmask 1041409   ;;  %vm3273_vm3 = vcmask 1042434  }
  0x1a   : > { %v3756_v60 = vld [vmem:[%s5414_s1 + $0x98] ss:$12 sps:$4 sm:$0xff]   ;;  %v4147_v1 = vld [vmem:[%s3959_s21 + $0x40] ss:$8 sps:$4 sm:$0xff]   ;;  %v4156_v4 = vld [vmem:[%s3959_s21 + $0x54] ss:$8 sps:$4 sm:$0xff]  }
  0x1b   : > { %917 = vmatpush1.bf16.msra.mxu0 %v3695_v11  ;;  %3657 = vmatpush1.bf16.msra.mxu1 %v3695_v11  ;;  %v4127_v61 = vld [vmem:[%s3959_s21 + $0x44] ss:$8 sps:$4 sm:$0xff]   ;;  %v4150_v2 = vld [vmem:[%s3959_s21 + $0x1c0] ss:$8 sps:$4 sm:$0xff]   ;;  %v4161_v5 = vld [vmem:[%s3959_s21 + $0x1d4] ss:$8 sps:$4 sm:$0xff]  }
  0x1c   : > { %918 = vmatprep.subr.bf16.mxu0 %v3696_v12  ;;  %3642 = vmatprep.subr.bf16.mxu1 %v3696_v12  ;;  %v4130_v62 = vld [vmem:[%s3959_s21 + $0x1c4] ss:$8 sps:$4 sm:$0xff]   ;;  %v3764_v3 = vld [vmem:[%s5414_s1 + $0xc8] ss:$12 sps:$4 sm:$0xff]   ;;  %v4175_v8 = vld [vmem:[%s3959_s21 + $0x50] ss:$8 sps:$4 sm:$0xff]  }
  0x1d   : > { %v3836_v6 = vld [vmem:[%s5415_s2 + $0x30] sm:$0xff]   ;;  %v3765_v7 = vld [vmem:[%s5414_s1 + $0xe0] ss:$12 sps:$4 sm:$0xff]   ;;  %v3772_v10 = vld [vmem:[%s5414_s1 + $0xf8] ss:$12 sps:$4 sm:$0xff]   ;;  %vm3275_vm8 = vcmask 1043459  }
  0x1e   : > { %v4178_v9 = vld [vmem:[%s3959_s21 + $0x1d0] ss:$8 sps:$4 sm:$0xff]   ;;  %v4185_v11 = vld [vmem:[%s3959_s21 + $0x64] ss:$8 sps:$4 sm:$0xff]   ;;  %v4200_v15 = vld [vmem:[%s3959_s21 + $0x60] ss:$8 sps:$4 sm:$0xff]  }
  0x1f   : > { %919 = vmatpush1.bf16.msra.mxu0 %v3698_v14  ;;  %3658 = vmatpush1.bf16.msra.mxu1 %v3698_v14  ;;  %v4189_v12 = vld [vmem:[%s3959_s21 + $0x1e4] ss:$8 sps:$4 sm:$0xff]   ;;  %v3773_v14 = vld [vmem:[%s5414_s1 + $0x110] ss:$12 sps:$4 sm:$0xff]   ;;  %vm3277_vm11 = vcmask 1044484   ;;  %vm3279_vm14 = vcmask 1045509  }
  0x20   : > { %920 = vmatprep.subr.bf16.mxu0 %v3699_v16  ;;  %3643 = vmatprep.subr.bf16.mxu1 %v3699_v16  ;;  %v4203_v16 = vld [vmem:[%s3959_s21 + $0x1e0] ss:$8 sps:$4 sm:$0xff]   ;;  %s3883_s17 = smov 64   ;;  %p197_p4 = scmp.lt.s32.totalorder %s3915_s16, 1 }
  0x22   : > { %s5423_s16 = smov (!%p197_p4, %s3915_s16), 1 }
  0x23   : > { %921 = vmatpush1.bf16.msra.mxu0 %v3701_v17  ;;  %3659 = vmatpush1.bf16.msra.mxu1 %v3701_v17  ;;  %v3780_v17 = vld [vmem:[%s5414_s1 + $0x128] ss:$12 sps:$4 sm:$0xff]   ;;  %s3367_s18 = sshll.u32 %s5423_s16, 3 }
  0x24   : > { %922 = vmatprep.subr.bf16.mxu0 %v3702_v18  ;;  %3644 = vmatprep.subr.bf16.mxu1 %v3702_v18  ;;  %v4209_v18 = vld [vmem:[%s3959_s21 + $0x74] ss:$8 sps:$4 sm:$0xff]   ;;  %s200_s22 = scalar_lea.vmem %s5417_s4, %s3367_s18 }
  0x27   : > { %923 = vmatpush1.bf16.msra.mxu0 %v3704_v19  ;;  %3660 = vmatpush1.bf16.msra.mxu1 %v3704_v19  ;;  %v4213_v19 = vld [vmem:[%s3959_s21 + $0x1f4] ss:$8 sps:$4 sm:$0xff]  }
  0x28   : > { %924 = vmatprep.subr.bf16.mxu0 %v3705_v20  ;;  %3645 = vmatprep.subr.bf16.mxu1 %v3705_v20  ;;  %v3843_v20 = vld [vmem:[%s5415_s2 + $0x38] sm:$0xff]  }
  0x2b   : > { %925 = vmatpush1.bf16.msra.mxu0 %v3707_v21  ;;  %3661 = vmatpush1.bf16.msra.mxu1 %v3707_v21  ;;  %v3781_v21 = vld [vmem:[%s5414_s1 + $0x140] ss:$12 sps:$4 sm:$0xff]  }
  0x2c   : > { %926 = vmatprep.subr.bf16.mxu0 %v3708_v22  ;;  %3646 = vmatprep.subr.bf16.mxu1 %v3708_v22  ;;  %v4227_v22 = vld [vmem:[%s3959_s21 + $0x70] ss:$8 sps:$4 sm:$0xff]  }
  0x2f   : > { %927 = vmatpush1.bf16.msra.mxu0 %v3710_v23  ;;  %3662 = vmatpush1.bf16.msra.mxu1 %v3710_v23  ;;  %v4230_v23 = vld [vmem:[%s3959_s21 + $0x1f0] ss:$8 sps:$4 sm:$0xff]  }
  0x30   : > { %928 = vmatprep.subr.bf16.mxu0 %v3711_v24  ;;  %3647 = vmatprep.subr.bf16.mxu1 %v3711_v24  ;;  %v3788_v24 = vld [vmem:[%s5414_s1 + $0x158] ss:$12 sps:$4 sm:$0xff]  }
  0x33   : > { %929 = vmatpush1.bf16.msra.mxu0 %v3713_v25  ;;  %3663 = vmatpush1.bf16.msra.mxu1 %v3713_v25  ;;  %v4237_v25 = vld [vmem:[%s3959_s21 + $0x84] ss:$8 sps:$4 sm:$0xff]  }
  0x34   : > { %930 = vmatprep.subr.bf16.mxu0 %v3714_v26  ;;  %3648 = vmatprep.subr.bf16.mxu1 %v3714_v26  ;;  %v3847_v26 = vld [vmem:[%s5415_s2 + $0x40] sm:$0xff]  }
  0x37   : > { %931 = vmatpush1.bf16.msra.mxu0 %v3716_v27  ;;  %3664 = vmatpush1.bf16.msra.mxu1 %v3716_v27  ;;  %v3789_v27 = vld [vmem:[%s5414_s1 + $0x170] ss:$12 sps:$4 sm:$0xff]  }
  0x38   : > { %932 = vmatprep.subr.bf16.mxu0 %v3717_v28  ;;  %3649 = vmatprep.subr.bf16.mxu1 %v3717_v28  ;;  %v3832_v28 = vld [vmem:[%s5415_s2 + $0x80] sm:$0xff]  }
  0x3b   : > { %933 = vmatpush1.bf16.msra.mxu0 %v3719_v29  ;;  %3665 = vmatpush1.bf16.msra.mxu1 %v3719_v29  ;;  %v4255_v29 = vld [vmem:[%s3959_s21 + $0x80] ss:$8 sps:$4 sm:$0xff]  }
  0x3c   : > { %934 = vmatprep.subr.bf16.mxu0 %v3720_v30  ;;  %3650 = vmatprep.subr.bf16.mxu1 %v3720_v30  ;;  %v4259_v30 = vld [vmem:[%s3959_s21 + $0x94] ss:$8 sps:$4 sm:$0xff]  }
  0x3f   : > { %935 = vmatpush1.bf16.msra.mxu0 %v3722_v31  ;;  %3666 = vmatpush1.bf16.msra.mxu1 %v3722_v31  ;;  %v3848_v31 = vld [vmem:[%s5415_s2 + $0x48] sm:$0xff]  }
  0x40   : > { %936 = vmatprep.subr.bf16.mxu0 %v3723_v32  ;;  %3651 = vmatprep.subr.bf16.mxu1 %v3723_v32  ;;  %v4273_v32 = vld [vmem:[%s3959_s21 + $0x90] ss:$8 sps:$4 sm:$0xff]  }
  0x43   : > { %937 = vmatpush1.bf16.msra.mxu0 %v3725_v33  ;;  %3667 = vmatpush1.bf16.msra.mxu1 %v3725_v33  ;;  %v4276_v33 = vld [vmem:[%s3959_s21 + $0xa4] ss:$8 sps:$4 sm:$0xff]  }
  0x44   : > { %1259 = vmatprep.subr.bf16.mxu1 %v3882_v38  ;;  %2084 = vmatprep.subr.bf16.mxu0 %v3882_v38 }
  0x46   : > { %939 = vmatmul.mubr.bf16.vlgmr.msra.gmra.mrb[0].mxu0 %v4027_v34  ;;  %1179 = vmatmul.mubr.bf16.vlgmr.msra.gmra.mrb[0].mxu1 %v4030_v35 }
  0x47   : > { %1260 = vmatpush1.bf16.msra.mxu1 %v3732_v36  ;;  %948 = vmatprep.mubr.bf16.mxu0 %v4036_v37  ;;  %v3851_v36 = vld [vmem:[%s5415_s2 + $0x60] sm:$0xff]  }
  0x48   : > { %1261 = vmatprep.subr.bf16.mxu1 %v3882_v38  ;;  %1188 = vmatprep.mubr.bf16.mxu1 %v4040_v39 }
  0x49   : > { %2085 = vmatpush1.bf16.msra.mxu0 %v3802_v40  ;;  %v3799_v40 = vld [vmem:[%s3959_s21 + $0xb4] ss:$8 sps:$4 sm:$0xff]  }
  0x4a   : > { %2086 = vmatprep.subr.bf16.mxu0 %v3882_v38 }
  0x4b   : > { %1262 = vmatpush1.bf16.msra.mxu1 %v3733_v41  ;;  %v3852_v41 = vld [vmem:[%s5415_s2 + $0x68] sm:$0xff]  }
  0x4c   : > { %1263 = vmatprep.subr.bf16.mxu1 %v3882_v38 }
  0x4d   : > { %2087 = vmatpush1.bf16.msra.mxu0 %v3809_v44  ;;  %v3801_v44 = vld [vmem:[%s3959_s21 + $0xb0] ss:$8 sps:$4 sm:$0xff]  }
  0x4e   : > { %949 = vmatmul.mubr.bf16.gmra.mrb[4].mxu0 %v4055_v42  ;;  %1189 = vmatmul.mubr.bf16.gmra.mrb[4].mxu1 %v4058_v43 }
  0x4f   : > { %1264 = vmatpush1.bf16.msra.mxu1 %v3740_v45  ;;  %958 = vmatprep.mubr.bf16.mxu0 %v4068_v46  ;;  %v3803_v45 = vld [vmem:[%s3959_s21 + $0xc4] ss:$8 sps:$4 sm:$0xff]  }
  0x50   : > { %1265 = vmatprep.subr.bf16.mxu1 %v3882_v38  ;;  %1198 = vmatprep.mubr.bf16.mxu1 %v4072_v47 }
  0x51   : > { %2088 = vmatprep.subr.bf16.mxu0 %v3882_v38 }
  0x52   : > { %2089 = vmatpush1.bf16.msra.mxu0 %v3813_v48  ;;  %v3805_v48 = vld [vmem:[%s3959_s21 + $0xc0] ss:$8 sps:$4 sm:$0xff]  }
  0x53   : > { %1266 = vmatpush1.bf16.msra.mxu1 %v3741_v49  ;;  %2090 = vmatprep.subr.bf16.mxu0 %v3882_v38  ;;  %v3806_v49 = vld [vmem:[%s3959_s21 + $0xd4] ss:$8 sps:$4 sm:$0xff]  }
  0x54   : > { %1267 = vmatprep.subr.bf16.mxu1 %v3882_v38 }
  0x56   : > { %959 = vmatmul.mubr.bf16.gmra.mrb[8].mxu0 %v4086_v50  ;;  %1199 = vmatmul.mubr.bf16.gmra.mrb[8].mxu1 %v4089_v51 }
  0x57   : > { %1268 = vmatpush1.bf16.msra.mxu1 %v3748_v52  ;;  %968 = vmatprep.mubr.bf16.mxu0 %v4095_v53  ;;  %v3812_v52 = vld [vmem:[%s3959_s21 + $0xe0] ss:$8 sps:$4 sm:$0xff]  }
  0x58   : > { %1269 = vmatprep.subr.bf16.mxu1 %v3882_v38  ;;  %1208 = vmatprep.mubr.bf16.mxu1 %v4099_v54 }
  0x59   : > { %2091 = vmatpush1.bf16.msra.mxu0 %v3820_v55  ;;  %v3816_v55 = vld [vmem:[%s3959_s21 + $0xf0] ss:$8 sps:$4 sm:$0xff]  }
  0x5a   : > { %2092 = vmatprep.subr.bf16.mxu0 %v3882_v38 }
  0x5b   : > { %1270 = vmatpush1.bf16.msra.mxu1 %v3749_v56  ;;  %v3817_v56 = vld [vmem:[%s3959_s21 + $0x104] ss:$8 sps:$4 sm:$0xff]  }
  0x5c   : > { %1271 = vmatprep.subr.bf16.mxu1 %v3882_v38 }
  0x5d   : > { %2093 = vmatpush1.bf16.msra.mxu0 %v3824_v57  ;;  %v3819_v57 = vld [vmem:[%s3959_s21 + $0x100] ss:$8 sps:$4 sm:$0xff]  }
  0x5e   : > { %969 = vmatmul.mubr.bf16.gmra.mrb[12].mxu0 %v4118_v58  ;;  %1209 = vmatmul.mubr.bf16.gmra.mrb[12].mxu1 %v4121_v59 }
  0x5f   : > { %1272 = vmatpush1.bf16.msra.mxu1 %v3756_v60  ;;  %978 = vmatprep.mubr.bf16.mxu0 %v4127_v61  ;;  %v3823_v60 = vld [vmem:[%s3959_s21 + $0x110] ss:$8 sps:$4 sm:$0xff]  }
  0x60   : > { %1273 = vmatprep.subr.bf16.mxu1 %v3882_v38  ;;  %1218 = vmatprep.mubr.bf16.mxu1 %v4130_v62 }
  0x61   : > { %2094 = vmatprep.subr.bf16.mxu0 %v3882_v38 }
  0x62   : > { %2095 = vmatpush1.bf16.msra.mxu0 %v3831_v63  ;;  %v3827_v63 = vld [vmem:[%s3959_s21 + $0x120] ss:$8 sps:$4 sm:$0xff]  }
  0x63   : > { %1274 = vmatpush1.bf16.msra.mxu1 %v3757_v0  ;;  %2096 = vmatprep.subr.bf16.mxu0 %v3882_v38  ;;  %v3828_v0 = vld [vmem:[%s3959_s21 + $0x134] ss:$8 sps:$4 sm:$0xff]  }
  0x64   : > { %1275 = vmatprep.subr.bf16.mxu1 %v3882_v38 }
  0x66   : > { %979 = vmatmul.mubr.bf16.gmra.mrb[16].mxu0 %v4147_v1  ;;  %1219 = vmatmul.mubr.bf16.gmra.mrb[16].mxu1 %v4150_v2 }
  0x67   : > { %1276 = vmatpush1.bf16.msra.mxu1 %v3764_v3  ;;  %988 = vmatprep.mubr.bf16.mxu0 %v4156_v4  ;;  %v3833_v3 = vld [vmem:[%s3959_s21 + $0x144] ss:$8 sps:$4 sm:$0xff]  }
  0x68   : > { %1277 = vmatprep.subr.bf16.mxu1 %v3882_v38  ;;  %1228 = vmatprep.mubr.bf16.mxu1 %v4161_v5 }
  0x69   : > { %2097 = vmatpush1.bf16.msra.mxu0 %v3836_v6  ;;  %v4342_v6 = vld [vmem:[%s3959_s21 + $0x140] ss:$8 sps:$4 sm:$0xff]  }
  0x6a   : > { %2098 = vmatprep.subr.bf16.mxu0 %v3882_v38 }
  0x6b   : > { %1278 = vmatpush1.bf16.msra.mxu1 %v3765_v7  ;;  %v4345_v7 = vld [vmem:[%s3959_s21 + $0x154] ss:$8 sps:$4 sm:$0xff]  }
  0x6c   : > { %1279 = vmatprep.subr.bf16.mxu1 %v3882_v38 }
  0x6d   : > { %2099 = vmatpush1.bf16.msra.mxu0 %v3843_v20 }
  0x6e   : > { %989 = vmatmul.mubr.bf16.gmra.mrb[20].mxu0 %v4175_v8  ;;  %1229 = vmatmul.mubr.bf16.gmra.mrb[20].mxu1 %v4178_v9 }
  0x6f   : > { %1280 = vmatpush1.bf16.msra.mxu1 %v3772_v10  ;;  %998 = vmatprep.mubr.bf16.mxu0 %v4185_v11  ;;  %v4353_v10 = vld [vmem:[%s3959_s21 + $0x164] ss:$8 sps:$4 sm:$0xff]  }
  0x70   : > { %1281 = vmatprep.subr.bf16.mxu1 %v3882_v38  ;;  %1238 = vmatprep.mubr.bf16.mxu1 %v4189_v12 }
  0x71   : > { %2100 = vmatprep.subr.bf16.mxu0 %v3882_v38 }
  0x72   : > { %2101 = vmatpush1.bf16.msra.mxu0 %v3847_v26 }
  0x73   : > { %1282 = vmatpush1.bf16.msra.mxu1 %v3773_v14  ;;  %2102 = vmatprep.subr.bf16.mxu0 %v3882_v38  ;;  %v4361_v14 = vld [vmem:[%s3959_s21 + $0x174] ss:$8 sps:$4 sm:$0xff]  }
  0x74   : > { %1283 = vmatprep.subr.bf16.mxu1 %v3882_v38 }
  0x76   : > { %999 = vmatmul.mubr.bf16.gmra.mrb[24].mxu0 %v4200_v15  ;;  %1239 = vmatmul.mubr.bf16.gmra.mrb[24].mxu1 %v4203_v16 }
  0x77   : > { %1284 = vmatpush1.bf16.msra.mxu1 %v3780_v17  ;;  %1008 = vmatprep.mubr.bf16.mxu0 %v4209_v18 }
  0x78   : > { %1285 = vmatprep.subr.bf16.mxu1 %v3882_v38  ;;  %1248 = vmatprep.mubr.bf16.mxu1 %v4213_v19 }
  0x79   : > { %2103 = vmatpush1.bf16.msra.mxu0 %v3848_v31 }
  0x7a   : > { %2104 = vmatprep.subr.bf16.mxu0 %v3882_v38 }
  0x7b   : > { %1286 = vmatpush1.bf16.msra.mxu1 %v3781_v21 }
  0x7c   : > { %1287 = vmatprep.subr.bf16.mxu1 %v3882_v38 }
  0x7e   : > { %1009 = vmatmul.mubr.bf16.gmra.mrb[28].mxu0 %v4227_v22  ;;  %1249 = vmatmul.mubr.bf16.gmra.mrb[28].mxu1 %v4230_v23 }
  0x7f   : > { %1288 = vmatpush1.bf16.msra.mxu1 %v3788_v24  ;;  %1018 = vmatprep.mubr.bf16.mxu0 %v4237_v25 }
  0x80   : > { %1289 = vmatprep.subr.bf16.mxu1 %v3882_v38  ;;  %1291 = vmatprep.mubr.bf16.mxu1 %v3965_v13  ;;  %v3849_v13 = vld [vmem:[%s5415_s2 + $0x50] sm:$0xff]  }
  0x81   : > { %2105 = vmatpush1.bf16.msra.mxu0 %v3849_v13 }
  0x82   : > { %2106 = vmatprep.subr.bf16.mxu0 %v3882_v38 }
  0x83   : > { %1290 = vmatpush1.bf16.msra.mxu1 %v3789_v27 }
  0x84   : > { %3568 = vmatprep.subr.bf16.mxu1 %v3832_v28 }
  0x86   : > { %1019 = vmatmul.mubr.bf16.gmra.mrb[32].mxu0 %v4255_v29  ;;  %1292 = vmatmul.mubr.bf16.vlgmr.msra.gmra.mrb[32].mxu1 %v4027_v34  ;;  %v3850_v34 = vld [vmem:[%s5415_s2 + $0x58] sm:$0xff]  }
  0x87   : > { %1028 = vmatprep.mubr.bf16.mxu0 %v4259_v30  ;;  %1299 = vmatprep.mubr.bf16.mxu1 %v4036_v37  ;;  %v3798_v37 = vld [vmem:[%s3959_s21 + $0xa0] ss:$8 sps:$4 sm:$0xff]  }
  0x88   : > { %3569 = vmatpush3.bf16.msra.mxu1 %v3832_v28  ;;  %2107 = vmatpush1.bf16.msra.mxu0 %v3850_v34 }
  0x89   : > { %2108 = vmatprep.subr.bf16.mxu0 %v3882_v38 }
  0x8c   : > { %2109 = vmatpush1.bf16.msra.mxu0 %v3851_v36 }
  0x8d   : > { %2110 = vmatprep.subr.bf16.mxu0 %v3882_v38 }
  0x8e   : > { %1029 = vmatmul.mubr.bf16.gmra.mrb[36].mxu0 %v4273_v32  ;;  %1300 = vmatmul.mubr.bf16.gmra.mrb[36].mxu1 %v4055_v42  ;;  %v3853_v42 = vld [vmem:[%s5415_s2 + $0x70] sm:$0xff]  }
  0x8f   : > { %1038 = vmatprep.mubr.bf16.mxu0 %v4276_v33  ;;  %1307 = vmatprep.mubr.bf16.mxu1 %v4068_v46  ;;  %v3854_v46 = vld [vmem:[%s5415_s2 + $0x78] sm:$0xff]  }
  0x90   : > { %2111 = vmatpush1.bf16.msra.mxu0 %v3852_v41 }
  0x91   : > { %2112 = vmatprep.subr.bf16.mxu0 %v3882_v38 }
  0x94   : > { %2113 = vmatpush1.bf16.msra.mxu0 %v3853_v42 }
  0x95   : > { %2114 = vmatprep.subr.bf16.mxu0 %v3882_v38  ;;  %v3808_v38 = vld [vmem:[%s3959_s21 + $0xd0] ss:$8 sps:$4 sm:$0xff]  }
  0x96   : > { %1039 = vmatmul.mubr.bf16.gmra.mrb[40].mxu0 %v3798_v37  ;;  %1308 = vmatmul.mubr.bf16.gmra.mrb[40].mxu1 %v4086_v50  ;;  %v3810_v50 = vld [vmem:[%s3959_s21 + $0xe4] ss:$8 sps:$4 sm:$0xff]  }
  0x97   : > { %1048 = vmatprep.mubr.bf16.mxu0 %v3799_v40  ;;  %1315 = vmatprep.mubr.bf16.mxu1 %v4095_v53  ;;  %v3814_v53 = vld [vmem:[%s3959_s21 + $0xf4] ss:$8 sps:$4 sm:$0xff]  }
  0x98   : > { %2115 = vmatpush1.bf16.msra.mxu0 %v3854_v46 }
  0x9e   : > { %1049 = vmatmul.mubr.bf16.gmra.mrb[44].mxu0 %v3801_v44  ;;  %1316 = vmatmul.mubr.bf16.gmra.mrb[44].mxu1 %v4118_v58  ;;  %v3821_v58 = vld [vmem:[%s3959_s21 + $0x114] ss:$8 sps:$4 sm:$0xff]  }
  0x9f   : > { %1058 = vmatprep.mubr.bf16.mxu0 %v3803_v45  ;;  %1323 = vmatprep.mubr.bf16.mxu1 %v4127_v61  ;;  %v3825_v61 = vld [vmem:[%s3959_s21 + $0x124] ss:$8 sps:$4 sm:$0xff]  }
  0xa6   : > { %1059 = vmatmul.mubr.bf16.gmra.mrb[48].mxu0 %v3805_v48  ;;  %1324 = vmatmul.mubr.bf16.gmra.mrb[48].mxu1 %v4147_v1  ;;  %v3830_v1 = vld [vmem:[%s3959_s21 + $0x130] ss:$8 sps:$4 sm:$0xff]  }
  0xa7   : > { %1068 = vmatprep.mubr.bf16.mxu0 %v3806_v49  ;;  %1331 = vmatprep.mubr.bf16.mxu1 %v4156_v4  ;;  %v3855_v4 = vld [vmem:[%s5415_s2 + $0x88] sm:$0xff]  }
  0xa8   : > { %3570 = vmatprep.subr.bf16.mxu1 %v3855_v4 }
  0xa9   : > { %3571 = vmatpush3.bf16.msra.mxu1 %v3855_v4 }
  0xae   : > { %1069 = vmatmul.mubr.bf16.gmra.mrb[52].mxu0 %v3808_v38  ;;  %1332 = vmatmul.mubr.bf16.gmra.mrb[52].mxu1 %v4175_v8  ;;  %v4350_v8 = vld [vmem:[%s3959_s21 + $0x150] ss:$8 sps:$4 sm:$0xff]  }
  0xaf   : > { %1078 = vmatprep.mubr.bf16.mxu0 %v3810_v50  ;;  %1339 = vmatprep.mubr.bf16.mxu1 %v4185_v11  ;;  %v4358_v11 = vld [vmem:[%s3959_s21 + $0x160] ss:$8 sps:$4 sm:$0xff]  }
  0xb6   : > { %1079 = vmatmul.mubr.bf16.gmra.mrb[56].mxu0 %v3812_v52  ;;  %1340 = vmatmul.mubr.bf16.gmra.mrb[56].mxu1 %v4200_v15  ;;  %v4366_v15 = vld [vmem:[%s3959_s21 + $0x170] ss:$8 sps:$4 sm:$0xff]  }
  0xb7   : > { %1088 = vmatprep.mubr.bf16.mxu0 %v3814_v53  ;;  %1347 = vmatprep.mubr.bf16.mxu1 %v4209_v18 }
  0xbe   : > { %1089 = vmatmul.mubr.bf16.gmra.mrb[60].mxu0 %v3816_v55  ;;  %1348 = vmatmul.mubr.bf16.gmra.mrb[60].mxu1 %v4227_v22 }
  0xbf   : > { %1098 = vmatprep.mubr.bf16.mxu0 %v3817_v56  ;;  %1355 = vmatprep.mubr.bf16.mxu1 %v4237_v25 }
  0xc6   : > { %1099 = vmatmul.mubr.bf16.gmra.mrb[64].mxu0 %v3819_v57  ;;  %1356 = vmatmul.mubr.bf16.gmra.mrb[64].mxu1 %v4255_v29 }
  0xc7   : > { %1108 = vmatprep.mubr.bf16.mxu0 %v3821_v58  ;;  %1363 = vmatprep.mubr.bf16.mxu1 %v4259_v30 }
  0xce   : > { %1109 = vmatmul.mubr.bf16.gmra.mrb[68].mxu0 %v3823_v60  ;;  %1364 = vmatmul.mubr.bf16.gmra.mrb[68].mxu1 %v4273_v32 }
  0xcf   : > { %1118 = vmatprep.mubr.bf16.mxu0 %v3825_v61  ;;  %1371 = vmatprep.mubr.bf16.mxu1 %v4276_v33 }
  0xd6   : > { %1119 = vmatmul.mubr.bf16.gmra.mrb[72].mxu0 %v3827_v63  ;;  %1372 = vmatmul.mubr.bf16.gmra.mrb[72].mxu1 %v3798_v37 }
  0xd7   : > { %1128 = vmatprep.mubr.bf16.mxu0 %v3828_v0  ;;  %1379 = vmatprep.mubr.bf16.mxu1 %v3799_v40 }
  0xde   : > { %1129 = vmatmul.mubr.bf16.gmra.mrb[76].mxu0 %v3830_v1  ;;  %1380 = vmatmul.mubr.bf16.gmra.mrb[76].mxu1 %v3801_v44 }
  0xdf   : > { %1138 = vmatprep.mubr.bf16.mxu0 %v3833_v3  ;;  %1387 = vmatprep.mubr.bf16.mxu1 %v3803_v45 }
  0xe6   : > { %1139 = vmatmul.mubr.bf16.gmra.mrb[80].mxu0 %v4342_v6  ;;  %1388 = vmatmul.mubr.bf16.gmra.mrb[80].mxu1 %v3805_v48 }
  0xe7   : > { %1148 = vmatprep.mubr.bf16.mxu0 %v4345_v7  ;;  %1395 = vmatprep.mubr.bf16.mxu1 %v3806_v49 }
  0xee   : > { %1149 = vmatmul.mubr.bf16.gmra.mrb[84].mxu0 %v4350_v8  ;;  %1396 = vmatmul.mubr.bf16.gmra.mrb[84].mxu1 %v3808_v38 }
  0xef   : > { %1158 = vmatprep.mubr.bf16.mxu0 %v4353_v10  ;;  %1403 = vmatprep.mubr.bf16.mxu1 %v3810_v50 }
  0xf6   : > { %1159 = vmatmul.mubr.bf16.gmra.mrb[88].mxu0 %v4358_v11  ;;  %1404 = vmatmul.mubr.bf16.gmra.mrb[88].mxu1 %v3812_v52 }
  0xf7   : > { %1168 = vmatprep.mubr.bf16.mxu0 %v4361_v14  ;;  %1411 = vmatprep.mubr.bf16.mxu1 %v3814_v53 }
  0xfe   : > { %1169 = vmatmul.mubr.bf16.gmra.mrb[92].mxu0 %v4366_v15  ;;  %1412 = vmatmul.mubr.bf16.gmra.mrb[92].mxu1 %v3816_v55 }
  0xff   : > { %1419 = vmatprep.mubr.bf16.mxu1 %v3817_v56 }
 0x106   : > { %1420 = vmatmul.mubr.bf16.gmra.mrb[96].mxu1 %v3819_v57 }
 0x107   : > { %1427 = vmatprep.mubr.bf16.mxu1 %v3821_v58 }
 0x10e   : > { %1428 = vmatmul.mubr.bf16.gmra.mrb[100].mxu1 %v3823_v60 }
 0x10f   : > { %1435 = vmatprep.mubr.bf16.mxu1 %v3825_v61 }
 0x116   : > { %1436 = vmatmul.mubr.bf16.gmra.mrb[104].mxu1 %v3827_v63 }
 0x117   : > { %1443 = vmatprep.mubr.bf16.mxu1 %v3828_v0 }
 0x119   : > { %v940_v17 = vpop.f32.mrb[0].mxu0  ;;  %v1180_v18 = vpop.f32.mrb[0].mxu1 }
 0x11a   : > { %v1548_v20 = vmax.f32 %v940_v17, 0.0  ;;  %v942_v21 = vpop.f32.mrb[1].mxu0  ;;  %v1182_v22 = vpop.f32.mrb[1].mxu1  ;;  %v1692_v27 = vmax.f32 %v1180_v18, 0.0 }
 0x11b   : > { %v1549_v24 = vmax.f32 %v942_v21, 0.0  ;;  %v944_v25 = vpop.f32.mrb[2].mxu0  ;;  %v1184_v26 = vpop.f32.mrb[2].mxu1  ;;  %v1693_v13 = vmax.f32 %v1182_v22, 0.0 }
 0x11c   : > { %v1551_v28 = vmax.f32 %v944_v25, 0.0  ;;  %v1695_v29 = vmax.f32 %v1184_v26, 0.0  ;;  %v946_v30 = vpop.f32.mrb[3].mxu0  ;;  %v1186_v31 = vpop.f32.mrb[3].mxu1 }
 0x11d   : > { %v1552_v32 = vmax.f32 %v946_v30, 0.0  ;;  %v1696_v33 = vmax.f32 %v1186_v31, 0.0 }
 0x11e   : > { %v1740_v34 = vpack.c.bf16 %v1551_v28, %v1548_v20  ;;  %v4369_v36 = vpack.c.bf16 %v1695_v29, %v1692_v27  ;;  %1444 = vmatmul.mubr.bf16.gmra.mrb[108].mxu1 %v3830_v1 }
 0x11f   : > { %v1741_v37 = vpack.c.bf16 %v1552_v32, %v1549_v24  ;;  %v4371_v40 = vpack.c.bf16 %v1696_v33, %v1693_v13  ;;  %1451 = vmatprep.mubr.bf16.mxu1 %v3833_v3 }
 0x121   : > { %v950_v41 = vpop.f32.mrb[4].mxu0  ;;  %v1190_v42 = vpop.f32.mrb[4].mxu1  ;;  %2116 = vmatprep.mubr.bf16.mxu0 %v1741_v37 }
 0x122   : > { %v1554_v44 = vmax.f32 %v950_v41, 0.0  ;;  %v952_v45 = vpop.f32.mrb[5].mxu0  ;;  %v1192_v46 = vpop.f32.mrb[5].mxu1  ;;  %2117 = vmatmul.mubr.bf16.vlgmr.msra.gmra.mrb[96].mxu0 %v1740_v34  ;;  %v1698_v50 = vmax.f32 %v1190_v42, 0.0 }
 0x123   : > { %v1555_v48 = vmax.f32 %v952_v45, 0.0  ;;  %v954_v49 = vpop.f32.mrb[6].mxu0  ;;  %v1194_v38 = vpop.f32.mrb[6].mxu1  ;;  %v1699_v57 = vmax.f32 %v1192_v46, 0.0 }
 0x124   : > { %v1557_v52 = vmax.f32 %v954_v49, 0.0  ;;  %v1701_v53 = vmax.f32 %v1194_v38, 0.0  ;;  %v956_v55 = vpop.f32.mrb[7].mxu0  ;;  %v1196_v56 = vpop.f32.mrb[7].mxu1 }
 0x125   : > { %v1558_v58 = vmax.f32 %v956_v55, 0.0  ;;  %v1702_v60 = vmax.f32 %v1196_v56, 0.0 }
 0x126   : > { %v1743_v61 = vpack.c.bf16 %v1557_v52, %v1554_v44  ;;  %v4373_v63 = vpack.c.bf16 %v1701_v53, %v1698_v50  ;;  %1452 = vmatmul.mubr.bf16.gmra.mrb[112].mxu1 %v4342_v6 }
 0x127   : > { %v1744_v0 = vpack.c.bf16 %v1558_v58, %v1555_v48  ;;  %v4376_v1 = vpack.c.bf16 %v1702_v60, %v1699_v57  ;;  %1459 = vmatprep.mubr.bf16.mxu1 %v4345_v7 }
 0x129   : > { %v960_v3 = vpop.f32.mrb[8].mxu0  ;;  %v1200_v4 = vpop.f32.mrb[8].mxu1  ;;  %2124 = vmatprep.mubr.bf16.mxu0 %v1744_v0 }
 0x12a   : > { %v1560_v17 = vmax.f32 %v960_v3, 0.0  ;;  %v962_v18 = vpop.f32.mrb[9].mxu0  ;;  %v1202_v20 = vpop.f32.mrb[9].mxu1  ;;  %2125 = vmatmul.mubr.bf16.gmra.mrb[100].mxu0 %v1743_v61  ;;  %v1704_v25 = vmax.f32 %v1200_v4, 0.0 }
 0x12b   : > { %v1561_v21 = vmax.f32 %v962_v18, 0.0  ;;  %v964_v22 = vpop.f32.mrb[10].mxu0  ;;  %v1204_v24 = vpop.f32.mrb[10].mxu1  ;;  %v1705_v29 = vmax.f32 %v1202_v20, 0.0 }
 0x12c   : > { %v1563_v26 = vmax.f32 %v964_v22, 0.0  ;;  %v1707_v27 = vmax.f32 %v1204_v24, 0.0  ;;  %v966_v28 = vpop.f32.mrb[11].mxu0  ;;  %v1206_v6 = vpop.f32.mrb[11].mxu1 }
 0x12d   : > { %v1564_v30 = vmax.f32 %v966_v28, 0.0  ;;  %v1708_v31 = vmax.f32 %v1206_v6, 0.0 }
 0x12e   : > { %v1746_v13 = vpack.c.bf16 %v1563_v26, %v1560_v17  ;;  %v4379_v7 = vpack.c.bf16 %v1707_v27, %v1704_v25  ;;  %1460 = vmatmul.mubr.bf16.gmra.mrb[116].mxu1 %v4350_v8 }
 0x12f   : > { %v1747_v32 = vpack.c.bf16 %v1564_v30, %v1561_v21  ;;  %v4382_v33 = vpack.c.bf16 %v1708_v31, %v1705_v29  ;;  %1467 = vmatprep.mubr.bf16.mxu1 %v4353_v10 }
 0x131   : > { %v970_v34 = vpop.f32.mrb[12].mxu0  ;;  %v1210_v37 = vpop.f32.mrb[12].mxu1  ;;  %2132 = vmatprep.mubr.bf16.mxu0 %v1747_v32 }
 0x132   : > { %v1566_v41 = vmax.f32 %v970_v34, 0.0  ;;  %v972_v42 = vpop.f32.mrb[13].mxu0  ;;  %v1212_v44 = vpop.f32.mrb[13].mxu1  ;;  %2133 = vmatmul.mubr.bf16.gmra.mrb[104].mxu0 %v1746_v13  ;;  %v1710_v49 = vmax.f32 %v1210_v37, 0.0  ;;  %v3872_v13 = vld [vmem:[%s3959_s21 + $0x184] ss:$8 sps:$4 sm:$0xff]  }
 0x133   : > { %v1567_v45 = vmax.f32 %v972_v42, 0.0  ;;  %v974_v46 = vpop.f32.mrb[14].mxu0  ;;  %v1214_v48 = vpop.f32.mrb[14].mxu1  ;;  %v1711_v53 = vmax.f32 %v1212_v44, 0.0 }
 0x134   : > { %v1569_v38 = vmax.f32 %v974_v46, 0.0  ;;  %v1713_v50 = vmax.f32 %v1214_v48, 0.0  ;;  %v976_v52 = vpop.f32.mrb[15].mxu0  ;;  %v1216_v8 = vpop.f32.mrb[15].mxu1 }
 0x135   : > { %v1570_v55 = vmax.f32 %v976_v52, 0.0  ;;  %v1714_v56 = vmax.f32 %v1216_v8, 0.0 }
 0x136   : > { %v1749_v57 = vpack.c.bf16 %v1569_v38, %v1566_v41  ;;  %v4385_v10 = vpack.c.bf16 %v1713_v50, %v1710_v49  ;;  %1468 = vmatmul.mubr.bf16.gmra.mrb[120].mxu1 %v4358_v11 }
 0x137   : > { %v1750_v58 = vpack.c.bf16 %v1570_v55, %v1567_v45  ;;  %v4388_v60 = vpack.c.bf16 %v1714_v56, %v1711_v53  ;;  %1475 = vmatprep.mubr.bf16.mxu1 %v4361_v14 }
 0x139   : > { %v980_v61 = vpop.f32.mrb[16].mxu0  ;;  %v1220_v0 = vpop.f32.mrb[16].mxu1  ;;  %2140 = vmatprep.mubr.bf16.mxu0 %v1750_v58 }
 0x13a   : > { %v1572_v3 = vmax.f32 %v980_v61, 0.0  ;;  %v982_v4 = vpop.f32.mrb[17].mxu0  ;;  %v1222_v17 = vpop.f32.mrb[17].mxu1  ;;  %2141 = vmatmul.mubr.bf16.gmra.mrb[108].mxu0 %v1749_v57  ;;  %v1716_v22 = vmax.f32 %v1220_v0, 0.0 }
 0x13b   : > { %v1573_v18 = vmax.f32 %v982_v4, 0.0  ;;  %v984_v20 = vpop.f32.mrb[18].mxu0  ;;  %v1224_v21 = vpop.f32.mrb[18].mxu1  ;;  %v1717_v27 = vmax.f32 %v1222_v17, 0.0 }
 0x13c   : > { %v1575_v24 = vmax.f32 %v984_v20, 0.0  ;;  %v1719_v25 = vmax.f32 %v1224_v21, 0.0  ;;  %v986_v11 = vpop.f32.mrb[19].mxu0  ;;  %v1226_v26 = vpop.f32.mrb[19].mxu1 }
 0x13d   : > { %v1576_v28 = vmax.f32 %v986_v11, 0.0  ;;  %v1720_v6 = vmax.f32 %v1226_v26, 0.0 }
 0x13e   : > { %v1752_v14 = vpack.c.bf16 %v1575_v24, %v1572_v3  ;;  %v4391_v29 = vpack.c.bf16 %v1719_v25, %v1716_v22  ;;  %1476 = vmatmul.mubr.bf16.gmra.mrb[124].mxu1 %v4366_v15 }
 0x13f   : > { %v1753_v30 = vpack.c.bf16 %v1576_v28, %v1573_v18  ;;  %v4394_v31 = vpack.c.bf16 %v1720_v6, %v1717_v27  ;;  %1483 = vmatprep.mubr.bf16.mxu1 %v3872_v13 }
 0x141   : > { %v990_v32 = vpop.f32.mrb[20].mxu0  ;;  %v1230_v34 = vpop.f32.mrb[20].mxu1  ;;  %2148 = vmatprep.mubr.bf16.mxu0 %v1753_v30 }
 0x142   : > { %v1578_v37 = vmax.f32 %v990_v32, 0.0  ;;  %v992_v41 = vpop.f32.mrb[21].mxu0  ;;  %v1232_v42 = vpop.f32.mrb[21].mxu1  ;;  %2149 = vmatmul.mubr.bf16.gmra.mrb[112].mxu0 %v1752_v14  ;;  %v1722_v48 = vmax.f32 %v1230_v34, 0.0 }
 0x143   : > { %v1579_v44 = vmax.f32 %v992_v41, 0.0  ;;  %v994_v45 = vpop.f32.mrb[22].mxu0  ;;  %v1234_v46 = vpop.f32.mrb[22].mxu1  ;;  %v1723_v52 = vmax.f32 %v1232_v42, 0.0 }
 0x144   : > { %v1581_v49 = vmax.f32 %v994_v45, 0.0  ;;  %v1725_v38 = vmax.f32 %v1234_v46, 0.0  ;;  %v996_v50 = vpop.f32.mrb[23].mxu0  ;;  %v1236_v15 = vpop.f32.mrb[23].mxu1 }
 0x145   : > { %v1582_v8 = vmax.f32 %v996_v50, 0.0  ;;  %v1726_v53 = vmax.f32 %v1236_v15, 0.0 }
 0x146   : > { %v1755_v55 = vpack.c.bf16 %v1581_v49, %v1578_v37  ;;  %v4397_v56 = vpack.c.bf16 %v1725_v38, %v1722_v48  ;;  %1484 = vmatmul.mubr.bf16.gmra.mrb[128].mxu1 %v4030_v35 }
 0x147   : > { %v1756_v57 = vpack.c.bf16 %v1582_v8, %v1579_v44  ;;  %v4400_v58 = vpack.c.bf16 %v1726_v53, %v1723_v52  ;;  %1491 = vmatprep.mubr.bf16.mxu1 %v4040_v39 }
 0x149   : > { %v1000_v61 = vpop.f32.mrb[24].mxu0  ;;  %v1240_v0 = vpop.f32.mrb[24].mxu1  ;;  %2156 = vmatprep.mubr.bf16.mxu0 %v1756_v57 }
 0x14a   : > { %v1584_v3 = vmax.f32 %v1000_v61, 0.0  ;;  %v1002_v4 = vpop.f32.mrb[25].mxu0  ;;  %v1242_v17 = vpop.f32.mrb[25].mxu1  ;;  %2157 = vmatmul.mubr.bf16.gmra.mrb[116].mxu0 %v1755_v55  ;;  %v1728_v22 = vmax.f32 %v1240_v0, 0.0 }
 0x14b   : > { %v1585_v18 = vmax.f32 %v1002_v4, 0.0  ;;  %v1004_v20 = vpop.f32.mrb[26].mxu0  ;;  %v1244_v21 = vpop.f32.mrb[26].mxu1  ;;  %v1729_v26 = vmax.f32 %v1242_v17, 0.0 }
 0x14c   : > { %v1587_v24 = vmax.f32 %v1004_v20, 0.0  ;;  %v1731_v25 = vmax.f32 %v1244_v21, 0.0  ;;  %v1006_v11 = vpop.f32.mrb[27].mxu0  ;;  %v1246_v35 = vpop.f32.mrb[27].mxu1 }
 0x14d   : > { %v1588_v27 = vmax.f32 %v1006_v11, 0.0  ;;  %v1732_v28 = vmax.f32 %v1246_v35, 0.0 }
 0x14e   : > { %v1758_v6 = vpack.c.bf16 %v1587_v24, %v1584_v3  ;;  %v4403_v39 = vpack.c.bf16 %v1731_v25, %v1728_v22  ;;  %1492 = vmatmul.mubr.bf16.gmra.mrb[132].mxu1 %v4058_v43 }
 0x14f   : > { %v1759_v14 = vpack.c.bf16 %v1588_v27, %v1585_v18  ;;  %v4406_v30 = vpack.c.bf16 %v1732_v28, %v1729_v26  ;;  %1499 = vmatprep.mubr.bf16.mxu1 %v4072_v47 }
 0x151   : > { %v1010_v13 = vpop.f32.mrb[28].mxu0  ;;  %v1250_v32 = vpop.f32.mrb[28].mxu1  ;;  %2164 = vmatprep.mubr.bf16.mxu0 %v1759_v14 }
 0x152   : > { %v1590_v34 = vmax.f32 %v1010_v13, 0.0  ;;  %v1012_v37 = vpop.f32.mrb[29].mxu0  ;;  %v1252_v41 = vpop.f32.mrb[29].mxu1  ;;  %2165 = vmatmul.mubr.bf16.gmra.mrb[120].mxu0 %v1758_v6  ;;  %v1734_v46 = vmax.f32 %v1250_v32, 0.0 }
 0x153   : > { %v1591_v42 = vmax.f32 %v1012_v37, 0.0  ;;  %v1014_v44 = vpop.f32.mrb[30].mxu0  ;;  %v1254_v45 = vpop.f32.mrb[30].mxu1  ;;  %v1735_v50 = vmax.f32 %v1252_v41, 0.0 }
 0x154   : > { %v1593_v48 = vmax.f32 %v1014_v44, 0.0  ;;  %v1737_v49 = vmax.f32 %v1254_v45, 0.0  ;;  %v1016_v38 = vpop.f32.mrb[31].mxu0  ;;  %v1256_v43 = vpop.f32.mrb[31].mxu1 }
 0x155   : > { %v1594_v15 = vmax.f32 %v1016_v38, 0.0  ;;  %v1738_v52 = vmax.f32 %v1256_v43, 0.0 }
 0x156   : > { %v1761_v8 = vpack.c.bf16 %v1593_v48, %v1590_v34  ;;  %v4409_v47 = vpack.c.bf16 %v1737_v49, %v1734_v46  ;;  %1500 = vmatmul.mubr.bf16.gmra.mrb[136].mxu1 %v4089_v51 }
 0x157   : > { %v1762_v53 = vpack.c.bf16 %v1594_v15, %v1591_v42  ;;  %v4412_v55 = vpack.c.bf16 %v1738_v52, %v1735_v50  ;;  %1507 = vmatprep.mubr.bf16.mxu1 %v4099_v54 }
 0x159   : > { %v1020_v57 = vpop.f32.mrb[32].mxu0  ;;  %v1293_v61 = vpop.f32.mrb[32].mxu1  ;;  %2172 = vmatprep.mubr.bf16.mxu0 %v1762_v53 }
 0x15a   : > { %v1596_v0 = vmax.f32 %v1020_v57, 0.0  ;;  %v1022_v3 = vpop.f32.mrb[33].mxu0  ;;  %v1295_v4 = vpop.f32.mrb[33].mxu1  ;;  %2173 = vmatmul.mubr.bf16.gmra.mrb[124].mxu0 %v1761_v8  ;;  %v1550_v21 = vmax.f32 %v1293_v61, 0.0 }
 0x15b   : > { %v1597_v17 = vmax.f32 %v1022_v3, 0.0  ;;  %v1024_v18 = vpop.f32.mrb[34].mxu0  ;;  %v1296_v20 = vpop.f32.mrb[34].mxu1 }
 0x15c   : > { %v1599_v22 = vmax.f32 %v1024_v18, 0.0  ;;  %v1553_v24 = vmax.f32 %v1296_v20, 0.0  ;;  %v1026_v25 = vpop.f32.mrb[35].mxu0  ;;  %v1298_v51 = vpop.f32.mrb[35].mxu1 }
 0x15d   : > { %v1600_v11 = vmax.f32 %v1026_v25, 0.0 }
 0x15e   : > { %v1764_v35 = vpack.c.bf16 %v1599_v22, %v1596_v0  ;;  %v4415_v26 = vpack.c.bf16 %v1553_v24, %v1550_v21  ;;  %1508 = vmatmul.mubr.bf16.gmra.mrb[140].mxu1 %v4121_v59 }
 0x15f   : > { %v1765_v54 = vpack.c.bf16 %v1600_v11, %v1597_v17  ;;  %1515 = vmatprep.mubr.bf16.mxu1 %v4130_v62 }
 0x161   : > { %v1030_v27 = vpop.f32.mrb[36].mxu0  ;;  %v1301_v28 = vpop.f32.mrb[36].mxu1  ;;  %2180 = vmatprep.mubr.bf16.mxu0 %v1765_v54 }
 0x162   : > { %v1602_v6 = vmax.f32 %v1030_v27, 0.0  ;;  %v1032_v14 = vpop.f32.mrb[37].mxu0  ;;  %v1303_v13 = vpop.f32.mrb[37].mxu1  ;;  %2181 = vmatmul.mubr.bf16.gmra.mrb[128].mxu0 %v1764_v35  ;;  %v1556_v41 = vmax.f32 %v1301_v28, 0.0 }
 0x163   : > { %v1603_v32 = vmax.f32 %v1032_v14, 0.0  ;;  %v1034_v34 = vpop.f32.mrb[38].mxu0  ;;  %v1304_v37 = vpop.f32.mrb[38].mxu1 }
 0x164   : > { %v1605_v42 = vmax.f32 %v1034_v34, 0.0  ;;  %v1559_v44 = vmax.f32 %v1304_v37, 0.0  ;;  %v1036_v45 = vpop.f32.mrb[39].mxu0  ;;  %v1306_v46 = vpop.f32.mrb[39].mxu1 }
 0x165   : > { %v1606_v48 = vmax.f32 %v1036_v45, 0.0 }
 0x166   : > { %v1767_v59 = vpack.c.bf16 %v1605_v42, %v1602_v6  ;;  %v4419_v49 = vpack.c.bf16 %v1559_v44, %v1556_v41  ;;  %1516 = vmatmul.mubr.bf16.gmra.mrb[144].mxu1 %v4150_v2 }
 0x167   : > { %v1768_v62 = vpack.c.bf16 %v1606_v48, %v1603_v32  ;;  %1523 = vmatprep.mubr.bf16.mxu1 %v4161_v5 }
 0x169   : > { %v1040_v38 = vpop.f32.mrb[40].mxu0  ;;  %v1309_v43 = vpop.f32.mrb[40].mxu1  ;;  %2188 = vmatprep.mubr.bf16.mxu0 %v1768_v62 }
 0x16a   : > { %v1608_v50 = vmax.f32 %v1040_v38, 0.0  ;;  %v1042_v15 = vpop.f32.mrb[41].mxu0  ;;  %v1311_v52 = vpop.f32.mrb[41].mxu1  ;;  %2189 = vmatmul.mubr.bf16.gmra.mrb[132].mxu0 %v1767_v59  ;;  %v1562_v61 = vmax.f32 %v1309_v43, 0.0 }
 0x16b   : > { %v1609_v8 = vmax.f32 %v1042_v15, 0.0  ;;  %v1044_v53 = vpop.f32.mrb[42].mxu0  ;;  %v1312_v57 = vpop.f32.mrb[42].mxu1 }
 0x16c   : > { %v1611_v0 = vmax.f32 %v1044_v53, 0.0  ;;  %v1565_v3 = vmax.f32 %v1312_v57, 0.0  ;;  %v1046_v4 = vpop.f32.mrb[43].mxu0  ;;  %v1314_v17 = vpop.f32.mrb[43].mxu1 }
 0x16d   : > { %v1612_v18 = vmax.f32 %v1046_v4, 0.0 }
 0x16e   : > { %v1770_v2 = vpack.c.bf16 %v1611_v0, %v1608_v50  ;;  %v4423_v20 = vpack.c.bf16 %v1565_v3, %v1562_v61  ;;  %1524 = vmatmul.mubr.bf16.gmra.mrb[148].mxu1 %v4178_v9 }
 0x16f   : > { %v1771_v5 = vpack.c.bf16 %v1612_v18, %v1609_v8  ;;  %1531 = vmatprep.mubr.bf16.mxu1 %v4189_v12 }
 0x171   : > { %v1050_v21 = vpop.f32.mrb[44].mxu0  ;;  %v1317_v22 = vpop.f32.mrb[44].mxu1  ;;  %2196 = vmatprep.mubr.bf16.mxu0 %v1771_v5 }
 0x172   : > { %v1614_v24 = vmax.f32 %v1050_v21, 0.0  ;;  %v1052_v25 = vpop.f32.mrb[45].mxu0  ;;  %v1319_v51 = vpop.f32.mrb[45].mxu1  ;;  %2197 = vmatmul.mubr.bf16.gmra.mrb[136].mxu0 %v1770_v2  ;;  %v1568_v27 = vmax.f32 %v1317_v22, 0.0 }
 0x173   : > { %v1615_v11 = vmax.f32 %v1052_v25, 0.0  ;;  %v1054_v35 = vpop.f32.mrb[46].mxu0  ;;  %v1320_v54 = vpop.f32.mrb[46].mxu1 }
 0x174   : > { %v1617_v28 = vmax.f32 %v1054_v35, 0.0  ;;  %v1571_v6 = vmax.f32 %v1320_v54, 0.0  ;;  %v1056_v14 = vpop.f32.mrb[47].mxu0  ;;  %v1322_v13 = vpop.f32.mrb[47].mxu1 }
 0x175   : > { %v1618_v32 = vmax.f32 %v1056_v14, 0.0 }
 0x176   : > { %v1773_v9 = vpack.c.bf16 %v1617_v28, %v1614_v24  ;;  %v4427_v34 = vpack.c.bf16 %v1571_v6, %v1568_v27  ;;  %1532 = vmatmul.mubr.bf16.gmra.mrb[152].mxu1 %v4203_v16 }
 0x177   : > { %v1774_v12 = vpack.c.bf16 %v1618_v32, %v1615_v11  ;;  %1539 = vmatprep.mubr.bf16.mxu1 %v4213_v19 }
 0x179   : > { %v1060_v37 = vpop.f32.mrb[48].mxu0  ;;  %v1325_v41 = vpop.f32.mrb[48].mxu1  ;;  %2204 = vmatprep.mubr.bf16.mxu0 %v1774_v12 }
 0x17a   : > { %v1620_v42 = vmax.f32 %v1060_v37, 0.0  ;;  %v1062_v44 = vpop.f32.mrb[49].mxu0  ;;  %v1327_v45 = vpop.f32.mrb[49].mxu1  ;;  %2205 = vmatmul.mubr.bf16.gmra.mrb[140].mxu0 %v1773_v9  ;;  %v1574_v62 = vmax.f32 %v1325_v41, 0.0 }
 0x17b   : > { %v1621_v46 = vmax.f32 %v1062_v44, 0.0  ;;  %v1064_v48 = vpop.f32.mrb[50].mxu0  ;;  %v1328_v59 = vpop.f32.mrb[50].mxu1 }
 0x17c   : > { %v1623_v38 = vmax.f32 %v1064_v48, 0.0  ;;  %v1577_v43 = vmax.f32 %v1328_v59, 0.0  ;;  %v1066_v50 = vpop.f32.mrb[51].mxu0  ;;  %v1330_v15 = vpop.f32.mrb[51].mxu1 }
 0x17d   : > { %v1624_v16 = vmax.f32 %v1066_v50, 0.0 }
 0x17e   : > { %v1776_v52 = vpack.c.bf16 %v1623_v38, %v1620_v42  ;;  %v1754_v8 = vpack.c.bf16 %v1577_v43, %v1574_v62  ;;  %1540 = vmatmul.mubr.bf16.gmra.mrb[156].mxu1 %v4230_v23 }
 0x17f   : > { %v1777_v19 = vpack.c.bf16 %v1624_v16, %v1621_v46  ;;  %3572 = vmatprep.mubr.msk.bf16.mxu1 %vm1987_vm0, %v4415_v26 }
 0x181   : > { %v1070_v53 = vpop.f32.mrb[52].mxu0  ;;  %v1333_v57 = vpop.f32.mrb[52].mxu1  ;;  %2212 = vmatprep.mubr.bf16.mxu0 %v1777_v19 }
 0x182   : > { %v1626_v61 = vmax.f32 %v1070_v53, 0.0  ;;  %v1072_v0 = vpop.f32.mrb[53].mxu0  ;;  %v1335_v3 = vpop.f32.mrb[53].mxu1  ;;  %2213 = vmatmul.mubr.bf16.gmra.mrb[144].mxu0 %v1776_v52  ;;  %v1580_v2 = vmax.f32 %v1333_v57, 0.0 }
 0x183   : > { %v1627_v4 = vmax.f32 %v1072_v0, 0.0  ;;  %v1074_v17 = vpop.f32.mrb[54].mxu0  ;;  %v1336_v18 = vpop.f32.mrb[54].mxu1 }
 0x184   : > { %v1629_v5 = vmax.f32 %v1074_v17, 0.0  ;;  %v1583_v21 = vmax.f32 %v1336_v18, 0.0  ;;  %v1076_v22 = vpop.f32.mrb[55].mxu0  ;;  %v1338_v24 = vpop.f32.mrb[55].mxu1 }
 0x185   : > { %v1630_v23 = vmax.f32 %v1076_v22, 0.0 }
 0x186   : > { %v1779_v25 = vpack.c.bf16 %v1629_v5, %v1626_v61  ;;  %v1757_v51 = vpack.c.bf16 %v1583_v21, %v1580_v2  ;;  %3573 = vmatmul.mubr.msk.bf16.vlgmr.msra.gmra.mrb[160].mxu1 %vm1987_vm0, %v4419_v49 }
 0x187   : > { %v1780_v26 = vpack.c.bf16 %v1630_v23, %v1627_v4  ;;  %3576 = vmatprep.mubr.msk.bf16.mxu1 %vm1987_vm0, %v4423_v20 }
 0x189   : > { %v1080_v11 = vpop.f32.mrb[56].mxu0  ;;  %v1341_v35 = vpop.f32.mrb[56].mxu1  ;;  %2220 = vmatprep.mubr.bf16.mxu0 %v1780_v26 }
 0x18a   : > { %v1632_v54 = vmax.f32 %v1080_v11, 0.0  ;;  %v1082_v27 = vpop.f32.mrb[57].mxu0  ;;  %v1343_v28 = vpop.f32.mrb[57].mxu1  ;;  %2221 = vmatmul.mubr.bf16.gmra.mrb[148].mxu0 %v1779_v25  ;;  %v1586_v32 = vmax.f32 %v1341_v35, 0.0 }
 0x18b   : > { %v1633_v6 = vmax.f32 %v1082_v27, 0.0  ;;  %v1084_v14 = vpop.f32.mrb[58].mxu0  ;;  %v1344_v13 = vpop.f32.mrb[58].mxu1 }
 0x18c   : > { %v1635_v9 = vmax.f32 %v1084_v14, 0.0  ;;  %v1589_v12 = vmax.f32 %v1344_v13, 0.0  ;;  %v1086_v37 = vpop.f32.mrb[59].mxu0  ;;  %v1346_v41 = vpop.f32.mrb[59].mxu1 }
 0x18d   : > { %v1636_v49 = vmax.f32 %v1086_v37, 0.0 }
 0x18e   : > { %v1782_v42 = vpack.c.bf16 %v1635_v9, %v1632_v54  ;;  %v1760_v44 = vpack.c.bf16 %v1589_v12, %v1586_v32  ;;  %3577 = vmatmul.mubr.msk.bf16.gmra.mrb[164].mxu1 %vm1987_vm0, %v4427_v34 }
 0x18f   : > { %v1783_v20 = vpack.c.bf16 %v1636_v49, %v1633_v6  ;;  %3580 = vmatprep.mubr.msk.bf16.mxu1 %vm1987_vm0, %v1754_v8 }
 0x191   : > { %v1090_v45 = vpop.f32.mrb[60].mxu0  ;;  %v1349_v46 = vpop.f32.mrb[60].mxu1  ;;  %2228 = vmatprep.mubr.bf16.mxu0 %v1783_v20 }
 0x192   : > { %v1638_v48 = vmax.f32 %v1090_v45, 0.0  ;;  %v1092_v59 = vpop.f32.mrb[61].mxu0  ;;  %v1351_v62 = vpop.f32.mrb[61].mxu1  ;;  %2229 = vmatmul.mubr.bf16.gmra.mrb[152].mxu0 %v1782_v42  ;;  %v1592_v15 = vmax.f32 %v1349_v46, 0.0 }
 0x193   : > { %v1639_v38 = vmax.f32 %v1092_v59, 0.0  ;;  %v1094_v43 = vpop.f32.mrb[62].mxu0  ;;  %v1352_v50 = vpop.f32.mrb[62].mxu1 }
 0x194   : > { %v1641_v16 = vmax.f32 %v1094_v43, 0.0  ;;  %v1595_v52 = vmax.f32 %v1352_v50, 0.0  ;;  %v1096_v19 = vpop.f32.mrb[63].mxu0  ;;  %v1354_v53 = vpop.f32.mrb[63].mxu1 }
 0x195   : > { %v1642_v57 = vmax.f32 %v1096_v19, 0.0 }
 0x196   : > { %v1785_v34 = vpack.c.bf16 %v1641_v16, %v1638_v48  ;;  %v1763_v61 = vpack.c.bf16 %v1595_v52, %v1592_v15  ;;  %3581 = vmatmul.mubr.msk.bf16.gmra.mrb[168].mxu1 %vm1987_vm0, %v1757_v51 }
 0x197   : > { %v1786_v8 = vpack.c.bf16 %v1642_v57, %v1639_v38  ;;  %3584 = vmatprep.mubr.msk.bf16.mxu1 %vm1987_vm0, %v1760_v44 }
 0x199   : > { %v1100_v0 = vpop.f32.mrb[64].mxu0  ;;  %v1357_v3 = vpop.f32.mrb[64].mxu1  ;;  %2236 = vmatprep.mubr.bf16.mxu0 %v1786_v8 }
 0x19a   : > { %v1644_v4 = vmax.f32 %v1100_v0, 0.0  ;;  %v1102_v17 = vpop.f32.mrb[65].mxu0  ;;  %v1359_v18 = vpop.f32.mrb[65].mxu1  ;;  %2237 = vmatmul.mubr.bf16.gmra.mrb[156].mxu0 %v1785_v34  ;;  %v1598_v22 = vmax.f32 %v1357_v3, 0.0 }
 0x19b   : > { %v1645_v2 = vmax.f32 %v1102_v17, 0.0  ;;  %v1104_v5 = vpop.f32.mrb[66].mxu0  ;;  %v1360_v21 = vpop.f32.mrb[66].mxu1 }
 0x19c   : > { %v1647_v24 = vmax.f32 %v1104_v5, 0.0  ;;  %v1601_v23 = vmax.f32 %v1360_v21, 0.0  ;;  %v1106_v25 = vpop.f32.mrb[67].mxu0  ;;  %v1362_v26 = vpop.f32.mrb[67].mxu1 }
 0x19d   : > { %v1648_v11 = vmax.f32 %v1106_v25, 0.0 }
 0x19e   : > { %v1788_v51 = vpack.c.bf16 %v1647_v24, %v1644_v4  ;;  %v1766_v35 = vpack.c.bf16 %v1601_v23, %v1598_v22  ;;  %3585 = vmatmul.mubr.msk.bf16.gmra.mrb[172].mxu1 %vm1987_vm0, %v1763_v61 }
 0x19f   : > { %v1789_v54 = vpack.c.bf16 %v1648_v11, %v1645_v2 }
 0x1a0   : > { %3588 = vmatprep.mubr.msk.bf16.mxu1 %vm1987_vm0, %v1766_v35 }
 0x1a1   : > { %v1110_v27 = vpop.f32.mrb[68].mxu0  ;;  %v1365_v28 = vpop.f32.mrb[68].mxu1  ;;  %2244 = vmatprep.mubr.bf16.mxu0 %v1789_v54 }
 0x1a2   : > { %v1650_v6 = vmax.f32 %v1110_v27, 0.0  ;;  %v1112_v14 = vpop.f32.mrb[69].mxu0  ;;  %v1367_v13 = vpop.f32.mrb[69].mxu1  ;;  %2245 = vmatmul.mubr.bf16.gmra.mrb[160].mxu0 %v1788_v51  ;;  %v1604_v37 = vmax.f32 %v1365_v28, 0.0 }
 0x1a3   : > { %v1651_v32 = vmax.f32 %v1112_v14, 0.0  ;;  %v1114_v9 = vpop.f32.mrb[70].mxu0  ;;  %v1368_v12 = vpop.f32.mrb[70].mxu1 }
 0x1a4   : > { %v1653_v41 = vmax.f32 %v1114_v9, 0.0  ;;  %v1607_v49 = vmax.f32 %v1368_v12, 0.0  ;;  %v1116_v42 = vpop.f32.mrb[71].mxu0  ;;  %v1370_v44 = vpop.f32.mrb[71].mxu1 }
 0x1a5   : > { %v1654_v20 = vmax.f32 %v1116_v42, 0.0 }
 0x1a6   : > { %v1791_v45 = vpack.c.bf16 %v1653_v41, %v1650_v6  ;;  %v1769_v46 = vpack.c.bf16 %v1607_v49, %v1604_v37 }
 0x1a7   : > { %v1792_v48 = vpack.c.bf16 %v1654_v20, %v1651_v32 }
 0x1a8   : > { %3589 = vmatmul.mubr.msk.bf16.gmra.mrb[176].mxu1 %vm1987_vm0, %v1769_v46 }
 0x1a9   : > { %v1120_v59 = vpop.f32.mrb[72].mxu0  ;;  %v1373_v62 = vpop.f32.mrb[72].mxu1  ;;  %2252 = vmatprep.mubr.bf16.mxu0 %v1792_v48 }
 0x1aa   : > { %v1656_v38 = vmax.f32 %v1120_v59, 0.0  ;;  %v1122_v43 = vpop.f32.mrb[73].mxu0  ;;  %v1375_v50 = vpop.f32.mrb[73].mxu1  ;;  %2253 = vmatmul.mubr.bf16.gmra.mrb[164].mxu0 %v1791_v45  ;;  %v1610_v19 = vmax.f32 %v1373_v62, 0.0 }
 0x1ab   : > { %v1657_v15 = vmax.f32 %v1122_v43, 0.0  ;;  %v1124_v16 = vpop.f32.mrb[74].mxu0  ;;  %v1376_v52 = vpop.f32.mrb[74].mxu1 }
 0x1ac   : > { %v1659_v53 = vmax.f32 %v1124_v16, 0.0  ;;  %v1613_v57 = vmax.f32 %v1376_v52, 0.0  ;;  %v1126_v34 = vpop.f32.mrb[75].mxu0  ;;  %v1378_v61 = vpop.f32.mrb[75].mxu1 }
 0x1ad   : > { %v1660_v8 = vmax.f32 %v1126_v34, 0.0 }
 0x1ae   : > { %v1794_v0 = vpack.c.bf16 %v1659_v53, %v1656_v38  ;;  %v1772_v3 = vpack.c.bf16 %v1613_v57, %v1610_v19 }
 0x1af   : > { %v1795_v4 = vpack.c.bf16 %v1660_v8, %v1657_v15 }
 0x1b0   : > { %3592 = vmatprep.mubr.msk.bf16.mxu1 %vm1987_vm0, %v1772_v3 }
 0x1b1   : > { %v1130_v17 = vpop.f32.mrb[76].mxu0  ;;  %v1381_v18 = vpop.f32.mrb[76].mxu1  ;;  %2260 = vmatprep.mubr.bf16.mxu0 %v1795_v4 }
 0x1b2   : > { %v1662_v2 = vmax.f32 %v1130_v17, 0.0  ;;  %v1132_v5 = vpop.f32.mrb[77].mxu0  ;;  %v1383_v21 = vpop.f32.mrb[77].mxu1  ;;  %2261 = vmatmul.mubr.bf16.gmra.mrb[168].mxu0 %v1794_v0  ;;  %v1616_v25 = vmax.f32 %v1381_v18, 0.0 }
 0x1b3   : > { %v1663_v22 = vmax.f32 %v1132_v5, 0.0  ;;  %v1134_v24 = vpop.f32.mrb[78].mxu0  ;;  %v1384_v23 = vpop.f32.mrb[78].mxu1 }
 0x1b4   : > { %v1665_v26 = vmax.f32 %v1134_v24, 0.0  ;;  %v1619_v11 = vmax.f32 %v1384_v23, 0.0  ;;  %v1136_v51 = vpop.f32.mrb[79].mxu0  ;;  %v1386_v35 = vpop.f32.mrb[79].mxu1 }
 0x1b5   : > { %v1666_v54 = vmax.f32 %v1136_v51, 0.0 }
 0x1b6   : > { %v1797_v27 = vpack.c.bf16 %v1665_v26, %v1662_v2  ;;  %v1775_v28 = vpack.c.bf16 %v1619_v11, %v1616_v25 }
 0x1b7   : > { %v1798_v6 = vpack.c.bf16 %v1666_v54, %v1663_v22 }
 0x1b8   : > { %3593 = vmatmul.mubr.msk.bf16.gmra.mrb[180].mxu1 %vm1987_vm0, %v1775_v28 }
 0x1b9   : > { %v1140_v14 = vpop.f32.mrb[80].mxu0  ;;  %v1389_v13 = vpop.f32.mrb[80].mxu1  ;;  %2268 = vmatprep.mubr.bf16.mxu0 %v1798_v6 }
 0x1ba   : > { %v1668_v32 = vmax.f32 %v1140_v14, 0.0  ;;  %v1142_v9 = vpop.f32.mrb[81].mxu0  ;;  %v1391_v12 = vpop.f32.mrb[81].mxu1  ;;  %2269 = vmatmul.mubr.bf16.gmra.mrb[172].mxu0 %v1797_v27  ;;  %v1622_v42 = vmax.f32 %v1389_v13, 0.0 }
 0x1bb   : > { %v1669_v37 = vmax.f32 %v1142_v9, 0.0  ;;  %v1144_v41 = vpop.f32.mrb[82].mxu0  ;;  %v1392_v49 = vpop.f32.mrb[82].mxu1 }
 0x1bc   : > { %v1671_v44 = vmax.f32 %v1144_v41, 0.0  ;;  %v1625_v20 = vmax.f32 %v1392_v49, 0.0  ;;  %v1146_v45 = vpop.f32.mrb[83].mxu0  ;;  %v1394_v46 = vpop.f32.mrb[83].mxu1 }
 0x1bd   : > { %v1672_v48 = vmax.f32 %v1146_v45, 0.0 }
 0x1be   : > { %v1800_v59 = vpack.c.bf16 %v1671_v44, %v1668_v32  ;;  %v1778_v62 = vpack.c.bf16 %v1625_v20, %v1622_v42 }
 0x1bf   : > { %v1801_v38 = vpack.c.bf16 %v1672_v48, %v1669_v37 }
 0x1c0   : > { %3596 = vmatprep.mubr.msk.bf16.mxu1 %vm1987_vm0, %v1778_v62 }
 0x1c1   : > { %v1150_v43 = vpop.f32.mrb[84].mxu0  ;;  %v1397_v50 = vpop.f32.mrb[84].mxu1  ;;  %2276 = vmatprep.mubr.bf16.mxu0 %v1801_v38 }
 0x1c2   : > { %v1674_v15 = vmax.f32 %v1150_v43, 0.0  ;;  %v1152_v16 = vpop.f32.mrb[85].mxu0  ;;  %v1399_v52 = vpop.f32.mrb[85].mxu1  ;;  %2277 = vmatmul.mubr.bf16.gmra.mrb[176].mxu0 %v1800_v59  ;;  %v1628_v34 = vmax.f32 %v1397_v50, 0.0 }
 0x1c3   : > { %v1675_v19 = vmax.f32 %v1152_v16, 0.0  ;;  %v1154_v53 = vpop.f32.mrb[86].mxu0  ;;  %v1400_v57 = vpop.f32.mrb[86].mxu1 }
 0x1c4   : > { %v1677_v61 = vmax.f32 %v1154_v53, 0.0  ;;  %v1631_v8 = vmax.f32 %v1400_v57, 0.0  ;;  %v1156_v0 = vpop.f32.mrb[87].mxu0  ;;  %v1402_v3 = vpop.f32.mrb[87].mxu1 }
 0x1c5   : > { %v1678_v4 = vmax.f32 %v1156_v0, 0.0 }
 0x1c6   : > { %v1803_v17 = vpack.c.bf16 %v1677_v61, %v1674_v15  ;;  %v1781_v18 = vpack.c.bf16 %v1631_v8, %v1628_v34 }
 0x1c7   : > { %v1804_v2 = vpack.c.bf16 %v1678_v4, %v1675_v19 }
 0x1c8   : > { %3597 = vmatmul.mubr.msk.bf16.gmra.mrb[184].mxu1 %vm1987_vm0, %v1781_v18 }
 0x1c9   : > { %v1160_v5 = vpop.f32.mrb[88].mxu0  ;;  %v1405_v21 = vpop.f32.mrb[88].mxu1  ;;  %2284 = vmatprep.mubr.bf16.mxu0 %v1804_v2 }
 0x1ca   : > { %v1680_v22 = vmax.f32 %v1160_v5, 0.0  ;;  %v1162_v24 = vpop.f32.mrb[89].mxu0  ;;  %v1407_v23 = vpop.f32.mrb[89].mxu1  ;;  %2285 = vmatmul.mubr.bf16.gmra.mrb[180].mxu0 %v1803_v17  ;;  %v1634_v51 = vmax.f32 %v1405_v21, 0.0 }
 0x1cb   : > { %v1681_v25 = vmax.f32 %v1162_v24, 0.0  ;;  %v1164_v26 = vpop.f32.mrb[90].mxu0  ;;  %v1408_v11 = vpop.f32.mrb[90].mxu1 }
 0x1cc   : > { %v1683_v35 = vmax.f32 %v1164_v26, 0.0  ;;  %v1637_v54 = vmax.f32 %v1408_v11, 0.0  ;;  %v1166_v27 = vpop.f32.mrb[91].mxu0  ;;  %v1410_v28 = vpop.f32.mrb[91].mxu1 }
 0x1cd   : > { %v1684_v6 = vmax.f32 %v1166_v27, 0.0 }
 0x1ce   : > { %v1806_v14 = vpack.c.bf16 %v1683_v35, %v1680_v22  ;;  %v1784_v13 = vpack.c.bf16 %v1637_v54, %v1634_v51 }
 0x1cf   : > { %v1807_v32 = vpack.c.bf16 %v1684_v6, %v1681_v25 }
 0x1d0   : > { %3600 = vmatprep.mubr.msk.bf16.mxu1 %vm1987_vm0, %v1784_v13 }
 0x1d1   : > { %v1170_v9 = vpop.f32.mrb[92].mxu0  ;;  %v1413_v12 = vpop.f32.mrb[92].mxu1  ;;  %2292 = vmatprep.mubr.bf16.mxu0 %v1807_v32 }
 0x1d2   : > { %v1686_v37 = vmax.f32 %v1170_v9, 0.0  ;;  %v1172_v41 = vpop.f32.mrb[93].mxu0  ;;  %v1415_v49 = vpop.f32.mrb[93].mxu1  ;;  %2293 = vmatmul.mubr.bf16.gmra.mrb[184].mxu0 %v1806_v14  ;;  %v1640_v45 = vmax.f32 %v1413_v12, 0.0 }
 0x1d3   : > { %v1687_v42 = vmax.f32 %v1172_v41, 0.0  ;;  %v1174_v44 = vpop.f32.mrb[94].mxu0  ;;  %v1416_v20 = vpop.f32.mrb[94].mxu1 }
 0x1d4   : > { %v1689_v46 = vmax.f32 %v1174_v44, 0.0  ;;  %v1643_v48 = vmax.f32 %v1416_v20, 0.0  ;;  %v1176_v59 = vpop.f32.mrb[95].mxu0  ;;  %v1418_v62 = vpop.f32.mrb[95].mxu1 }
 0x1d5   : > { %v1690_v38 = vmax.f32 %v1176_v59, 0.0 }
 0x1d6   : > { %v1809_v43 = vpack.c.bf16 %v1689_v46, %v1686_v37  ;;  %v1787_v50 = vpack.c.bf16 %v1643_v48, %v1640_v45 }
 0x1d7   : > { %v1810_v15 = vpack.c.bf16 %v1690_v38, %v1687_v42 }
 0x1d8   : > { %3601 = vmatmul.mubr.msk.bf16.gmra.mrb[188].mxu1 %vm1987_vm0, %v1787_v50 }
 0x1d9   : > { %v1421_v16 = vpop.f32.mrb[96].mxu1  ;;  %2300 = vmatprep.mubr.bf16.mxu0 %v1810_v15 }
 0x1da   : > { %v1423_v52 = vpop.f32.mrb[97].mxu1  ;;  %2301 = vmatmul.mubr.bf16.gmra.mrb[188].mxu0 %v1809_v43  ;;  %v1646_v53 = vmax.f32 %v1421_v16, 0.0 }
 0x1db   : > { %v1424_v19 = vpop.f32.mrb[98].mxu1  ;;  %2308 = vmatprep.mubr.bf16.mxu0 %v4371_v40 }
 0x1dc   : > { %v1649_v57 = vmax.f32 %v1424_v19, 0.0  ;;  %v1426_v34 = vpop.f32.mrb[99].mxu1 }
 0x1de   : > { %v1790_v61 = vpack.c.bf16 %v1649_v57, %v1646_v53 }
 0x1e0   : > { %3604 = vmatprep.mubr.msk.bf16.mxu1 %vm1987_vm0, %v1790_v61 }
 0x1e1   : > { %v1429_v8 = vpop.f32.mrb[100].mxu1 }
 0x1e2   : > { %v1431_v0 = vpop.f32.mrb[101].mxu1  ;;  %2309 = vmatmul.mubr.bf16.gmra.mrb[192].mxu0 %v4369_v36  ;;  %v1652_v4 = vmax.f32 %v1429_v8, 0.0 }
 0x1e3   : > { %v1432_v3 = vpop.f32.mrb[102].mxu1  ;;  %2316 = vmatprep.mubr.bf16.mxu0 %v4376_v1 }
 0x1e4   : > { %v1655_v17 = vmax.f32 %v1432_v3, 0.0  ;;  %v1434_v18 = vpop.f32.mrb[103].mxu1 }
 0x1e6   : > { %v1793_v2 = vpack.c.bf16 %v1655_v17, %v1652_v4 }
 0x1e8   : > { %3605 = vmatmul.mubr.msk.bf16.gmra.mrb[192].mxu1 %vm1987_vm0, %v1793_v2 }
 0x1e9   : > { %v1437_v40 = vpop.f32.mrb[104].mxu1 }
 0x1ea   : > { %v1439_v5 = vpop.f32.mrb[105].mxu1  ;;  %2317 = vmatmul.mubr.bf16.gmra.mrb[196].mxu0 %v4373_v63  ;;  %v1658_v22 = vmax.f32 %v1437_v40, 0.0 }
 0x1eb   : > { %v1440_v21 = vpop.f32.mrb[106].mxu1  ;;  %2324 = vmatprep.mubr.bf16.mxu0 %v4382_v33 }
 0x1ec   : > { %v1661_v24 = vmax.f32 %v1440_v21, 0.0  ;;  %v1442_v23 = vpop.f32.mrb[107].mxu1 }
 0x1ee   : > { %v1796_v36 = vpack.c.bf16 %v1661_v24, %v1658_v22 }
 0x1f0   : > { %3608 = vmatprep.mubr.msk.bf16.mxu1 %vm1987_vm0, %v1796_v36 }
 0x1f1   : > { %v1445_v1 = vpop.f32.mrb[108].mxu1 }
 0x1f2   : > { %v1447_v25 = vpop.f32.mrb[109].mxu1  ;;  %2325 = vmatmul.mubr.bf16.gmra.mrb[200].mxu0 %v4379_v7  ;;  %v1664_v11 = vmax.f32 %v1445_v1, 0.0 }
 0x1f3   : > { %v1448_v26 = vpop.f32.mrb[110].mxu1  ;;  %2332 = vmatprep.mubr.bf16.mxu0 %v4388_v60 }
 0x1f4   : > { %v1667_v51 = vmax.f32 %v1448_v26, 0.0  ;;  %v1450_v35 = vpop.f32.mrb[111].mxu1 }
 0x1f5   : > { %v4462_v63 = vpop.f32.mrb[96].mxu0 }
 0x1f6   : > { %v1799_v54 = vpack.c.bf16 %v1667_v51, %v1664_v11  ;;  %v2120_v33 = vpop.f32.mrb[97].mxu0 }
 0x1f7   : > { %v4464_v27 = vpop.f32.mrb[98].mxu0 }
 0x1f8   : > { %3609 = vmatmul.mubr.msk.bf16.gmra.mrb[196].mxu1 %vm1987_vm0, %v1799_v54  ;;  %v2123_v28 = vpop.f32.mrb[99].mxu0 }
 0x1f9   : > { %v1453_v6 = vpop.f32.mrb[112].mxu1 }
 0x1fa   : > { %v1455_v14 = vpop.f32.mrb[113].mxu1  ;;  %2333 = vmatmul.mubr.bf16.gmra.mrb[204].mxu0 %v4385_v10  ;;  %v1670_v60 = vmax.f32 %v1453_v6, 0.0 }
 0x1fb   : > { %v1456_v7 = vpop.f32.mrb[114].mxu1  ;;  %2340 = vmatprep.mubr.bf16.mxu0 %v4394_v31 }
 0x1fc   : > { %v1673_v13 = vmax.f32 %v1456_v7, 0.0  ;;  %v1458_v32 = vpop.f32.mrb[115].mxu1 }
 0x1fd   : > { %v4469_v9 = vpop.f32.mrb[100].mxu0 }
 0x1fe   : > { %v1802_v12 = vpack.c.bf16 %v1673_v13, %v1670_v60  ;;  %v2128_v37 = vpop.f32.mrb[101].mxu0 }
 0x1ff   : > { %v4471_v41 = vpop.f32.mrb[102].mxu0 }
 0x200   : > { %3612 = vmatprep.mubr.msk.bf16.mxu1 %vm1987_vm0, %v1802_v12  ;;  %v2131_v49 = vpop.f32.mrb[103].mxu0 }
 0x201   : > { %v1461_v42 = vpop.f32.mrb[116].mxu1 }
 0x202   : > { %v1463_v44 = vpop.f32.mrb[117].mxu1  ;;  %2341 = vmatmul.mubr.bf16.gmra.mrb[208].mxu0 %v4391_v29  ;;  %v1676_v31 = vmax.f32 %v1461_v42, 0.0 }
 0x203   : > { %v1464_v10 = vpop.f32.mrb[118].mxu1  ;;  %2348 = vmatprep.mubr.bf16.mxu0 %v4400_v58 }
 0x204   : > { %v1679_v20 = vmax.f32 %v1464_v10, 0.0  ;;  %v1466_v45 = vpop.f32.mrb[119].mxu1 }
 0x205   : > { %v4476_v46 = vpop.f32.mrb[104].mxu0 }
 0x206   : > { %v1805_v48 = vpack.c.bf16 %v1679_v20, %v1676_v31  ;;  %v2136_v59 = vpop.f32.mrb[105].mxu0 }
 0x207   : > { %v4478_v62 = vpop.f32.mrb[106].mxu0 }
 0x208   : > { %3613 = vmatmul.mubr.msk.bf16.gmra.mrb[200].mxu1 %vm1987_vm0, %v1805_v48  ;;  %v2139_v38 = vpop.f32.mrb[107].mxu0 }
 0x209   : > { %v1469_v43 = vpop.f32.mrb[120].mxu1 }
 0x20a   : > { %v1471_v50 = vpop.f32.mrb[121].mxu1  ;;  %2349 = vmatmul.mubr.bf16.gmra.mrb[212].mxu0 %v4397_v56  ;;  %v1682_v58 = vmax.f32 %v1469_v43, 0.0 }
 0x20b   : > { %v1472_v29 = vpop.f32.mrb[122].mxu1  ;;  %2356 = vmatprep.mubr.bf16.mxu0 %v4406_v30 }
 0x20c   : > { %v1685_v15 = vmax.f32 %v1472_v29, 0.0  ;;  %v1474_v16 = vpop.f32.mrb[123].mxu1 }
 0x20d   : > { %v4483_v52 = vpop.f32.mrb[108].mxu0 }
 0x20e   : > { %v1808_v19 = vpack.c.bf16 %v1685_v15, %v1682_v58  ;;  %v2144_v53 = vpop.f32.mrb[109].mxu0 }
 0x20f   : > { %v4485_v57 = vpop.f32.mrb[110].mxu0 }
 0x210   : > { %3616 = vmatprep.mubr.msk.bf16.mxu1 %vm1987_vm0, %v1808_v19  ;;  %v2147_v34 = vpop.f32.mrb[111].mxu0 }
 0x211   : > { %v1477_v61 = vpop.f32.mrb[124].mxu1 }
 0x212   : > { %v1479_v8 = vpop.f32.mrb[125].mxu1  ;;  %2357 = vmatmul.mubr.bf16.gmra.mrb[216].mxu0 %v4403_v39  ;;  %v1688_v30 = vmax.f32 %v1477_v61, 0.0 }
 0x213   : > { %v1480_v56 = vpop.f32.mrb[126].mxu1  ;;  %2364 = vmatprep.mubr.bf16.mxu0 %v4412_v55 }
 0x214   : > { %v1691_v0 = vmax.f32 %v1480_v56, 0.0  ;;  %v1482_v3 = vpop.f32.mrb[127].mxu1 }
 0x215   : > { %v4490_v4 = vpop.f32.mrb[112].mxu0 }
 0x216   : > { %v1811_v17 = vpack.c.bf16 %v1691_v0, %v1688_v30  ;;  %v2152_v18 = vpop.f32.mrb[113].mxu0 }
 0x217   : > { %v4492_v2 = vpop.f32.mrb[114].mxu0 }
 0x218   : > { %3617 = vmatmul.mubr.msk.bf16.gmra.mrb[204].mxu1 %vm1987_vm0, %v1811_v17  ;;  %v2155_v40 = vpop.f32.mrb[115].mxu0 }
 0x219   : > { %v1485_v5 = vpop.f32.mrb[128].mxu1 }
 0x21a   : > { %v1487_v21 = vpop.f32.mrb[129].mxu1  ;;  %2365 = vmatmul.mubr.bf16.gmra.mrb[220].mxu0 %v4409_v47  ;;  %v1694_v22 = vmax.f32 %v1485_v5, 0.0 }
 0x21b   : > { %v1488_v39 = vpop.f32.mrb[130].mxu1 }
 0x21c   : > { %v1697_v24 = vmax.f32 %v1488_v39, 0.0  ;;  %v1490_v55 = vpop.f32.mrb[131].mxu1 }
 0x21d   : > { %v4496_v23 = vpop.f32.mrb[116].mxu0 }
 0x21e   : > { %v1814_v36 = vpack.c.bf16 %v1697_v24, %v1694_v22  ;;  %v2160_v1 = vpop.f32.mrb[117].mxu0 }
 0x21f   : > { %v4498_v25 = vpop.f32.mrb[118].mxu0 }
 0x220   : > { %3620 = vmatprep.mubr.msk.bf16.mxu1 %vm1987_vm0, %v1814_v36  ;;  %v2163_v26 = vpop.f32.mrb[119].mxu0 }
 0x221   : > { %v1493_v11 = vpop.f32.mrb[132].mxu1 }
 0x222   : > { %v1495_v51 = vpop.f32.mrb[133].mxu1  ;;  %v1700_v54 = vmax.f32 %v1493_v11, 0.0 }
 0x223   : > { %v1496_v35 = vpop.f32.mrb[134].mxu1 }
 0x224   : > { %v1703_v33 = vmax.f32 %v1496_v35, 0.0  ;;  %v1498_v28 = vpop.f32.mrb[135].mxu1 }
 0x225   : > { %v4501_v47 = vpop.f32.mrb[120].mxu0 }
 0x226   : > { %v1817_v6 = vpack.c.bf16 %v1703_v33, %v1700_v54  ;;  %v2168_v14 = vpop.f32.mrb[121].mxu0 }
 0x227   : > { %v4503_v7 = vpop.f32.mrb[122].mxu0 }
 0x228   : > { %3621 = vmatmul.mubr.msk.bf16.gmra.mrb[208].mxu1 %vm1987_vm0, %v1817_v6  ;;  %v2171_v60 = vpop.f32.mrb[123].mxu0 }
 0x229   : > { %v1501_v13 = vpop.f32.mrb[136].mxu1 }
 0x22a   : > { %v1503_v32 = vpop.f32.mrb[137].mxu1  ;;  %v1706_v37 = vmax.f32 %v1501_v13, 0.0 }
 0x22b   : > { %v1504_v12 = vpop.f32.mrb[138].mxu1 }
 0x22c   : > { %v1709_v49 = vmax.f32 %v1504_v12, 0.0  ;;  %v1506_v42 = vpop.f32.mrb[139].mxu1 }
 0x22d   : > { %v4506_v44 = vpop.f32.mrb[124].mxu0 }
 0x22e   : > { %v1820_v10 = vpack.c.bf16 %v1709_v49, %v1706_v37  ;;  %v2176_v31 = vpop.f32.mrb[125].mxu0 }
 0x22f   : > { %v4508_v20 = vpop.f32.mrb[126].mxu0 }
 0x230   : > { %3624 = vmatprep.mubr.msk.bf16.mxu1 %vm1987_vm0, %v1820_v10  ;;  %v2179_v45 = vpop.f32.mrb[127].mxu0 }
 0x231   : > { %v1509_v48 = vpop.f32.mrb[140].mxu1 }
 0x232   : > { %v1511_v59 = vpop.f32.mrb[141].mxu1  ;;  %v1712_v43 = vmax.f32 %v1509_v48, 0.0 }
 0x233   : > { %v1512_v38 = vpop.f32.mrb[142].mxu1 }
 0x234   : > { %v1715_v50 = vmax.f32 %v1512_v38, 0.0  ;;  %v1514_v29 = vpop.f32.mrb[143].mxu1 }
 0x235   : > { %v4511_v58 = vpop.f32.mrb[128].mxu0 }
 0x236   : > { %v1823_v15 = vpack.c.bf16 %v1715_v50, %v1712_v43  ;;  %v2184_v16 = vpop.f32.mrb[129].mxu0  ;;  %v4536_v43 = vld [vmem:[%s5416_s3] ss:$0 sm:$0xff] }
 0x237   : > { %v4513_v19 = vpop.f32.mrb[130].mxu0  ;;  %v2127_v16 = vadd.f32 %v4536_v43, %v4469_v9 }
 0x238   : > { %3625 = vmatmul.mubr.msk.bf16.gmra.mrb[212].mxu1 %vm1987_vm0, %v1823_v15  ;;  %v2187_v53 = vpop.f32.mrb[131].mxu0 }
 0x239   : > { %v1517_v34 = vpop.f32.mrb[144].mxu1 }
 0x23a   : > { %v1519_v61 = vpop.f32.mrb[145].mxu1  ;;  %v1718_v56 = vmax.f32 %v1517_v34, 0.0  ;;  %v2119_v34 = vadd.f32 %v4536_v43, %v4462_v63 }
 0x23b   : > { %v1520_v8 = vpop.f32.mrb[146].mxu1 }
 0x23c   : > { %v1721_v30 = vmax.f32 %v1520_v8, 0.0  ;;  %v1522_v0 = vpop.f32.mrb[147].mxu1  ;;  %v2130_v8 = vadd.f32 %v4536_v43, %v4471_v41 }
 0x23d   : > { %v4516_v3 = vpop.f32.mrb[132].mxu0  ;;  %v2122_v0 = vadd.f32 %v4536_v43, %v4464_v27  ;;  %v2143_v27 = vadd.f32 %v4536_v43, %v4483_v52 }
 0x23e   : > { %v1826_v17 = vpack.c.bf16 %v1721_v30, %v1718_v56  ;;  %v2192_v18 = vpop.f32.mrb[133].mxu0 }
 0x23f   : > { %v4518_v40 = vpop.f32.mrb[134].mxu0 }
 0x240   : > { %3628 = vmatprep.mubr.msk.bf16.mxu1 %vm1987_vm0, %v1826_v17  ;;  %v2195_v5 = vpop.f32.mrb[135].mxu0 }
 0x241   : > { %v1525_v21 = vpop.f32.mrb[148].mxu1 }
 0x242   : > { %v1527_v39 = vpop.f32.mrb[149].mxu1  ;;  %v1724_v24 = vmax.f32 %v1525_v21, 0.0 }
 0x243   : > { %v1528_v22 = vpop.f32.mrb[150].mxu1 }
 0x244   : > { %v1727_v55 = vmax.f32 %v1528_v22, 0.0  ;;  %v1530_v36 = vpop.f32.mrb[151].mxu1 }
 0x245   : > { %v4521_v1 = vpop.f32.mrb[136].mxu0 }
 0x246   : > { %v1829_v26 = vpack.c.bf16 %v1727_v55, %v1724_v24  ;;  %v2200_v11 = vpop.f32.mrb[137].mxu0 }
 0x247   : > { %v4523_v51 = vpop.f32.mrb[138].mxu0 }
 0x248   : > { %3629 = vmatmul.mubr.msk.bf16.gmra.mrb[216].mxu1 %vm1987_vm0, %v1829_v26  ;;  %v2203_v35 = vpop.f32.mrb[139].mxu0  ;;  %v2135_v26 = vadd.f32 %v4536_v43, %v4476_v46  ;;  %v2138_v46 = vadd.f32 %v4536_v43, %v4478_v62 }
 0x249   : > { %v1533_v54 = vpop.f32.mrb[152].mxu1 }
 0x24a   : > { %v1535_v33 = vpop.f32.mrb[153].mxu1  ;;  %v1730_v6 = vmax.f32 %v1533_v54, 0.0 }
 0x24b   : > { %v1536_v28 = vpop.f32.mrb[154].mxu1 }
 0x24c   : > { %v1733_v14 = vmax.f32 %v1536_v28, 0.0  ;;  %v1538_v60 = vpop.f32.mrb[155].mxu1  ;;  %v2146_v28 = vadd.f32 %v4536_v43, %v4485_v57 }
 0x24d   : > { %v4526_v13 = vpop.f32.mrb[140].mxu0 }
 0x24e   : > { %v1832_v32 = vpack.c.bf16 %v1733_v14, %v1730_v6  ;;  %v2208_v12 = vpop.f32.mrb[141].mxu0 }
 0x24f   : > { %v4528_v37 = vpop.f32.mrb[142].mxu0 }
 0x250   : > { %3632 = vmatprep.mubr.msk.bf16.mxu1 %vm1987_vm0, %v1832_v32  ;;  %v2211_v49 = vpop.f32.mrb[143].mxu0 }
 0x251   : > { %v1541_v42 = vpop.f32.mrb[156].mxu1 }
 0x252   : > { %v1543_v10 = vpop.f32.mrb[157].mxu1  ;;  %v1736_v45 = vmax.f32 %v1541_v42, 0.0 }
 0x253   : > { %v1544_v31 = vpop.f32.mrb[158].mxu1 }
 0x254   : > { %v1739_v48 = vmax.f32 %v1544_v31, 0.0  ;;  %v1546_v59 = vpop.f32.mrb[159].mxu1 }
 0x255   : > { %v4531_v38 = vpop.f32.mrb[144].mxu0 }
 0x256   : > { %v1835_v50 = vpack.c.bf16 %v1739_v48, %v1736_v45  ;;  %v2216_v29 = vpop.f32.mrb[145].mxu0 }
 0x257   : > { %v4538_v15 = vpop.f32.mrb[146].mxu0 }
 0x258   : > { %3633 = vmatmul.mubr.msk.bf16.gmra.mrb[220].mxu1 %vm1987_vm0, %v1835_v50  ;;  %v2219_v53 = vpop.f32.mrb[147].mxu0 }
 0x259   : > { %v3574_v61 = vpop.f32.mrb[160].mxu1 }
 0x25a   : > { %v4547_v56 = vadd.f32 %v3574_v61, %v2127_v16  ;;  %v2407_v30 = vpop.f32.mrb[161].mxu1 }
 0x25b   : > { %v4551_v17 = vadd.f32 %v2407_v30, %v2119_v34  ;;  %v3575_v18 = vpop.f32.mrb[162].mxu1  ;;  %v2159_v34 = vadd.f32 %v4536_v43, %v4496_v23  ;;  %v2151_v30 = vadd.f32 %v4536_v43, %v4490_v4  ;;  %v2154_v23 = vadd.f32 %v4536_v43, %v4492_v2 }
 0x25c   : > { %v4553_v9 = vadd.f32 %v3575_v18, %v2130_v8  ;;  %v2410_v5 = vpop.f32.mrb[163].mxu1  ;;  %v2664_v22 = vmax.f32 %v4547_v56, 0.0 }
 0x25d   : > { %v2662_v21 = vmax.f32 %v4551_v17, 0.0  ;;  %v4556_v39 = vadd.f32 %v2410_v5, %v2122_v0  ;;  %v4558_v63 = vpop.f32.mrb[148].mxu0 }
 0x25e   : > { %v2224_v41 = vpop.f32.mrb[149].mxu0  ;;  %v2665_v35 = vmax.f32 %v4553_v9, 0.0  ;;  %v2730_v60 = vsel %vm2726_vm1, %v2664_v22, 0.0 }
 0x25f   : > { %v2663_v24 = vmax.f32 %v4556_v39, 0.0  ;;  %v4562_v55 = vpop.f32.mrb[150].mxu0  ;;  %v2727_v11 = vsel %vm2726_vm1, %v2662_v21, 0.0  ;;  %v2162_v41 = vadd.f32 %v4536_v43, %v4498_v25 }
 0x260   : > { %v2227_v36 = vpop.f32.mrb[151].mxu0  ;;  %v2732_v57 = vsel %vm2726_vm1, %v2665_v35, 0.0 }
 0x261   : > { %v2728_v54 = vsel %vm2726_vm1, %v2663_v24, 0.0  ;;  %v3578_v33 = vpop.f32.mrb[164].mxu1 }
 0x262   : > { %v2729_v6 = vadd.f32 %v2728_v54, %v2727_v11  ;;  %v4577_v52 = vadd.f32 %v3578_v33, %v2143_v27  ;;  %v2423_v14 = vpop.f32.mrb[165].mxu1 }
 0x263   : > { %v4584_v32 = vadd.f32 %v2423_v14, %v2135_v26  ;;  %v3579_v12 = vpop.f32.mrb[166].mxu1 }
 0x264   : > { %v2731_v49 = vadd.f32 %v2730_v60, %v2729_v6  ;;  %v4586_v42 = vadd.f32 %v3579_v12, %v2146_v28  ;;  %v2426_v10 = vpop.f32.mrb[167].mxu1  ;;  %v2668_v50 = vmax.f32 %v4577_v52, 0.0 }
 0x265   : > { %v2666_v31 = vmax.f32 %v4584_v32, 0.0  ;;  %v4592_v45 = vadd.f32 %v2426_v10, %v2138_v46  ;;  %v4594_v62 = vpop.f32.mrb[152].mxu0  ;;  %v2194_v32 = vadd.f32 %v4536_v43, %v4518_v40 }
 0x266   : > { %v2733_v48 = vadd.f32 %v2732_v57, %v2731_v49  ;;  %v2232_v59 = vpop.f32.mrb[153].mxu0  ;;  %v2669_v0 = vmax.f32 %v4586_v42, 0.0  ;;  %v2738_v4 = vsel %vm2726_vm1, %v2668_v50, 0.0 }
 0x267   : > { %v2734_v29 = vsel %vm2726_vm1, %v2666_v31, 0.0  ;;  %v2667_v16 = vmax.f32 %v4592_v45, 0.0  ;;  %v4601_v53 = vpop.f32.mrb[154].mxu0  ;;  %v2175_v59 = vadd.f32 %v4536_v43, %v4506_v44 }
 0x268   : > { %v2735_v61 = vadd.f32 %v2734_v29, %v2733_v48  ;;  %v2235_v8 = vpop.f32.mrb[155].mxu0  ;;  %v2740_v25 = vsel %vm2726_vm1, %v2669_v0, 0.0 }
 0x269   : > { %v2736_v18 = vsel %vm2726_vm1, %v2667_v16, 0.0  ;;  %v3582_v5 = vpop.f32.mrb[168].mxu1 }
 0x26a   : > { %v2737_v27 = vadd.f32 %v2736_v18, %v2735_v61  ;;  %v4613_v36 = vadd.f32 %v3582_v5, %v2159_v34  ;;  %v2439_v26 = vpop.f32.mrb[169].mxu1  ;;  %v2167_v34 = vadd.f32 %v4536_v43, %v4501_v47  ;;  %v2170_v47 = vadd.f32 %v4536_v43, %v4503_v7 }
 0x26b   : > { %v4620_v11 = vadd.f32 %v2439_v26, %v2151_v30  ;;  %v3583_v54 = vpop.f32.mrb[170].mxu1 }
 0x26c   : > { %v2739_v33 = vadd.f32 %v2738_v4, %v2737_v27  ;;  %v4622_v28 = vadd.f32 %v3583_v54, %v2162_v41  ;;  %v2442_v6 = vpop.f32.mrb[171].mxu1  ;;  %v2672_v49 = vmax.f32 %v4613_v36, 0.0  ;;  %v2178_v41 = vadd.f32 %v4536_v43, %v4508_v20 }
 0x26d   : > { %v2670_v14 = vmax.f32 %v4620_v11, 0.0  ;;  %v4628_v46 = vadd.f32 %v2442_v6, %v2154_v23  ;;  %v4630_v2 = vpop.f32.mrb[156].mxu0 }
 0x26e   : > { %v2741_v60 = vadd.f32 %v2740_v25, %v2739_v33  ;;  %v2240_v12 = vpop.f32.mrb[157].mxu0  ;;  %v2673_v8 = vmax.f32 %v4622_v28, 0.0  ;;  %v2751_v23 = vsel %vm2726_vm1, %v2672_v49, 0.0 }
 0x26f   : > { %v2671_v10 = vmax.f32 %v4628_v46, 0.0  ;;  %v4634_v57 = vpop.f32.mrb[158].mxu0  ;;  %v2748_v61 = vsel %vm2726_vm1, %v2670_v14, 0.0 }
 0x270   : > { %v2742_v48 = vrot.slane %v2741_v60, 4  ;;  %v2243_v29 = vpop.f32.mrb[159].mxu0  ;;  %v2753_v20 = vsel %vm2726_vm1, %v2673_v8, 0.0 }
 0x271   : > { %v2749_v30 = vsel %vm2726_vm1, %v2671_v10, 0.0  ;;  %v3586_v18 = vpop.f32.mrb[172].mxu1 }
 0x272   : > { %v2743_v5 = vadd.f32 %v2742_v48, %v2741_v60  ;;  %v2750_v44 = vadd.f32 %v2749_v30, %v2748_v61  ;;  %v4649_v27 = vadd.f32 %v3586_v18, %v2175_v59  ;;  %v2455_v26 = vpop.f32.mrb[173].mxu1 }
 0x273   : > { %v4656_v4 = vadd.f32 %v2455_v26, %v2167_v34  ;;  %v3587_v54 = vpop.f32.mrb[174].mxu1 }
 0x274   : > { %v2744_v33 = vrot.slane %v2743_v5, 2  ;;  %v2752_v6 = vadd.f32 %v2751_v23, %v2750_v44  ;;  %v4658_v25 = vadd.f32 %v3587_v54, %v2178_v41  ;;  %v2458_v60 = vpop.f32.mrb[175].mxu1  ;;  %v2676_v61 = vmax.f32 %v4649_v27, 0.0 }
 0x275   : > { %v5418_v12 = vmax.f32 %v4656_v4, 0.0  ;;  %v4664_v48 = vadd.f32 %v2458_v60, %v2170_v47  ;;  %v4666_v7 = vpop.f32.mrb[160].mxu0  ;;  %v2191_v47 = vadd.f32 %v4536_v43, %v4516_v3 }
 0x276   : > { %v2745_v59 = vadd.f32 %v2744_v33, %v2743_v5  ;;  %v2754_v29 = vadd.f32 %v2753_v20, %v2752_v6  ;;  %v2248_v34 = vpop.f32.mrb[161].mxu0  ;;  %v2183_v6 = vadd.f32 %v4536_v43, %v4511_v58  ;;  %v2759_v60 = vsel %vm2726_vm1, %v2676_v61, 0.0 }
 0x277   : > { %v2755_v30 = vsel %vm2726_vm1, %v5418_v12, 0.0  ;;  %v2675_v18 = vmax.f32 %v4664_v48, 0.0  ;;  %v4673_v41 = vpop.f32.mrb[162].mxu0 }
 0x278   : > { %v2746_v44 = vrot.slane %v2745_v59, 1  ;;  %v2756_v26 = vadd.f32 %v2755_v30, %v2754_v29  ;;  %v2251_v23 = vpop.f32.mrb[163].mxu0 }
 0x279   : > { %v2757_v5 = vsel %vm2726_vm1, %v2675_v18, 0.0  ;;  %v2677_v23 = vmax.f32 %v4658_v25, 0.0 }
 0x27a   : > { %v2747_v54 = vadd.f32 %v2746_v44, %v2745_v59  ;;  %v2758_v33 = vadd.f32 %v2757_v5, %v2756_v26 }
 0x27b   : > { %v3590_v20 = vpop.f32.mrb[176].mxu1  ;;  %v2761_v42 = vsel %vm2726_vm1, %v2677_v23, 0.0 }
 0x27c   : > { %v4685_v34 = vmul.f32 0.015625, %v2747_v54  ;;  %v2760_v29 = vadd.f32 %v2759_v60, %v2758_v33  ;;  %v4687_v30 = vadd.f32 %v3590_v20, %v2191_v47  ;;  %v2471_v3 = vpop.f32.mrb[177].mxu1 }
 0x27d   : > { %v4690_v12 = vadd.f32 %v2471_v3, %v2183_v6  ;;  %v3591_v59 = vpop.f32.mrb[178].mxu1  ;;  %v4692_v44 = vpop.f32.mrb[164].mxu0 }
 0x27e   : > { %v2903_v58 = vsub.f32 %v2662_v21, %v4685_v34  ;;  %v2904_v26 = vsub.f32 %v2663_v24, %v4685_v34  ;;  %v2905_v47 = vsub.f32 %v2664_v22, %v4685_v34  ;;  %v2906_v5 = vsub.f32 %v2665_v35, %v4685_v34  ;;  %v2474_v54 = vpop.f32.mrb[179].mxu1  ;;  %v2256_v33 = vpop.f32.mrb[165].mxu0 }
 0x27f   : > { %v2907_v6 = vsub.f32 %v2666_v31, %v4685_v34  ;;  %v2908_v17 = vsub.f32 %v2667_v16, %v4685_v34  ;;  %v2909_v21 = vsub.f32 %v2668_v50, %v4685_v34  ;;  %v2910_v56 = vsub.f32 %v2669_v0, %v4685_v34  ;;  %v4718_v9 = vpop.f32.mrb[166].mxu0 }
 0x280   : > { %v2967_v39 = vmul.f32 %v2903_v58, %v2903_v58  ;;  %v2968_v22 = vmul.f32 %v2904_v26, %v2904_v26  ;;  %v2969_v24 = vmul.f32 %v2905_v47, %v2905_v47  ;;  %v2259_v35 = vpop.f32.mrb[167].mxu0  ;;  %v2970_v31 = vmul.f32 %v2906_v5, %v2906_v5 }
 0x281   : > { %v2186_v50 = vadd.f32 %v4536_v43, %v4513_v19  ;;  %v2971_v0 = vmul.f32 %v2907_v6, %v2907_v6  ;;  %v2762_v20 = vadd.f32 %v2761_v42, %v2760_v29  ;;  %v2678_v40 = vmax.f32 %v4690_v12, 0.0 }
 0x282   : > { %v3031_v45 = vsel %vm2726_vm1, %v2967_v39, 0.0  ;;  %v3032_v16 = vsel %vm2726_vm1, %v2968_v22, 0.0  ;;  %v3034_v60 = vsel %vm2726_vm1, %v2969_v24, 0.0  ;;  %v4731_v58 = vadd.f32 %v3591_v59, %v2194_v32 }
 0x283   : > { %v3033_v52 = vadd.f32 %v3032_v16, %v3031_v45  ;;  %v4733_v26 = vadd.f32 %v2474_v54, %v2186_v50  ;;  %v2972_v5 = vmul.f32 %v2908_v17, %v2908_v17  ;;  %v3036_v19 = vsel %vm2726_vm1, %v2970_v31, 0.0 }
 0x284   : > { %v2763_v33 = vrot.slane %v2762_v20, 4  ;;  %v2680_v6 = vmax.f32 %v4687_v30, 0.0  ;;  %v2207_v29 = vadd.f32 %v4536_v43, %v4526_v13  ;;  %v2973_v59 = vmul.f32 %v2909_v21, %v2909_v21 }
 0x285   : > { %v3035_v3 = vadd.f32 %v3034_v60, %v3033_v52  ;;  %v4735_v47 = vpop.f32.mrb[168].mxu0  ;;  %v2679_v24 = vmax.f32 %v4733_v26, 0.0  ;;  %v3038_v54 = vsel %vm2726_vm1, %v2971_v0, 0.0  ;;  %v2210_v17 = vadd.f32 %v4536_v43, %v4528_v37 }
 0x286   : > { %v2264_v39 = vpop.f32.mrb[169].mxu0  ;;  %v2764_v32 = vadd.f32 %v2763_v33, %v2762_v20  ;;  %v2769_v16 = vsel %vm2726_vm1, %v2678_v40, 0.0  ;;  %v2681_v52 = vmax.f32 %v4731_v58, 0.0  ;;  %v2974_v50 = vmul.f32 %v2910_v56, %v2910_v56 }
 0x287   : > { %v3037_v22 = vadd.f32 %v3036_v19, %v3035_v3  ;;  %v4742_v35 = vpop.f32.mrb[170].mxu0  ;;  %v2770_v13 = vsel %vm2726_vm1, %v2679_v24, 0.0  ;;  %v3040_v21 = vsel %vm2726_vm1, %v2972_v5, 0.0  ;;  %v2772_v37 = vsel %vm2726_vm1, %v2680_v6, 0.0 }
 0x288   : > { %v2267_v31 = vpop.f32.mrb[171].mxu0  ;;  %v2765_v42 = vrot.slane %v2764_v32, 2  ;;  %v2771_v0 = vadd.f32 %v2770_v13, %v2769_v16  ;;  %v2199_v20 = vadd.f32 %v4536_v43, %v4521_v1  ;;  %v3042_v19 = vsel %vm2726_vm1, %v2973_v59, 0.0 }
 0x289   : > { %v3039_v45 = vadd.f32 %v3038_v54, %v3037_v22  ;;  %v2774_v5 = vsel %vm2726_vm1, %v2681_v52, 0.0  ;;  %v2202_v31 = vadd.f32 %v4536_v43, %v4523_v51  ;;  %v3044_v59 = vsel %vm2726_vm1, %v2974_v50, 0.0 }
 0x28a   : > { %v2766_v33 = vadd.f32 %v2765_v42, %v2764_v32  ;;  %v2773_v39 = vadd.f32 %v2772_v37, %v2771_v0 }
 0x28b   : > { %v3041_v60 = vadd.f32 %v3040_v21, %v3039_v45  ;;  %v3594_v3 = vpop.f32.mrb[180].mxu1 }
 0x28c   : > { %v4761_v22 = vadd.f32 %v3594_v3, %v2207_v29  ;;  %v2487_v56 = vpop.f32.mrb[181].mxu1  ;;  %v2767_v32 = vrot.slane %v2766_v33, 1  ;;  %v2775_v13 = vadd.f32 %v2774_v5, %v2773_v39 }
 0x28d   : > { %v3043_v54 = vadd.f32 %v3042_v19, %v3041_v60  ;;  %v4768_v45 = vadd.f32 %v2487_v56, %v2199_v20  ;;  %v3595_v16 = vpop.f32.mrb[182].mxu1  ;;  %v4770_v1 = vpop.f32.mrb[172].mxu0 }
 0x28e   : > { %v4773_v29 = vadd.f32 %v3595_v16, %v2210_v17  ;;  %v2490_v21 = vpop.f32.mrb[183].mxu1  ;;  %v2272_v42 = vpop.f32.mrb[173].mxu0  ;;  %v2768_v51 = vadd.f32 %v2767_v32, %v2766_v33 }
 0x28f   : > { %v3045_v0 = vadd.f32 %v3044_v59, %v3043_v54  ;;  %v2682_v60 = vmax.f32 %v4768_v45, 0.0  ;;  %v4776_v37 = vadd.f32 %v2490_v21, %v2202_v31  ;;  %v4778_v3 = vpop.f32.mrb[174].mxu0  ;;  %v5419_v59 = vmax.f32 %v4656_v4, 0.0 }
 0x290   : > { %v2275_v20 = vpop.f32.mrb[175].mxu0  ;;  %v2896_v56 = vmul.f32 0.015625, %v2768_v51  ;;  %v2684_v4 = vmax.f32 %v4761_v22, 0.0  ;;  %v2215_v42 = vadd.f32 %v4536_v43, %v4531_v38 }
 0x291   : > { %v3046_v19 = vrot.slane %v3045_v0, 4  ;;  %v2776_v50 = vsel %vm2726_vm1, %v2682_v60, 0.0  ;;  %v2683_v17 = vmax.f32 %v4776_v37, 0.0 }
 0x292   : > { %v2777_v39 = vadd.f32 %v2776_v50, %v2775_v13  ;;  %v2911_v54 = vsub.f32 %v2670_v14, %v2896_v56  ;;  %v2912_v5 = vsub.f32 %v2671_v10, %v2896_v56  ;;  %v2913_v31 = vsub.f32 %v2672_v49, %v2896_v56 }
 0x293   : > { %v2914_v33 = vsub.f32 %v2673_v8, %v2896_v56  ;;  %v3047_v16 = vadd.f32 %v3046_v19, %v3045_v0  ;;  %v2915_v32 = vsub.f32 %v5419_v59, %v2896_v56  ;;  %v2916_v13 = vsub.f32 %v2675_v18, %v2896_v56 }
 0x294   : > { %v2917_v11 = vsub.f32 %v2676_v61, %v2896_v56  ;;  %v2918_v46 = vsub.f32 %v2677_v23, %v2896_v56  ;;  %v2975_v36 = vmul.f32 %v2911_v54, %v2911_v54  ;;  %v2976_v49 = vmul.f32 %v2912_v5, %v2912_v5 }
 0x295   : > { %v4798_v14 = vpop.f32.mrb[176].mxu0  ;;  %v2977_v10 = vmul.f32 %v2913_v31, %v2913_v31  ;;  %v2223_v8 = vadd.f32 %v4536_v43, %v4558_v63  ;;  %v2978_v48 = vmul.f32 %v2914_v33, %v2914_v33  ;;  %v2778_v25 = vsel %vm2726_vm1, %v2683_v17, 0.0 }
 0x296   : > { %v2280_v28 = vpop.f32.mrb[177].mxu0  ;;  %v3052_v27 = vsel %vm2726_vm1, %v2975_v36, 0.0  ;;  %v3053_v61 = vsel %vm2726_vm1, %v2976_v49, 0.0  ;;  %v2685_v63 = vmax.f32 %v4773_v29, 0.0  ;;  %v3048_v0 = vrot.slane %v3047_v16, 2 }
 0x297   : > { %v4805_v21 = vpop.f32.mrb[178].mxu0  ;;  %v3054_v23 = vadd.f32 %v3053_v61, %v3052_v27  ;;  %v2979_v51 = vmul.f32 %v2915_v32, %v2915_v32  ;;  %v3055_v20 = vsel %vm2726_vm1, %v2977_v10, 0.0  ;;  %v2226_v19 = vadd.f32 %v4536_v43, %v4562_v55 }
 0x298   : > { %v2283_v18 = vpop.f32.mrb[179].mxu0  ;;  %v2218_v54 = vadd.f32 %v4536_v43, %v4538_v15  ;;  %v2780_v5 = vsel %vm2726_vm1, %v2684_v4, 0.0  ;;  %v2779_v31 = vadd.f32 %v2778_v25, %v2777_v39  ;;  %v2980_v33 = vmul.f32 %v2916_v13, %v2916_v13 }
 0x299   : > { %v3056_v50 = vadd.f32 %v3055_v20, %v3054_v23  ;;  %v3057_v59 = vsel %vm2726_vm1, %v2978_v48, 0.0  ;;  %v4828_v49 = vsel %vm3271_vm2, %v2896_v56, %v4685_v34  ;;  %v2782_v15 = vsel %vm2726_vm1, %v2685_v63, 0.0 }
 0x29a   : > { %v2781_v10 = vadd.f32 %v2780_v5, %v2779_v31  ;;  %v3049_v13 = vadd.f32 %v3048_v0, %v3047_v16  ;;  %v2981_v48 = vmul.f32 %v2917_v11, %v2917_v11  ;;  %v3061_v5 = vsel %vm2726_vm1, %v2980_v33, 0.0 }
 0x29b   : > { %v3598_v38 = vpop.f32.mrb[184].mxu1  ;;  %v3058_v55 = vadd.f32 %v3057_v59, %v3056_v50 }
 0x29c   : > { %v4824_v36 = vadd.f32 %v3598_v38, %v2223_v8  ;;  %v2503_v32 = vpop.f32.mrb[185].mxu1  ;;  %v3059_v8 = vsel %vm2726_vm1, %v2979_v51, 0.0  ;;  %v2783_v18 = vadd.f32 %v2782_v15, %v2781_v10  ;;  %v3063_v38 = vsel %vm2726_vm1, %v2981_v48, 0.0 }
 0x29d   : > { %v4833_v28 = vadd.f32 %v2503_v32, %v2215_v42  ;;  %v3599_v39 = vpop.f32.mrb[186].mxu1  ;;  %v4835_v27 = vpop.f32.mrb[180].mxu0  ;;  %v3060_v56 = vadd.f32 %v3059_v8, %v3058_v55  ;;  %v2982_v42 = vmul.f32 %v2918_v46, %v2918_v46 }
 0x29e   : > { %v4838_v61 = vadd.f32 %v3599_v39, %v2226_v19  ;;  %v2506_v25 = vpop.f32.mrb[187].mxu1  ;;  %v2288_v34 = vpop.f32.mrb[181].mxu0  ;;  %v2784_v11 = vrot.slane %v2783_v18, 4  ;;  %v2688_v0 = vmax.f32 %v4824_v36, 0.0  ;;  %v3050_v19 = vrot.slane %v3049_v13, 1 }
 0x29f   : > { %v2686_v23 = vmax.f32 %v4833_v28, 0.0  ;;  %v4841_v20 = vadd.f32 %v2506_v25, %v2218_v54  ;;  %v4843_v50 = vpop.f32.mrb[182].mxu0  ;;  %v3062_v16 = vadd.f32 %v3061_v5, %v3060_v56  ;;  %v3065_v55 = vsel %vm2726_vm1, %v2982_v42, 0.0 }
 0x2a0   : > { %v2291_v31 = vpop.f32.mrb[183].mxu0  ;;  %v2689_v59 = vmax.f32 %v4838_v61, 0.0  ;;  %v2785_v54 = vadd.f32 %v2784_v11, %v2783_v18  ;;  %v2793_v48 = vsel %vm2726_vm1, %v2688_v0, 0.0  ;;  %v3051_v25 = vadd.f32 %v3050_v19, %v3049_v13 }
 0x2a1   : > { %v2687_v51 = vmax.f32 %v4841_v20, 0.0  ;;  %v3064_v32 = vadd.f32 %v3063_v38, %v3062_v16  ;;  %v2790_v46 = vsel %vm2726_vm1, %v2686_v23, 0.0  ;;  %v2239_v42 = vadd.f32 %v4536_v43, %v4630_v2 }
 0x2a2   : > { %v2786_v39 = vrot.slane %v2785_v54, 2  ;;  %v2795_v31 = vsel %vm2726_vm1, %v2689_v59, 0.0  ;;  %v2242_v13 = vadd.f32 %v4536_v43, %v4634_v57 }
 0x2a3   : > { %v2791_v33 = vsel %vm2726_vm1, %v2687_v51, 0.0  ;;  %v3066_v10 = vadd.f32 %v3065_v55, %v3064_v32 }
 0x2a4   : > { %v2792_v15 = vadd.f32 %v2791_v33, %v2790_v46  ;;  %v2787_v5 = vadd.f32 %v2786_v39, %v2785_v54  ;;  %v4871_v33 = vmul.f32 0.015873017, %v3051_v25  ;;  %v2231_v54 = vadd.f32 %v4536_v43, %v4594_v62 }
 0x2a5   : > { %v4860_v8 = vpop.f32.mrb[184].mxu0  ;;  %v3067_v18 = vrot.slane %v3066_v10, 4 }
 0x2a6   : > { %v2794_v34 = vadd.f32 %v2793_v48, %v2792_v15  ;;  %v2296_v56 = vpop.f32.mrb[185].mxu0  ;;  %v2788_v46 = vrot.slane %v2787_v5, 1  ;;  %3856 = vrsqrt.f32 %v4871_v33  ;;  %vm3209_vm4 = vcmp.eq.f32.partialorder %v4871_v33, inf }
 0x2a7   : > { %v4865_v16 = vpop.f32.mrb[186].mxu0  ;;  %v3068_v32 = vadd.f32 %v3067_v18, %v3066_v10  ;;  %vm3211_vm5 = vcmp.eq.f32.partialorder %v4871_v33, 0.0 }
 0x2a8   : > { %v4869_v11 = vadd.f32 %v2795_v31, %v2794_v34  ;;  %v2299_v38 = vpop.f32.mrb[187].mxu0  ;;  %v2789_v55 = vadd.f32 %v2788_v46, %v2787_v5 }
 0x2a9   : > { %v3069_v19 = vrot.slane %v3068_v32, 2 }
 0x2aa   : > { %v2897_v34 = vmul.f32 0.015625, %v2789_v55 }
 0x2ab   : > { %v3602_v15 = vpop.f32.mrb[188].mxu1  ;;  %v3070_v2 = vadd.f32 %v3069_v19, %v3068_v32 }
 0x2ac   : > { %v4877_v39 = vadd.f32 %v3602_v15, %v2239_v42  ;;  %v2519_v48 = vpop.f32.mrb[189].mxu1  ;;  %v2919_v62 = vsub.f32 %v2678_v40, %v2897_v34  ;;  %v2920_v5 = vsub.f32 %v2679_v24, %v2897_v34  ;;  %v2921_v42 = vsub.f32 %v2680_v6, %v2897_v34 }
 0x2ad   : > { %v4879_v56 = vadd.f32 %v2519_v48, %v2231_v54  ;;  %v3603_v10 = vpop.f32.mrb[190].mxu1  ;;  %v4881_v18 = vpop.f32.mrb[188].mxu0  ;;  %v3071_v38 = vrot.slane %v3070_v2, 1  ;;  %v2922_v46 = vsub.f32 %v2681_v52, %v2897_v34  ;;  %v2924_v19 = vsub.f32 %v2683_v17, %v2897_v34 }
 0x2ae   : > { %v4883_v25 = vadd.f32 %v3603_v10, %v2242_v13  ;;  %v2522_v31 = vpop.f32.mrb[191].mxu1  ;;  %v2304_v57 = vpop.f32.mrb[189].mxu0  ;;  %v2923_v13 = vsub.f32 %v2682_v60, %v2897_v34  ;;  %v2925_v12 = vsub.f32 %v2684_v4, %v2897_v34  ;;  %v2926_v30 = vsub.f32 %v2685_v63, %v2897_v34 }
 0x2af   : > { %v4892_v32 = vpop.f32.mrb[190].mxu0  ;;  %v3072_v26 = vadd.f32 %v3071_v38, %v3070_v2  ;;  %v2983_v6 = vmul.f32 %v2919_v62, %v2919_v62  ;;  %v2984_v24 = vmul.f32 %v2920_v5, %v2920_v5  ;;  %v2985_v54 = vmul.f32 %v2921_v42, %v2921_v42 }
 0x2b0   : > { %v2307_v40 = vpop.f32.mrb[191].mxu0  ;;  %v2986_v52 = vmul.f32 %v2922_v46, %v2922_v46  ;;  %v2234_v60 = vadd.f32 %v4536_v43, %v4601_v53  ;;  %v2987_v17 = vmul.f32 %v2923_v13, %v2923_v13  ;;  %v2690_v4 = vmax.f32 %v4879_v56, 0.0  ;;  %v3857_v53 = vpop.eup %3856 }
 0x2b1   : > { %v4904_v55 = vmul.f32 0.015873017, %v3072_v26  ;;  %v3073_v58 = vsel %vm2726_vm1, %v2983_v6, 0.0  ;;  %v3074_v45 = vsel %vm2726_vm1, %v2984_v24, 0.0  ;;  %v3076_v29 = vsel %vm2726_vm1, %v2985_v54, 0.0 }
 0x2b2   : > { %v3075_v22 = vadd.f32 %v3074_v45, %v3073_v58  ;;  %v4914_v63 = vadd.f32 %v2522_v31, %v2234_v60  ;;  %v2255_v2 = vadd.f32 %v4536_v43, %v4692_v44  ;;  %v2692_v10 = vmax.f32 %v4877_v39, 0.0 }
 0x2b3   : > { %3858 = vrsqrt.f32 %v4904_v55  ;;  %v2988_v38 = vmul.f32 %v2924_v19, %v2924_v19  ;;  %v3078_v62 = vsel %vm2726_vm1, %v2986_v52, 0.0  ;;  %v2797_v31 = vsel %vm2726_vm1, %v2690_v4, 0.0 }
 0x2b4   : > { %v3077_v48 = vadd.f32 %v3076_v29, %v3075_v22  ;;  %v2691_v5 = vmax.f32 %v4914_v63, 0.0  ;;  %v2989_v46 = vmul.f32 %v2925_v12, %v2925_v12  ;;  %v2258_v44 = vadd.f32 %v4536_v43, %v4718_v9 }
 0x2b5   : > { %v4910_v37 = vpop.f32.mrb[192].mxu0  ;;  %v2798_v40 = vadd.f32 %v2797_v31, %v4869_v11  ;;  %v3080_v26 = vsel %vm2726_vm1, %v2987_v17, 0.0  ;;  %v2693_v19 = vmax.f32 %v4883_v25, 0.0  ;;  %v4937_v24 = vsel %vm3273_vm3, %v2897_v34, %v4828_v49 }
 0x2b6   : > { %v2312_v15 = vpop.f32.mrb[193].mxu0  ;;  %v3079_v13 = vadd.f32 %v3078_v62, %v3077_v48  ;;  %v2799_v6 = vsel %vm2726_vm1, %v2691_v5, 0.0  ;;  %v2247_v12 = vadd.f32 %v4536_v43, %v4666_v7  ;;  %v3208_v11 = vmul.f32 %v3857_v53, %v4871_v33 }
 0x2b7   : > { %v4919_v57 = vpop.f32.mrb[194].mxu0  ;;  %v2800_v58 = vadd.f32 %v2799_v6, %v2798_v40  ;;  %v2990_v52 = vmul.f32 %v2926_v30, %v2926_v30  ;;  %v3082_v45 = vsel %vm2726_vm1, %v2988_v38, 0.0  ;;  %v2801_v60 = vsel %vm2726_vm1, %v2692_v10, 0.0 }
 0x2b8   : > { %v2315_v42 = vpop.f32.mrb[195].mxu0  ;;  %v3081_v54 = vadd.f32 %v3080_v26, %v3079_v13  ;;  %v2250_v34 = vadd.f32 %v4536_v43, %v4673_v41  ;;  %v3084_v30 = vsel %vm2726_vm1, %v2989_v46, 0.0  ;;  %v2803_v53 = vsel %vm2726_vm1, %v2693_v19, 0.0 }
 0x2b9   : > { %v2802_v29 = vadd.f32 %v2801_v60, %v2800_v58  ;;  %v3086_v46 = vsel %vm2726_vm1, %v2990_v52, 0.0  ;;  %v3210_v6 = vsel %vm3209_vm4, %v4871_v33, %v3208_v11  ;;  %vm3216_vm6 = vcmp.eq.f32.partialorder %v4904_v55, inf }
 0x2ba   : > { %v3083_v49 = vadd.f32 %v3082_v45, %v3081_v54  ;;  %v3219_v52 = vand.u32 2147483648, %v4904_v55  ;;  %vm3218_vm7 = vcmp.eq.f32.partialorder %v4904_v55, 0.0 }
 0x2bb   : > { %v3606_v9 = vpop.f32.mrb[192].mxu1  ;;  %v2804_v41 = vadd.f32 %v2803_v53, %v2802_v29 }
 0x2bc   : > { %v4946_v22 = vadd.f32 %v3606_v9, %v2255_v2  ;;  %v2535_v17 = vpop.f32.mrb[193].mxu1  ;;  %v3085_v31 = vadd.f32 %v3084_v30, %v3083_v49 }
 0x2bd   : > { %v4950_v7 = vadd.f32 %v2535_v17, %v2247_v12  ;;  %v4952_v15 = vpop.f32.mrb[196].mxu0  ;;  %v3607_v48 = vpop.f32.mrb[194].mxu1  ;;  %v2805_v58 = vrot.slane %v2804_v41, 4 }
 0x2be   : > { %v4958_v38 = vadd.f32 %v3607_v48, %v2258_v44  ;;  %v2320_v2 = vpop.f32.mrb[197].mxu0  ;;  %v2538_v62 = vpop.f32.mrb[195].mxu1  ;;  %v3212_v44 = vand.u32 2147483648, %v4871_v33  ;;  %v3087_v12 = vadd.f32 %v3086_v46, %v3085_v31  ;;  %v2696_v9 = vmax.f32 %v4946_v22, 0.0 }
 0x2bf   : > { %v2694_v42 = vmax.f32 %v4950_v7, 0.0  ;;  %v4962_v13 = vadd.f32 %v2538_v62, %v2250_v34  ;;  %v4964_v40 = vpop.f32.mrb[198].mxu0  ;;  %v3859_v54 = vpop.eup %3858  ;;  %v2806_v49 = vadd.f32 %v2805_v58, %v2804_v41 }
 0x2c0   : > { %v2323_v26 = vpop.f32.mrb[199].mxu0  ;;  %v2697_v60 = vmax.f32 %v4958_v38, 0.0  ;;  %v3215_v17 = vmul.f32 %v3859_v54, %v4904_v55  ;;  %v3088_v11 = vrot.slane %v3087_v12, 4  ;;  %v3213_v30 = vsel %vm3211_vm5, %v3212_v44, %v3210_v6 }
 0x2c1   : > { %v2695_v45 = vmax.f32 %v4962_v13, 0.0  ;;  %v2811_v34 = vsel %vm2726_vm1, %v2694_v42, 0.0  ;;  %v2807_v62 = vrot.slane %v2806_v49, 2  ;;  %v2814_v31 = vsel %vm2726_vm1, %v2696_v9, 0.0 }
 0x2c2   : > { %v3217_v53 = vsel %vm3216_vm6, %v4904_v55, %v3215_v17  ;;  %v3089_v2 = vadd.f32 %v3088_v11, %v3087_v12  ;;  %v2816_v55 = vsel %vm2726_vm1, %v2697_v60, 0.0  ;;  %v2271_v12 = vadd.f32 %v4536_v43, %v4770_v1 }
 0x2c3   : > { %v2812_v29 = vsel %vm2726_vm1, %v2695_v45, 0.0  ;;  %v3220_v46 = vsel %vm3218_vm7, %v3219_v52, %v3217_v53  ;;  %v2808_v6 = vadd.f32 %v2807_v62, %v2806_v49  ;;  %v2263_v49 = vadd.f32 %v4536_v43, %v4735_v47 }
 0x2c4   : > { %v2813_v48 = vadd.f32 %v2812_v29, %v2811_v34  ;;  %v4992_v58 = vsel %vm3271_vm2, %v3220_v46, %v3213_v30  ;;  %v3090_v33 = vrot.slane %v3089_v2, 2  ;;  %v2274_v29 = vadd.f32 %v4536_v43, %v4778_v3 }
 0x2c5   : > { %v4989_v41 = vpop.f32.mrb[200].mxu0  ;;  %v2809_v52 = vrot.slane %v2808_v6, 1  ;;  %vm3281_vm2 = vcmask 1046534   ;;  %vm3283_vm5 = vcmask 1047559  }
 0x2c6   : > { %v2815_v26 = vadd.f32 %v2814_v31, %v2813_v48  ;;  %v2328_v54 = vpop.f32.mrb[201].mxu0  ;;  %v3091_v34 = vadd.f32 %v3090_v33, %v3089_v2 }
 0x2c7   : > { %v4997_v44 = vpop.f32.mrb[202].mxu0  ;;  %v2810_v30 = vadd.f32 %v2809_v52, %v2808_v6 }
 0x2c8   : > { %v2331_v17 = vpop.f32.mrb[203].mxu0  ;;  %v2817_v11 = vadd.f32 %v2816_v55, %v2815_v26  ;;  %v3092_v48 = vrot.slane %v3091_v34, 1 }
 0x2c9   : > { %v2898_v46 = vmul.f32 0.015625, %v2810_v30 }
 0x2ca   : > { %v3093_v3 = vadd.f32 %v3092_v48, %v3091_v34 }
 0x2cb   : > { %v3610_v53 = vpop.f32.mrb[196].mxu1  ;;  %v2927_v17 = vsub.f32 %v2686_v23, %v2898_v46  ;;  %v2928_v47 = vsub.f32 %v2687_v51, %v2898_v46  ;;  %v2929_v6 = vsub.f32 %v2688_v0, %v2898_v46  ;;  %v2930_v52 = vsub.f32 %v2689_v59, %v2898_v46 }
 0x2cc   : > { %v5005_v62 = vadd.f32 %v3610_v53, %v2271_v12  ;;  %v2551_v31 = vpop.f32.mrb[197].mxu1  ;;  %v2932_v34 = vsub.f32 %v2691_v5, %v2898_v46  ;;  %v2933_v28 = vsub.f32 %v2692_v10, %v2898_v46  ;;  %v2934_v20 = vsub.f32 %v2693_v19, %v2898_v46 }
 0x2cd   : > { %v5007_v54 = vadd.f32 %v2551_v31, %v2263_v49  ;;  %v5009_v1 = vpop.f32.mrb[204].mxu0  ;;  %v3611_v26 = vpop.f32.mrb[198].mxu1  ;;  %v2991_v36 = vmul.f32 %v2927_v17, %v2927_v17  ;;  %v2992_v0 = vmul.f32 %v2928_v47, %v2928_v47  ;;  %v2993_v51 = vmul.f32 %v2929_v6, %v2929_v6 }
 0x2ce   : > { %v5011_v2 = vadd.f32 %v3611_v26, %v2274_v29  ;;  %v2336_v33 = vpop.f32.mrb[205].mxu0  ;;  %v2554_v55 = vpop.f32.mrb[199].mxu1  ;;  %v2931_v29 = vsub.f32 %v2690_v4, %v2898_v46  ;;  %v5031_v48 = vmul.f32 0.015873017, %v3093_v3  ;;  %v2994_v61 = vmul.f32 %v2930_v52, %v2930_v52 }
 0x2cf   : > { %v5019_v12 = vpop.f32.mrb[206].mxu0  ;;  %v3094_v59 = vsel %vm2726_vm1, %v2991_v36, 0.0  ;;  %v3095_v56 = vsel %vm2726_vm1, %v2992_v0, 0.0  ;;  %v2266_v4 = vadd.f32 %v4536_v43, %v4742_v35  ;;  %v3097_v10 = vsel %vm2726_vm1, %v2993_v51, 0.0 }
 0x2d0   : > { %v2339_v23 = vpop.f32.mrb[207].mxu0  ;;  %v3096_v63 = vadd.f32 %v3095_v56, %v3094_v59  ;;  %v2995_v39 = vmul.f32 %v2931_v29, %v2931_v29  ;;  %v2698_v25 = vmax.f32 %v5007_v54, 0.0  ;;  %v2287_v19 = vadd.f32 %v4536_v43, %v4835_v27 }
 0x2d1   : > { %v5043_v30 = vadd.f32 %v2554_v55, %v2266_v4  ;;  %v2996_v31 = vmul.f32 %v2932_v34, %v2932_v34  ;;  %v3099_v26 = vsel %vm2726_vm1, %v2994_v61, 0.0  ;;  %3860 = vrsqrt.f32 %v5031_v48 }
 0x2d2   : > { %v3098_v49 = vadd.f32 %v3097_v10, %v3096_v63  ;;  %v2818_v35 = vsel %vm2726_vm1, %v2698_v25, 0.0  ;;  %v2700_v17 = vmax.f32 %v5005_v62, 0.0  ;;  %v2290_v6 = vadd.f32 %v4536_v43, %v4843_v50 }
 0x2d3   : > { %v2819_v27 = vadd.f32 %v2818_v35, %v2817_v11  ;;  %v2699_v55 = vmax.f32 %v5043_v30, 0.0  ;;  %v2997_v52 = vmul.f32 %v2933_v28, %v2933_v28  ;;  %v3101_v29 = vsel %vm2726_vm1, %v2995_v39, 0.0 }
 0x2d4   : > { %v3100_v3 = vadd.f32 %v3099_v26, %v3098_v49  ;;  %v2701_v23 = vmax.f32 %v5011_v2, 0.0  ;;  %v5063_v0 = vsel %vm3275_vm8, %v2898_v46, %v4937_v24  ;;  %v2279_v11 = vadd.f32 %v4536_v43, %v4798_v14 }
 0x2d5   : > { %v5039_v5 = vpop.f32.mrb[208].mxu0  ;;  %v2820_v36 = vsel %vm2726_vm1, %v2699_v55, 0.0  ;;  %v2998_v51 = vmul.f32 %v2934_v20, %v2934_v20  ;;  %v3103_v50 = vsel %vm2726_vm1, %v2996_v31, 0.0  ;;  %v2822_v56 = vsel %vm2726_vm1, %v2700_v17, 0.0 }
 0x2d6   : > { %v2344_v53 = vpop.f32.mrb[209].mxu0  ;;  %v3102_v34 = vadd.f32 %v3101_v29, %v3100_v3  ;;  %v2821_v28 = vadd.f32 %v2820_v36, %v2819_v27  ;;  %v2282_v24 = vadd.f32 %v4536_v43, %v4805_v21  ;;  %v3105_v46 = vsel %vm2726_vm1, %v2997_v52, 0.0 }
 0x2d7   : > { %v5049_v33 = vpop.f32.mrb[210].mxu0  ;;  %v2824_v53 = vsel %vm2726_vm1, %v2701_v23, 0.0  ;;  %v3107_v35 = vsel %vm2726_vm1, %v2998_v51, 0.0  ;;  %vm3223_vm9 = vcmp.eq.f32.partialorder %v5031_v48, inf  ;;  %v3226_v51 = vand.u32 2147483648, %v5031_v48 }
 0x2d8   : > { %v2347_v47 = vpop.f32.mrb[211].mxu0  ;;  %v3104_v59 = vadd.f32 %v3103_v50, %v3102_v34  ;;  %v2823_v39 = vadd.f32 %v2822_v56, %v2821_v28  ;;  %vm3225_vm10 = vcmp.eq.f32.partialorder %v5031_v48, 0.0 }
 0x2da   : > { %v3106_v49 = vadd.f32 %v3105_v46, %v3104_v59  ;;  %v2825_v43 = vadd.f32 %v2824_v53, %v2823_v39 }
 0x2db   : > { %v3614_v61 = vpop.f32.mrb[200].mxu1  ;;  %v3861_v29 = vpop.eup %3860 }
 0x2dc   : > { %v5071_v4 = vadd.f32 %v3614_v61, %v2287_v19  ;;  %v2567_v63 = vpop.f32.mrb[201].mxu1  ;;  %v3108_v47 = vadd.f32 %v3107_v35, %v3106_v49  ;;  %v2826_v34 = vrot.slane %v2825_v43, 4  ;;  %v3222_v50 = vmul.f32 %v3861_v29, %v5031_v48 }
 0x2dd   : > { %v5076_v14 = vadd.f32 %v2567_v63, %v2279_v11  ;;  %v5078_v20 = vpop.f32.mrb[212].mxu0  ;;  %v3615_v10 = vpop.f32.mrb[202].mxu1 }
 0x2de   : > { %v5083_v31 = vadd.f32 %v3615_v10, %v2290_v6  ;;  %v2352_v19 = vpop.f32.mrb[213].mxu0  ;;  %v2570_v26 = vpop.f32.mrb[203].mxu1  ;;  %v2704_v36 = vmax.f32 %v5071_v4, 0.0  ;;  %v3109_v11 = vrot.slane %v3108_v47, 4  ;;  %v2827_v28 = vadd.f32 %v2826_v34, %v2825_v43  ;;  %v5122_v34 = vld [vmem:[%s5416_s3] ss:$0 sm:$0xff] }
 0x2df   : > { %v2702_v21 = vmax.f32 %v5076_v14, 0.0  ;;  %v5087_v3 = vadd.f32 %v2570_v26, %v2282_v24  ;;  %v5089_v27 = vpop.f32.mrb[214].mxu0  ;;  %v3224_v46 = vsel %vm3223_vm9, %v5031_v48, %v3222_v50 }
 0x2e0   : > { %v2355_v52 = vpop.f32.mrb[215].mxu0  ;;  %v2705_v59 = vmax.f32 %v5083_v31, 0.0  ;;  %v3110_v63 = vadd.f32 %v3109_v11, %v3108_v47  ;;  %v2828_v39 = vrot.slane %v2827_v28, 2  ;;  %v2835_v10 = vsel %vm2726_vm1, %v2704_v36, 0.0 }
 0x2e1   : > { %v2703_v6 = vmax.f32 %v5087_v3, 0.0  ;;  %v2832_v61 = vsel %vm2726_vm1, %v2702_v21, 0.0  ;;  %v3227_v53 = vsel %vm3225_vm10, %v3226_v51, %v3224_v46  ;;  %v2303_v11 = vadd.f32 %v5122_v34, %v4881_v18 }
 0x2e2   : > { %v3111_v19 = vrot.slane %v3110_v63, 2  ;;  %v5112_v43 = vsel %vm3273_vm3, %v3227_v53, %v4992_v58  ;;  %v2829_v47 = vadd.f32 %v2828_v39, %v2827_v28  ;;  %v2837_v48 = vsel %vm2726_vm1, %v2705_v59, 0.0 }
 0x2e3   : > { %v2833_v56 = vsel %vm2726_vm1, %v2703_v6, 0.0  ;;  %v2306_v28 = vadd.f32 %v5122_v34, %v4892_v32 }
 0x2e4   : > { %v2834_v24 = vadd.f32 %v2833_v56, %v2832_v61  ;;  %v3112_v29 = vadd.f32 %v3111_v19, %v3110_v63  ;;  %v2830_v58 = vrot.slane %v2829_v47, 1  ;;  %v2295_v56 = vadd.f32 %v5122_v34, %v4860_v8 }
 0x2e5   : > { %v5108_v49 = vpop.f32.mrb[216].mxu0 }
 0x2e6   : > { %v2836_v26 = vadd.f32 %v2835_v10, %v2834_v24  ;;  %v2360_v35 = vpop.f32.mrb[217].mxu0  ;;  %v3113_v61 = vrot.slane %v3112_v29, 1  ;;  %v2831_v24 = vadd.f32 %v2830_v58, %v2829_v47 }
 0x2e7   : > { %v5117_v52 = vpop.f32.mrb[218].mxu0 }
 0x2e8   : > { %v2363_v50 = vpop.f32.mrb[219].mxu0  ;;  %v2838_v51 = vadd.f32 %v2837_v48, %v2836_v26  ;;  %v2899_v10 = vmul.f32 0.015625, %v2831_v24  ;;  %v3114_v26 = vadd.f32 %v3113_v61, %v3112_v29 }
 0x2ea   : > { %v2935_v32 = vsub.f32 %v2694_v42, %v2899_v10  ;;  %v2936_v8 = vsub.f32 %v2695_v45, %v2899_v10  ;;  %v2937_v47 = vsub.f32 %v2696_v9, %v2899_v10  ;;  %v2939_v29 = vsub.f32 %v2698_v25, %v2899_v10 }
 0x2eb   : > { %v3618_v63 = vpop.f32.mrb[204].mxu1  ;;  %v2940_v61 = vsub.f32 %v2699_v55, %v2899_v10  ;;  %v2941_v7 = vsub.f32 %v2700_v17, %v2899_v10  ;;  %v2942_v42 = vsub.f32 %v2701_v23, %v2899_v10  ;;  %v5156_v38 = vmul.f32 0.015873017, %v3114_v26 }
 0x2ec   : > { %v5130_v46 = vadd.f32 %v3618_v63, %v2303_v11  ;;  %v2583_v39 = vpop.f32.mrb[205].mxu1  ;;  %v2938_v11 = vsub.f32 %v2697_v60, %v2899_v10  ;;  %v2999_v22 = vmul.f32 %v2935_v32, %v2935_v32  ;;  %v3000_v9 = vmul.f32 %v2936_v8, %v2936_v8 }
 0x2ed   : > { %v5132_v53 = vadd.f32 %v2583_v39, %v2295_v56  ;;  %v5134_v19 = vpop.f32.mrb[220].mxu0  ;;  %v3619_v18 = vpop.f32.mrb[206].mxu1  ;;  %v3001_v45 = vmul.f32 %v2937_v47, %v2937_v47  ;;  %v2298_v25 = vadd.f32 %v5122_v34, %v4865_v16  ;;  %v3003_v62 = vmul.f32 %v2939_v29, %v2939_v29 }
 0x2ee   : > { %v5136_v35 = vadd.f32 %v3619_v18, %v2306_v28  ;;  %v2368_v48 = vpop.f32.mrb[221].mxu0  ;;  %v2586_v50 = vpop.f32.mrb[207].mxu1  ;;  %v3002_v60 = vmul.f32 %v2938_v11, %v2938_v11  ;;  %v3115_v28 = vsel %vm2726_vm1, %v2999_v22, 0.0  ;;  %v3116_v54 = vsel %vm2726_vm1, %v3000_v9, 0.0 }
 0x2ef   : > { %v5146_v58 = vpop.f32.mrb[222].mxu0  ;;  %v3117_v30 = vadd.f32 %v3116_v54, %v3115_v28  ;;  %v3118_v17 = vsel %vm2726_vm1, %v3001_v45, 0.0  ;;  %v2706_v2 = vmax.f32 %v5132_v53, 0.0  ;;  %v5164_v23 = vadd.f32 %v2586_v50, %v2298_v25 }
 0x2f0   : > { %v2371_v13 = vpop.f32.mrb[223].mxu0  ;;  %3862 = vrsqrt.f32 %v5156_v38  ;;  %v3004_v56 = vmul.f32 %v2940_v61, %v2940_v61  ;;  %v3120_v24 = vsel %vm2726_vm1, %v3002_v60, 0.0  ;;  %v2708_v39 = vmax.f32 %v5130_v46, 0.0 }
 0x2f1   : > { %v3119_v55 = vadd.f32 %v3118_v17, %v3117_v30  ;;  %v2839_v63 = vsel %vm2726_vm1, %v2706_v2, 0.0  ;;  %v2707_v26 = vmax.f32 %v5164_v23, 0.0  ;;  %v3005_v48 = vmul.f32 %v2941_v7, %v2941_v7 }
 0x2f2   : > { %v2840_v18 = vadd.f32 %v2839_v63, %v2838_v51  ;;  %v3122_v50 = vsel %vm2726_vm1, %v3003_v62, 0.0  ;;  %v5176_v32 = vsel %vm3277_vm11, %v2899_v10, %v5063_v0  ;;  %v2319_v8 = vadd.f32 %v5122_v34, %v4952_v15 }
 0x2f3   : > { %v3121_v16 = vadd.f32 %v3120_v24, %v3119_v55  ;;  %v2709_v11 = vmax.f32 %v5136_v35, 0.0  ;;  %v2841_v29 = vsel %vm2726_vm1, %v2707_v26, 0.0  ;;  %v2311_v51 = vadd.f32 %v5122_v34, %v4910_v37 }
 0x2f4   : > { %v3006_v61 = vmul.f32 %v2942_v42, %v2942_v42  ;;  %v3124_v7 = vsel %vm2726_vm1, %v3004_v56, 0.0  ;;  %v2842_v13 = vadd.f32 %v2841_v29, %v2840_v18  ;;  %v2322_v0 = vadd.f32 %v5122_v34, %v4964_v40 }
 0x2f5   : > { %v3123_v47 = vadd.f32 %v3122_v50, %v3121_v16  ;;  %v2843_v15 = vsel %vm2726_vm1, %v2708_v39, 0.0  ;;  %v2314_v60 = vadd.f32 %v5122_v34, %v4919_v57  ;;  %v3126_v37 = vsel %vm2726_vm1, %v3005_v48, 0.0 }
 0x2f6   : > { %v2844_v42 = vadd.f32 %v2843_v15, %v2842_v13  ;;  %v2845_v40 = vsel %vm2726_vm1, %v2709_v11, 0.0  ;;  %v3128_v17 = vsel %vm2726_vm1, %v3006_v61, 0.0  ;;  %vm3230_vm12 = vcmp.eq.f32.partialorder %v5156_v38, inf }
 0x2f7   : > { %v3125_v10 = vadd.f32 %v3124_v7, %v3123_v47  ;;  %vm3232_vm13 = vcmp.eq.f32.partialorder %v5156_v38, 0.0  ;;  %v3233_v29 = vand.u32 2147483648, %v5156_v38  ;;  %v2330_v53 = vadd.f32 %v5122_v34, %v4997_v44 }
 0x2f8   : > { %v2846_v55 = vadd.f32 %v2845_v40, %v2844_v42 }
 0x2f9   : > { %v3127_v25 = vadd.f32 %v3126_v37, %v3125_v10 }
 0x2fa   : > { %v3863_v24 = vpop.eup %3862  ;;  %v2847_v16 = vrot.slane %v2846_v55, 4 }
 0x2fb   : > { %v3622_v22 = vpop.f32.mrb[208].mxu1  ;;  %v3129_v63 = vadd.f32 %v3128_v17, %v3127_v25  ;;  %v3229_v50 = vmul.f32 %v3863_v24, %v5156_v38  ;;  %v2335_v17 = vadd.f32 %v5122_v34, %v5009_v1  ;;  %v2327_v24 = vadd.f32 %v5122_v34, %v4989_v41 }
 0x2fc   : > { %v5192_v9 = vadd.f32 %v3622_v22, %v2319_v8  ;;  %v2599_v45 = vpop.f32.mrb[209].mxu1 }
 0x2fd   : > { %v5197_v28 = vadd.f32 %v2599_v45, %v2311_v51  ;;  %v3623_v54 = vpop.f32.mrb[210].mxu1  ;;  %v3130_v8 = vrot.slane %v3129_v63, 4  ;;  %v2848_v51 = vadd.f32 %v2847_v16, %v2846_v55  ;;  %v3231_v13 = vsel %vm3230_vm12, %v5156_v38, %v3229_v50 }
 0x2fe   : > { %v5202_v30 = vadd.f32 %v3623_v54, %v2322_v0  ;;  %v2602_v62 = vpop.f32.mrb[211].mxu1  ;;  %v2712_v18 = vmax.f32 %v5192_v9, 0.0  ;;  %v3234_v10 = vsel %vm3232_vm13, %v3233_v29, %v3231_v13  ;;  %v2338_v16 = vadd.f32 %v5122_v34, %v5019_v12 }
 0x2ff   : > { %v2710_v56 = vmax.f32 %v5197_v28, 0.0  ;;  %v5206_v57 = vadd.f32 %v2602_v62, %v2314_v60  ;;  %v3131_v22 = vadd.f32 %v3130_v8, %v3129_v63  ;;  %v2849_v15 = vrot.slane %v2848_v51, 2 }
 0x300   : > { %v2713_v47 = vmax.f32 %v5202_v30, 0.0  ;;  %v2856_v45 = vsel %vm2726_vm1, %v2712_v18, 0.0  ;;  %v5227_v60 = vsel %vm3275_vm8, %v3234_v10, %v5112_v43 }
 0x301   : > { %v2711_v48 = vmax.f32 %v5206_v57, 0.0  ;;  %v2853_v61 = vsel %vm2726_vm1, %v2710_v56, 0.0  ;;  %v3132_v37 = vrot.slane %v3131_v22, 2  ;;  %v2850_v54 = vadd.f32 %v2849_v15, %v2848_v51 }
 0x302   : > { %v2858_v25 = vsel %vm2726_vm1, %v2713_v47, 0.0 }
 0x303   : > { %v2854_v7 = vsel %vm2726_vm1, %v2711_v48, 0.0  ;;  %v3133_v38 = vadd.f32 %v3132_v37, %v3131_v22  ;;  %v2851_v62 = vrot.slane %v2850_v54, 1 }
 0x304   : > { %v2855_v0 = vadd.f32 %v2854_v7, %v2853_v61 }
 0x305   : > { %v3134_v55 = vrot.slane %v3133_v38, 1  ;;  %v2852_v63 = vadd.f32 %v2851_v62, %v2850_v54 }
 0x306   : > { %v2857_v42 = vadd.f32 %v2856_v45, %v2855_v0 }
 0x307   : > { %v2900_v29 = vmul.f32 0.015625, %v2852_v63  ;;  %v3135_v7 = vadd.f32 %v3134_v55, %v3133_v38 }
 0x308   : > { %v2859_v40 = vadd.f32 %v2858_v25, %v2857_v42 }
 0x309   : > { %v2943_v22 = vsub.f32 %v2702_v21, %v2900_v29  ;;  %v2944_v41 = vsub.f32 %v2703_v6, %v2900_v29  ;;  %v2945_v12 = vsub.f32 %v2704_v36, %v2900_v29  ;;  %v2946_v0 = vsub.f32 %v2705_v59, %v2900_v29 }
 0x30a   : > { %v2947_v10 = vsub.f32 %v2706_v2, %v2900_v29  ;;  %v2948_v15 = vsub.f32 %v2707_v26, %v2900_v29  ;;  %v2949_v45 = vsub.f32 %v2708_v39, %v2900_v29  ;;  %v2950_v14 = vsub.f32 %v2709_v11, %v2900_v29 }
 0x30b   : > { %v3626_v43 = vpop.f32.mrb[212].mxu1  ;;  %v3007_v21 = vmul.f32 %v2943_v22, %v2943_v22  ;;  %v3008_v3 = vmul.f32 %v2944_v41, %v2944_v41  ;;  %v3009_v6 = vmul.f32 %v2945_v12, %v2945_v12  ;;  %v5260_v4 = vmul.f32 0.015873017, %v3135_v7 }
 0x30c   : > { %v5238_v50 = vadd.f32 %v3626_v43, %v2335_v17  ;;  %v2615_v8 = vpop.f32.mrb[213].mxu1  ;;  %v3010_v36 = vmul.f32 %v2946_v0, %v2946_v0  ;;  %v3011_v23 = vmul.f32 %v2947_v10, %v2947_v10  ;;  %v3012_v11 = vmul.f32 %v2948_v15, %v2948_v15 }
 0x30d   : > { %v5240_v51 = vadd.f32 %v2615_v8, %v2327_v24  ;;  %v3627_v61 = vpop.f32.mrb[214].mxu1  ;;  %v3136_v31 = vsel %vm2726_vm1, %v3007_v21, 0.0  ;;  %v3137_v59 = vsel %vm2726_vm1, %v3008_v3, 0.0  ;;  %v3139_v46 = vsel %vm2726_vm1, %v3009_v6, 0.0 }
 0x30e   : > { %v5242_v13 = vadd.f32 %v3627_v61, %v2338_v16  ;;  %v2618_v1 = vpop.f32.mrb[215].mxu1  ;;  %v3138_v2 = vadd.f32 %v3137_v59, %v3136_v31  ;;  %3864 = vrsqrt.f32 %v5260_v4  ;;  %v3141_v37 = vsel %vm2726_vm1, %v3010_v36, 0.0 }
 0x30f   : > { %v2714_v35 = vmax.f32 %v5240_v51, 0.0  ;;  %v5268_v26 = vadd.f32 %v2618_v1, %v2330_v53  ;;  %v2716_v42 = vmax.f32 %v5238_v50, 0.0  ;;  %v5279_v62 = vsel %vm3279_vm14, %v2900_v29, %v5176_v32 }
 0x310   : > { %v3140_v39 = vadd.f32 %v3139_v46, %v3138_v2  ;;  %v3013_v17 = vmul.f32 %v2949_v45, %v2949_v45  ;;  %v3143_v55 = vsel %vm2726_vm1, %v3011_v23, 0.0  ;;  %v2351_v24 = vadd.f32 %v5122_v34, %v5078_v20 }
 0x311   : > { %v2860_v44 = vsel %vm2726_vm1, %v2714_v35, 0.0  ;;  %v2715_v38 = vmax.f32 %v5268_v26, 0.0  ;;  %v2717_v43 = vmax.f32 %v5242_v13, 0.0  ;;  %v3014_v8 = vmul.f32 %v2950_v14, %v2950_v14 }
 0x312   : > { %v3142_v54 = vadd.f32 %v3141_v37, %v3140_v39  ;;  %v2861_v25 = vadd.f32 %v2860_v44, %v2859_v40  ;;  %v2343_v40 = vadd.f32 %v5122_v34, %v5039_v5  ;;  %v3145_v32 = vsel %vm2726_vm1, %v3012_v11, 0.0 }
 0x313   : > { %v2862_v16 = vsel %vm2726_vm1, %v2715_v38, 0.0  ;;  %v2354_v7 = vadd.f32 %v5122_v34, %v5089_v27  ;;  %v2864_v20 = vsel %vm2726_vm1, %v2716_v42, 0.0  ;;  %v2346_v12 = vadd.f32 %v5122_v34, %v5049_v33 }
 0x314   : > { %v3144_v63 = vadd.f32 %v3143_v55, %v3142_v54  ;;  %v2863_v29 = vadd.f32 %v2862_v16, %v2861_v25  ;;  %v3147_v5 = vsel %vm2726_vm1, %v3013_v17, 0.0  ;;  %v2866_v27 = vsel %vm2726_vm1, %v2717_v43, 0.0 }
 0x315   : > { %v3149_v3 = vsel %vm2726_vm1, %v3014_v8, 0.0  ;;  %vm3237_vm15 = vcmp.eq.f32.partialorder %v5260_v4, inf  ;;  %vm3239_vm0 = vcmp.eq.f32.partialorder %v5260_v4, 0.0  ;;  %v3240_v37 = vand.u32 2147483648, %v5260_v4 }
 0x316   : > { %v3146_v1 = vadd.f32 %v3145_v32, %v3144_v63  ;;  %v2865_v0 = vadd.f32 %v2864_v20, %v2863_v29  ;;  %v2362_v51 = vadd.f32 %v5122_v34, %v5117_v52 }
 0x318   : > { %v3148_v45 = vadd.f32 %v3147_v5, %v3146_v1  ;;  %v2867_v6 = vadd.f32 %v2866_v27, %v2865_v0  ;;  %v3865_v31 = vpop.eup %3864  ;;  %v2359_v5 = vadd.f32 %v5122_v34, %v5108_v49 }
 0x319   : > { %v3236_v46 = vmul.f32 %v3865_v31, %v5260_v4 }
 0x31a   : > { %v3150_v59 = vadd.f32 %v3149_v3, %v3148_v45  ;;  %v2868_v53 = vrot.slane %v2867_v6, 4 }
 0x31b   : > { %v3630_v61 = vpop.f32.mrb[216].mxu1  ;;  %v3238_v17 = vsel %vm3237_vm15, %v5260_v4, %v3236_v46 }
 0x31c   : > { %v5296_v22 = vadd.f32 %v3630_v61, %v2351_v24  ;;  %v2631_v41 = vpop.f32.mrb[217].mxu1  ;;  %v3151_v39 = vrot.slane %v3150_v59, 4  ;;  %v2869_v44 = vadd.f32 %v2868_v53, %v2867_v6  ;;  %v3241_v63 = vsel %vm3239_vm0, %v3240_v37, %v3238_v17 }
 0x31d   : > { %v5301_v10 = vadd.f32 %v2631_v41, %v2343_v40  ;;  %v3631_v15 = vpop.f32.mrb[218].mxu1  ;;  %v5331_v8 = vsel %vm3277_vm11, %v3241_v63, %v5227_v60  ;;  %v2367_v41 = vadd.f32 %v5122_v34, %v5134_v19 }
 0x31e   : > { %v5306_v14 = vadd.f32 %v3631_v15, %v2354_v7  ;;  %v2634_v21 = vpop.f32.mrb[219].mxu1  ;;  %v2720_v2 = vmax.f32 %v5296_v22, 0.0  ;;  %v3152_v55 = vadd.f32 %v3151_v39, %v3150_v59  ;;  %v2870_v16 = vrot.slane %v2869_v44, 2 }
 0x31f   : > { %v2718_v36 = vmax.f32 %v5301_v10, 0.0  ;;  %v5310_v33 = vadd.f32 %v2634_v21, %v2346_v12  ;;  %v2370_v15 = vadd.f32 %v5122_v34, %v5146_v58 }
 0x320   : > { %v2721_v11 = vmax.f32 %v5306_v14, 0.0  ;;  %v2877_v40 = vsel %vm2726_vm1, %v2720_v2, 0.0  ;;  %v3153_v32 = vrot.slane %v3152_v55, 2  ;;  %v2871_v61 = vadd.f32 %v2870_v16, %v2869_v44 }
 0x321   : > { %v2719_v23 = vmax.f32 %v5310_v33, 0.0  ;;  %v2874_v54 = vsel %vm2726_vm1, %v2718_v36, 0.0 }
 0x322   : > { %v2879_v7 = vsel %vm2726_vm1, %v2721_v11, 0.0  ;;  %v3154_v4 = vadd.f32 %v3153_v32, %v3152_v55  ;;  %v2872_v20 = vrot.slane %v2871_v61, 1 }
 0x323   : > { %v2875_v25 = vsel %vm2726_vm1, %v2719_v23, 0.0 }
 0x324   : > { %v2876_v24 = vadd.f32 %v2875_v25, %v2874_v54  ;;  %v3155_v12 = vrot.slane %v3154_v4, 1  ;;  %v2873_v0 = vadd.f32 %v2872_v20, %v2871_v61 }
 0x326   : > { %v2878_v29 = vadd.f32 %v2877_v40, %v2876_v24  ;;  %v2901_v21 = vmul.f32 0.015625, %v2873_v0  ;;  %v3156_v31 = vadd.f32 %v3155_v12, %v3154_v4 }
 0x328   : > { %v2880_v1 = vadd.f32 %v2879_v7, %v2878_v29  ;;  %v2951_v53 = vsub.f32 %v2710_v56, %v2901_v21  ;;  %v2952_v49 = vsub.f32 %v2711_v48, %v2901_v21  ;;  %v2953_v58 = vsub.f32 %v2712_v18, %v2901_v21 }
 0x329   : > { %v2954_v46 = vsub.f32 %v2713_v47, %v2901_v21  ;;  %v2955_v39 = vsub.f32 %v2714_v35, %v2901_v21  ;;  %v2956_v37 = vsub.f32 %v2715_v38, %v2901_v21  ;;  %v2957_v44 = vsub.f32 %v2716_v42, %v2901_v21 }
 0x32a   : > { %v2958_v28 = vsub.f32 %v2717_v43, %v2901_v21  ;;  %v3015_v56 = vmul.f32 %v2951_v53, %v2951_v53  ;;  %v3016_v57 = vmul.f32 %v2952_v49, %v2952_v49  ;;  %v3017_v48 = vmul.f32 %v2953_v58, %v2953_v58 }
 0x32b   : > { %v3634_v60 = vpop.f32.mrb[220].mxu1  ;;  %v3204_v9 = vmul.f32 0.015873017, %v3156_v31  ;;  %v3018_v18 = vmul.f32 %v2954_v46, %v2954_v46  ;;  %v3019_v26 = vmul.f32 %v2955_v39, %v2955_v39  ;;  %v3020_v43 = vmul.f32 %v2956_v37, %v2956_v37 }
 0x32c   : > { %v5342_v45 = vadd.f32 %v3634_v60, %v2367_v41  ;;  %v2647_v27 = vpop.f32.mrb[221].mxu1  ;;  %v3157_v30 = vsel %vm2726_vm1, %v3015_v56, 0.0  ;;  %v3158_v47 = vsel %vm2726_vm1, %v3016_v57, 0.0  ;;  %v3160_v50 = vsel %vm2726_vm1, %v3017_v48, 0.0 }
 0x32d   : > { %v5344_v3 = vadd.f32 %v2647_v27, %v2359_v5  ;;  %v3635_v6 = vpop.f32.mrb[222].mxu1  ;;  %v3159_v35 = vadd.f32 %v3158_v47, %v3157_v30  ;;  %3866 = vrsqrt.f32 %v3204_v9  ;;  %v3162_v54 = vsel %vm2726_vm1, %v3018_v18, 0.0 }
 0x32e   : > { %v5346_v59 = vadd.f32 %v3635_v6, %v2370_v15  ;;  %v2650_v19 = vpop.f32.mrb[223].mxu1  ;;  %v2724_v25 = vmax.f32 %v5342_v45, 0.0  ;;  %v3282_v34 = vsel %vm3281_vm2, %v2901_v21, %v5279_v62  ;;  %v3021_v63 = vmul.f32 %v2957_v44, %v2957_v44 }
 0x32f   : > { %v2722_v42 = vmax.f32 %v5344_v3, 0.0  ;;  %v3161_v13 = vadd.f32 %v3160_v50, %v3159_v35  ;;  %v2651_v38 = vadd.f32 %v2650_v19, %v2362_v51  ;;  %v3164_v16 = vsel %vm2726_vm1, %v3019_v26, 0.0 }
 0x330   : > { %v2725_v32 = vmax.f32 %v5346_v59, 0.0  ;;  %v3022_v61 = vmul.f32 %v2958_v28, %v2958_v28  ;;  %v3166_v7 = vsel %vm2726_vm1, %v3020_v43, 0.0  ;;  %v2885_v41 = vsel %vm2726_vm1, %v2724_v25, 0.0 }
 0x331   : > { %v2881_v17 = vsel %vm2726_vm1, %v2722_v42, 0.0  ;;  %v3163_v55 = vadd.f32 %v3162_v54, %v3161_v13  ;;  %v2723_v52 = vmax.f32 %v2651_v38, 0.0  ;;  %vm3244_vm3 = vcmp.eq.f32.partialorder %v3204_v9, inf }
 0x332   : > { %v2882_v24 = vadd.f32 %v2881_v17, %v2880_v1  ;;  %v3168_v1 = vsel %vm2726_vm1, %v3021_v63, 0.0  ;;  %v2887_v62 = vsel %vm2726_vm1, %v2725_v32, 0.0  ;;  %v3170_v0 = vsel %vm2726_vm1, %v3022_v61, 0.0 }
 0x333   : > { %v3165_v40 = vadd.f32 %v3164_v16, %v3163_v55  ;;  %v2883_v29 = vsel %vm2726_vm1, %v2723_v52, 0.0  ;;  %v3247_v6 = vand.u32 2147483648, %v3204_v9  ;;  %vm3246_vm4 = vcmp.eq.f32.partialorder %v3204_v9, 0.0 }
 0x334   : > { %v2884_v4 = vadd.f32 %v2883_v29, %v2882_v24 }
 0x335   : > { %v3167_v20 = vadd.f32 %v3166_v7, %v3165_v40 }
 0x336   : > { %v2886_v12 = vadd.f32 %v2885_v41, %v2884_v4 }
 0x337   : > { %v3169_v5 = vadd.f32 %v3168_v1, %v3167_v20  ;;  %v3867_v15 = vpop.eup %3866 }
 0x338   : > { %v2888_v60 = vadd.f32 %v2887_v62, %v2886_v12  ;;  %v3243_v21 = vmul.f32 %v3867_v15, %v3204_v9 }
 0x339   : > { %v3171_v45 = vadd.f32 %v3170_v0, %v3169_v5 }
 0x33a   : > { %v2889_v27 = vrot.slane %v2888_v60, 4  ;;  %v3245_v59 = vsel %vm3244_vm3, %v3204_v9, %v3243_v21 }
 0x33b   : > { %v3172_v3 = vrot.slane %v3171_v45, 4  ;;  %v3248_v53 = vsel %vm3246_vm4, %v3247_v6, %v3245_v59 }
 0x33c   : > { %v2890_v31 = vadd.f32 %v2889_v27, %v2888_v60  ;;  %v3298_v58 = vsel %vm3279_vm14, %v3248_v53, %v5331_v8 }
 0x33d   : > { %v3173_v19 = vadd.f32 %v3172_v3, %v3171_v45 }
 0x33e   : > { %v2891_v49 = vrot.slane %v2890_v31, 2 }
 0x33f   : > { %v3174_v46 = vrot.slane %v3173_v19, 2 }
 0x340   : > { %v2892_v39 = vadd.f32 %v2891_v49, %v2890_v31 }
 0x341   : > { %v3175_v37 = vadd.f32 %v3174_v46, %v3173_v19 }
 0x342   : > { %v2893_v44 = vrot.slane %v2892_v39, 1 }
 0x343   : > { %v3176_v28 = vrot.slane %v3175_v37, 1 }
 0x344   : > { %v2894_v56 = vadd.f32 %v2893_v44, %v2892_v39 }
 0x345   : > { %v3177_v57 = vadd.f32 %v3176_v28, %v3175_v37 }
 0x346   : > { %v2902_v48 = vmul.f32 0.015625, %v2894_v56 }
 0x347   : > { %v3205_v50 = vmul.f32 0.015873017, %v3177_v57 }
 0x348   : > { %v2959_v18 = vsub.f32 %v2718_v36, %v2902_v48  ;;  %v2960_v9 = vsub.f32 %v2719_v23, %v2902_v48  ;;  %v2961_v30 = vsub.f32 %v2720_v2, %v2902_v48  ;;  %v2962_v8 = vsub.f32 %v2721_v11, %v2902_v48 }
 0x349   : > { %v2963_v47 = vsub.f32 %v2722_v42, %v2902_v48  ;;  %v2964_v51 = vsub.f32 %v2723_v52, %v2902_v48  ;;  %v2965_v35 = vsub.f32 %v2724_v25, %v2902_v48  ;;  %v2966_v26 = vsub.f32 %v2725_v32, %v2902_v48 }
 0x34a   : > { %v3023_v13 = vmul.f32 %v2959_v18, %v2959_v18  ;;  %v3024_v38 = vmul.f32 %v2960_v9, %v2960_v9  ;;  %v3025_v43 = vmul.f32 %v2961_v30, %v2961_v30  ;;  %v3026_v54 = vmul.f32 %v2962_v8, %v2962_v8 }
 0x34b   : > { %v3027_v22 = vmul.f32 %v2963_v47, %v2963_v47  ;;  %3868 = vrsqrt.f32 %v3205_v50  ;;  %v3284_v23 = vsel %vm3283_vm5, %v2902_v48, %v3282_v34  ;;  %v3028_v11 = vmul.f32 %v2964_v51, %v2964_v51 }
 0x34c   : > { %v3178_v10 = vsel %vm2726_vm1, %v3023_v13, 0.0  ;;  %v3179_v36 = vsel %vm2726_vm1, %v3024_v38, 0.0  ;;  %v3181_v2 = vsel %vm2726_vm1, %v3025_v43, 0.0  ;;  %v3183_v42 = vsel %vm2726_vm1, %v3026_v54, 0.0 }
 0x34d   : > { %v3180_v33 = vadd.f32 %v3179_v36, %v3178_v10  ;;  %v3029_v17 = vmul.f32 %v2965_v35, %v2965_v35  ;;  %v3185_v55 = vsel %vm2726_vm1, %v3027_v22, 0.0  ;;  %v3030_v52 = vmul.f32 %v2966_v26, %v2966_v26 }
 0x34e   : > { %v3187_v63 = vsel %vm2726_vm1, %v3028_v11, 0.0  ;;  %vm3251_vm6 = vcmp.eq.f32.partialorder %v3205_v50, inf  ;;  %v3254_v4 = vand.u32 2147483648, %v3205_v50  ;;  %vm3253_vm7 = vcmp.eq.f32.partialorder %v3205_v50, 0.0 }
 0x34f   : > { %v3182_v14 = vadd.f32 %v3181_v2, %v3180_v33  ;;  %v3189_v40 = vsel %vm2726_vm1, %v3029_v17, 0.0  ;;  %v3191_v61 = vsel %vm2726_vm1, %v3030_v52, 0.0 }
 0x351   : > { %v3184_v25 = vadd.f32 %v3183_v42, %v3182_v14 }
 0x353   : > { %v3186_v24 = vadd.f32 %v3185_v55, %v3184_v25 }
 0x355   : > { %v3188_v16 = vadd.f32 %v3187_v63, %v3186_v24  ;;  %v3869_v29 = vpop.eup %3868 }
 0x356   : > { %v3250_v34 = vmul.f32 %v3869_v29, %v3205_v50 }
 0x357   : > { %v3190_v32 = vadd.f32 %v3189_v40, %v3188_v16 }
 0x358   : > { %v3252_v41 = vsel %vm3251_vm6, %v3205_v50, %v3250_v34 }
 0x359   : > { %v3192_v7 = vadd.f32 %v3191_v61, %v3190_v32  ;;  %v3255_v1 = vsel %vm3253_vm7, %v3254_v4, %v3252_v41 }
 0x35a   : > { %v3299_v5 = vsel %vm3281_vm2, %v3255_v1, %v3298_v58 }
 0x35b   : > { %v3193_v20 = vrot.slane %v3192_v7, 4 }
 0x35d   : > { %v3194_v12 = vadd.f32 %v3193_v20, %v3192_v7 }
 0x35f   : > { %v3195_v62 = vrot.slane %v3194_v12, 2 }
 0x361   : > { %v3196_v0 = vadd.f32 %v3195_v62, %v3194_v12 }
 0x363   : > { %v3197_v60 = vrot.slane %v3196_v0, 1 }
 0x365   : > { %v3198_v15 = vadd.f32 %v3197_v60, %v3196_v0 }
 0x367   : > { %v3206_v45 = vmul.f32 0.015873017, %v3198_v15 }
 0x369   : > { %3870 = vrsqrt.f32 %v3206_v45  ;;  %vm3258_vm8 = vcmp.eq.f32.partialorder %v3206_v45, inf  ;;  %v3261_v3 = vand.u32 2147483648, %v3206_v45  ;;  %vm3260_vm9 = vcmp.eq.f32.partialorder %v3206_v45, 0.0 }
 0x373   : > { %v3871_v27 = vpop.eup %3870 }
 0x374   : > { %v3257_v21 = vmul.f32 %v3871_v27, %v3206_v45 }
 0x376   : > { %v3259_v6 = vsel %vm3258_vm8, %v3206_v45, %v3257_v21 }
 0x377   : > { %v3262_v31 = vsel %vm3260_vm9, %v3261_v3, %v3259_v6 }
 0x378   : > { %v3300_v59 = vsel %vm3283_vm5, %v3262_v31, %v3299_v5 }
 0x379   : > { %3301 = vrot.lane.b32.xlu0 %v3300_v59, %s3883_s17 }
 0x3eb   : > { %v3302_v19 = vpop.permute.xlu0 %3301 }
 0x3ec   : > { %v3304_v53 = vsel %vm2726_vm1, %v3284_v23, %v3302_v19 }
 0x3ed   : > { %3305 = vst [vmem:[%s200_s22] sm:$0xff] %v3304_v53 }
 0x3ee PF: > { %s14_s15 = sadd.s32 1, %s3880_s15  }
 0x3ef   : > { %p11_p5 = scmp.ge.s32.totalorder %s14_s15, 4  }
 0x3f1   :  { %13 = sbr.rel (!%p11_p5) target bundleno = 1 (0x1), region = 66 }

</bundles_post_ra>
